<compile_context>
chip_gen: v7x
topology: tpu7x:2x2x1
jax: 0.10.0
libtpu: 0.0.40
codegen_flags: <defaults>
</compile_context>

<pallas_src>
import functools

import jax
import jax.numpy as jnp
from jax.experimental import pallas as pl
from jax.experimental.pallas import tpu as pltpu


_SLOT = 128   # lane-padded width of one segment-slot channel block (96 -> 128)


# ----------------------------------------------------------------------------
# Fused Pallas kernel: stage1 (+view quirk) -> stage2 -> global pool -> fc
# ----------------------------------------------------------------------------

def _eco_fused_kernel(x_ref, w1_ref, w2_ref, wfc_ref, bfc_ref, o_ref, *, ns):
    """One grid step == one batch element.

    x_ref  : (1, hw, 3*ns)  channels-last input tile
    w1_ref : (3*ns, ns*128) stage-1 weight with the ECO view-quirk pre-scattered
    w2_ref : (128, 512)     stage-2 weight, rows zero-padded 96 -> 128
    wfc_ref: (512, ncp)     fc weight, cols zero-padded num_classes -> 128
    bfc_ref: (1, ncp)       fc bias, zero-padded
    o_ref  : (1, 1, ncp)    lane-dense output
    """
    hw = x_ref.shape[1]
    c2 = w2_ref.shape[1]                                   # 512
    x = x_ref[0]                                           # (hw, 3*ns)
    w2 = w2_ref[...]                                       # hoist VMEM loads
    wfc = wfc_ref[...]
    bfc = bfc_ref[...]

    # Stage 1: one matmul emits the post-view-quirk features for ALL segment
    # slots side by side in lanes: column block sp*128:(sp+1)*128 is slot sp.
    x5_all = jnp.dot(x, w1_ref[...], preferred_element_type=jnp.float32)

    # Stage 2 + global pooling accumulation (all in VMEM, nothing hits HBM).
    acc = jnp.zeros((1, c2), jnp.float32)
    for sp in range(ns):                                   # static unroll, ns small
        x5 = x5_all[:, sp * _SLOT:(sp + 1) * _SLOT]        # lane-aligned slice
        f2 = jnp.dot(x5, w2, preferred_element_type=jnp.float32)   # (hw, 512)
        acc = acc + jnp.sum(f2, axis=0, keepdims=True)

    pooled = acc * (1.0 / (ns * hw))                       # avg_pool3d, (1, 512)
    logits = jnp.dot(pooled, wfc,
                     preferred_element_type=jnp.float32) + bfc     # (1, ncp)
    o_ref[0] = logits


# ----------------------------------------------------------------------------
# Host-side weight folding (tiny, done once per call)
# ----------------------------------------------------------------------------

def _fold_stage1_weight(w_bn, ns, dtype=jnp.float32):
    """Fold the 3->96 pointwise weight AND the ECO view-quirk
    x.view(bs, 96, ns, h, w) into one pre-scattered matrix of shape
    (3*ns, ns*128).

    Column sp*128 + c' holds the weights producing channel c' of segment slot
    sp *after* the view quirk (flat channel k = c'*ns + sp maps to source
    segment k // 96 and source channel k % 96); rows follow the channels-last
    input order (segment-major, rgb-minor). Lanes 96..127 of each slot are 0.
    """
    c1 = w_bn.shape[1]                                     # 96
    assert c1 <= _SLOT
    cp = jnp.arange(c1)
    spv = jnp.arange(ns)
    k = cp[None, :] * ns + spv[:, None]                    # (ns, c1)
    s_src = k // c1                                        # source segment
    c_src = k % c1                                         # source channel
    col = spv[:, None] * _SLOT + cp[None, :]               # (ns, c1)
    w1 = jnp.zeros((3 * ns, ns * _SLOT), dtype)
    for r in range(3):
        w1 = w1.at[3 * s_src + r, col].set(w_bn[r, c_src].astype(dtype))
    return w1


# ----------------------------------------------------------------------------
# ECO forward (Pallas) and a pure-jnp reference
# ----------------------------------------------------------------------------

def eco_forward(x, params, num_segments):
    bs, c_ns, h, w = x.shape
    ns = num_segments
    hw = h * w
    assert c_ns == 3 * ns
    assert hw % 8 == 0

    # Single tiny layout pass: channels-last so every stage is a dense matmul.
    x_cl = jnp.transpose(x.reshape(bs, 3 * ns, hw), (0, 2, 1))   # (bs, hw, 3*ns)

    # --- bninception_pretrained stand-in (1x1 conv 3->96) + ECO view quirk ---
    # TODO(synk): full BNInception backbone definition not provided in the
    # reference source; using a deterministic pointwise stand-in on the hot path.
    w1 = _fold_stage1_weight(params["w_bn"], ns)                 # (3*ns, ns*128)

    # --- resnet3d stand-in (pointwise 96->512), rows zero-padded 96 -> 128 ---
    # TODO(synk): resnet3d (3D ResNet tail) definition not provided; stand-in.
    c2 = params["w_r3d"].shape[1]                                # 512
    w2 = jnp.zeros((_SLOT, c2), jnp.float32).at[:96, :].set(params["w_r3d"])

    # --- fc head, output lane-padded num_classes -> multiple of 128 ----------
    nc = params["w_fc"].shape[1]
    ncp = ((nc + _SLOT - 1) // _SLOT) * _SLOT
    wfc = jnp.zeros((c2, ncp), jnp.float32).at[:, :nc].set(params["w_fc"])
    bfc = jnp.zeros((1, ncp), jnp.float32).at[0, :nc].set(params["b_fc"])

    kernel = functools.partial(_eco_fused_kernel, ns=ns)
    out = pl.pallas_call(
        kernel,
        out_shape=jax.ShapeDtypeStruct((bs, 1, ncp), jnp.float32),
        grid=(bs,),
        in_specs=[
            pl.BlockSpec((1, hw, 3 * ns), lambda b: (b, 0, 0)),
            pl.BlockSpec((3 * ns, ns * _SLOT), lambda b: (0, 0)),
            pl.BlockSpec((_SLOT, c2), lambda b: (0, 0)),
            pl.BlockSpec((c2, ncp), lambda b: (0, 0)),
            pl.BlockSpec((1, ncp), lambda b: (0, 0)),
        ],
        out_specs=pl.BlockSpec((1, 1, ncp), lambda b: (b, 0, 0)),
        compiler_params=pltpu.CompilerParams(
            dimension_semantics=("parallel",)),
    )(x_cl, w1, w2, wfc, bfc)

    return out.reshape(bs, ncp)[:, :nc]


def eco_forward_ref(x, params, num_segments):
    bs, c_ns, h, w = x.shape
    ns = num_segments
    x = x.reshape(bs * ns, 3, h, w)
    xf = jnp.transpose(x, (0, 2, 3, 1)).reshape(-1, 3)
    f1 = (xf @ params["w_bn"]).reshape(bs * ns, h, w, 96).transpose(0, 3, 1, 2)
    x5 = f1.reshape(bs, 96, ns, h, w)
    xr = jnp.transpose(x5, (0, 2, 3, 4, 1)).reshape(-1, 96)
    f2 = (xr @ params["w_r3d"]).reshape(bs, ns * h * w, 512)
    pooled = f2.mean(axis=1)
    return pooled @ params["w_fc"] + params["b_fc"]


# ----------------------------------------------------------------------------
# main
# ----------------------------------------------------------------------------

if __name__ == "__main__":
    num_classes = 10
    num_segments = 4
    bs, h, w = 2, 28, 28   # 28x28 matches the feature-map size hard-coded in ECO

    key = jax.random.PRNGKey(0)
    k_x, k_bn, k_r3d, k_fc, k_b = jax.random.split(key, 5)
    x = jax.random.normal(k_x, (bs, 3 * num_segments, h, w), jnp.float32)
    params = {
        "w_bn":  jax.random.normal(k_bn,  (3, 96),           jnp.float32) * 0.10,
        "w_r3d": jax.random.normal(k_r3d, (96, 512),          jnp.float32) * 0.05,
        "w_fc":  jax.random.normal(k_fc,  (512, num_classes), jnp.float32) * 0.02,
        "b_fc":  jax.random.normal(k_b,   (num_classes,),     jnp.float32) * 0.01,
    }

    out = eco_forward(x, params, num_segments)
    out = jax.block_until_ready(out)

    ref = eco_forward_ref(x, params, num_segments)
    assert out.shape == (bs, num_classes), out.shape
    assert jnp.allclose(out, ref, rtol=1e-4, atol=1e-4), \
        float(jnp.max(jnp.abs(out - ref)))

    print("KERNEL_OK")
</pallas_src>

<mosaic_0001>
module attributes {stable_mosaic.version = 11 : i64} {
  func.func @_eco_fused_kernel(%arg0: i32, %arg1: memref<1x784x12xf32, #tpu.memory_space<vmem>>, %arg2: memref<12x512xf32, #tpu.memory_space<vmem>>, %arg3: memref<128x512xf32, #tpu.memory_space<vmem>>, %arg4: memref<512x128xf32, #tpu.memory_space<vmem>>, %arg5: memref<1x128xf32, #tpu.memory_space<vmem>>, %arg6: memref<1x1x128xf32, #tpu.memory_space<vmem>>) attributes {dimension_semantics = [#tpu.dimension_semantics<parallel>], iteration_bounds = array<i64: 2>, scalar_prefetch = 0 : i64, scratch_operands = 0 : i64, tpu.core_type = #tpu.core_type<tc>, window_params = [{transform_indices = @transform_0, window_bounds = array<i64: 1, 784, 12>}, {pipeline_mode = #tpu.pipeline_mode<synchronous>, transform_indices = @transform_1, window_bounds = array<i64: 12, 512>}, {pipeline_mode = #tpu.pipeline_mode<synchronous>, transform_indices = @transform_2, window_bounds = array<i64: 128, 512>}, {pipeline_mode = #tpu.pipeline_mode<synchronous>, transform_indices = @transform_3, window_bounds = array<i64: 512, 128>}, {pipeline_mode = #tpu.pipeline_mode<synchronous>, transform_indices = @transform_4, window_bounds = array<i64: 1, 128>}, {transform_indices = @transform_5, window_bounds = array<i64: 1, 1, 128>}]} {
    %c0 = arith.constant 0 : index
    %c0_0 = arith.constant 0 : index
    %c0_1 = arith.constant 0 : index
    %0 = vector.load %arg1[%c0, %c0_0, %c0_1] : memref<1x784x12xf32, #tpu.memory_space<vmem>>, vector<1x784x12xf32>
    %1 = vector.shape_cast %0 : vector<1x784x12xf32> to vector<784x12xf32>
    %c0_2 = arith.constant 0 : index
    %c0_3 = arith.constant 0 : index
    %2 = vector.load %arg3[%c0_2, %c0_3] : memref<128x512xf32, #tpu.memory_space<vmem>>, vector<128x512xf32>
    %c0_4 = arith.constant 0 : index
    %c0_5 = arith.constant 0 : index
    %3 = vector.load %arg4[%c0_4, %c0_5] : memref<512x128xf32, #tpu.memory_space<vmem>>, vector<512x128xf32>
    %c0_6 = arith.constant 0 : index
    %c0_7 = arith.constant 0 : index
    %4 = vector.load %arg5[%c0_6, %c0_7] : memref<1x128xf32, #tpu.memory_space<vmem>>, vector<1x128xf32>
    %c0_8 = arith.constant 0 : index
    %c0_9 = arith.constant 0 : index
    %5 = vector.load %arg2[%c0_8, %c0_9] : memref<12x512xf32, #tpu.memory_space<vmem>>, vector<12x512xf32>
    %cst = arith.constant dense<0.000000e+00> : vector<784x512xf32>
    %6 = tpu.matmul %1, %5, %cst {dimension_numbers = #tpu.dot_dimension_numbers<[1], [0], [0], [1], [0, 0, 1, 1], [], []>} : vector<784x12xf32>, vector<12x512xf32>, vector<784x512xf32> -> vector<784x512xf32>
    %cst_10 = arith.constant 0.000000e+00 : f32
    %7 = vector.broadcast %cst_10 : f32 to vector<1x512xf32>
    %8 = vector.extract_strided_slice %6 {offsets = [0, 0], sizes = [784, 128], strides = [1, 1]} : vector<784x512xf32> to vector<784x128xf32>
    %cst_11 = arith.constant dense<0.000000e+00> : vector<784x512xf32>
    %9 = tpu.matmul %8, %2, %cst_11 {dimension_numbers = #tpu.dot_dimension_numbers<[1], [0], [0], [1], [0, 0, 1, 1], [], []>} : vector<784x128xf32>, vector<128x512xf32>, vector<784x512xf32> -> vector<784x512xf32>
    %cst_12 = arith.constant dense<0.000000e+00> : vector<512xf32>
    %10 = vector.multi_reduction <add>, %9, %cst_12 [0] : vector<784x512xf32> to vector<512xf32>
    %11 = vector.shape_cast %10 : vector<512xf32> to vector<1x512xf32>
    %12 = arith.addf %7, %11 : vector<1x512xf32>
    %13 = vector.extract_strided_slice %6 {offsets = [0, 128], sizes = [784, 128], strides = [1, 1]} : vector<784x512xf32> to vector<784x128xf32>
    %cst_13 = arith.constant dense<0.000000e+00> : vector<784x512xf32>
    %14 = tpu.matmul %13, %2, %cst_13 {dimension_numbers = #tpu.dot_dimension_numbers<[1], [0], [0], [1], [0, 0, 1, 1], [], []>} : vector<784x128xf32>, vector<128x512xf32>, vector<784x512xf32> -> vector<784x512xf32>
    %cst_14 = arith.constant dense<0.000000e+00> : vector<512xf32>
    %15 = vector.multi_reduction <add>, %14, %cst_14 [0] : vector<784x512xf32> to vector<512xf32>
    %16 = vector.shape_cast %15 : vector<512xf32> to vector<1x512xf32>
    %17 = arith.addf %12, %16 : vector<1x512xf32>
    %18 = vector.extract_strided_slice %6 {offsets = [0, 256], sizes = [784, 128], strides = [1, 1]} : vector<784x512xf32> to vector<784x128xf32>
    %cst_15 = arith.constant dense<0.000000e+00> : vector<784x512xf32>
    %19 = tpu.matmul %18, %2, %cst_15 {dimension_numbers = #tpu.dot_dimension_numbers<[1], [0], [0], [1], [0, 0, 1, 1], [], []>} : vector<784x128xf32>, vector<128x512xf32>, vector<784x512xf32> -> vector<784x512xf32>
    %cst_16 = arith.constant dense<0.000000e+00> : vector<512xf32>
    %20 = vector.multi_reduction <add>, %19, %cst_16 [0] : vector<784x512xf32> to vector<512xf32>
    %21 = vector.shape_cast %20 : vector<512xf32> to vector<1x512xf32>
    %22 = arith.addf %17, %21 : vector<1x512xf32>
    %23 = vector.extract_strided_slice %6 {offsets = [0, 384], sizes = [784, 128], strides = [1, 1]} : vector<784x512xf32> to vector<784x128xf32>
    %cst_17 = arith.constant dense<0.000000e+00> : vector<784x512xf32>
    %24 = tpu.matmul %23, %2, %cst_17 {dimension_numbers = #tpu.dot_dimension_numbers<[1], [0], [0], [1], [0, 0, 1, 1], [], []>} : vector<784x128xf32>, vector<128x512xf32>, vector<784x512xf32> -> vector<784x512xf32>
    %cst_18 = arith.constant dense<0.000000e+00> : vector<512xf32>
    %25 = vector.multi_reduction <add>, %24, %cst_18 [0] : vector<784x512xf32> to vector<512xf32>
    %26 = vector.shape_cast %25 : vector<512xf32> to vector<1x512xf32>
    %27 = arith.addf %22, %26 : vector<1x512xf32>
    %cst_19 = arith.constant 3.18877544E-4 : f32
    %28 = vector.broadcast %cst_19 : f32 to vector<1x512xf32>
    %29 = arith.mulf %27, %28 : vector<1x512xf32>
    %cst_20 = arith.constant dense<0.000000e+00> : vector<1x128xf32>
    %30 = tpu.matmul %29, %3, %cst_20 {dimension_numbers = #tpu.dot_dimension_numbers<[1], [0], [0], [1], [0, 0, 1, 1], [], []>} : vector<1x512xf32>, vector<512x128xf32>, vector<1x128xf32> -> vector<1x128xf32>
    %31 = arith.addf %30, %4 : vector<1x128xf32>
    %c0_21 = arith.constant 0 : index
    %c0_22 = arith.constant 0 : index
    %c0_23 = arith.constant 0 : index
    %32 = vector.load %arg6[%c0_21, %c0_22, %c0_23] : memref<1x1x128xf32, #tpu.memory_space<vmem>>, vector<1x1x128xf32>
    %33 = vector.shape_cast %32 : vector<1x1x128xf32> to vector<1x128xf32>
    %34 = vector.shape_cast %31 : vector<1x128xf32> to vector<1x1x128xf32>
    tpu.vector_store %arg6[%c0_21, %c0_22, %c0_23], %34 {strides = array<i32>} : memref<1x1x128xf32, #tpu.memory_space<vmem>>, vector<1x1x128xf32>,
    return
  }
  func.func @transform_0(%arg0: i32) -> (i32, i32, i32) {
    %c0_i32 = arith.constant 0 : i32
    %c0_i32_0 = arith.constant 0 : i32
    %c0_i32_1 = arith.constant 0 : i32
    return %arg0, %c0_i32, %c0_i32_0 : i32, i32, i32
  }
  func.func @transform_1(%arg0: i32) -> (i32, i32) {
    %c0_i32 = arith.constant 0 : i32
    %c0_i32_0 = arith.constant 0 : i32
    %c0_i32_1 = arith.constant 0 : i32
    return %c0_i32, %c0_i32_0 : i32, i32
  }
  func.func @transform_2(%arg0: i32) -> (i32, i32) {
    %c0_i32 = arith.constant 0 : i32
    %c0_i32_0 = arith.constant 0 : i32
    %c0_i32_1 = arith.constant 0 : i32
    return %c0_i32, %c0_i32_0 : i32, i32
  }
  func.func @transform_3(%arg0: i32) -> (i32, i32) {
    %c0_i32 = arith.constant 0 : i32
    %c0_i32_0 = arith.constant 0 : i32
    %c0_i32_1 = arith.constant 0 : i32
    return %c0_i32, %c0_i32_0 : i32, i32
  }
  func.func @transform_4(%arg0: i32) -> (i32, i32) {
    %c0_i32 = arith.constant 0 : i32
    %c0_i32_0 = arith.constant 0 : i32
    %c0_i32_1 = arith.constant 0 : i32
    return %c0_i32, %c0_i32_0 : i32, i32
  }
  func.func @transform_5(%arg0: i32) -> (i32, i32, i32) {
    %c0_i32 = arith.constant 0 : i32
    %c0_i32_0 = arith.constant 0 : i32
    %c0_i32_1 = arith.constant 0 : i32
    return %arg0, %c0_i32, %c0_i32_0 : i32, i32, i32
  }
}

</mosaic_0001>

<bundles_post_ra>
// kernel: tpu_custom_call.1
= control target key start
LH: loop header
LB: loop body
LE: loop exit
PB: predicated region body
PF: predicated region fallthrough
CT: control target
= control target key end

     0   :  { %10 = vsyncpa [#allocation3], 0  ;;  %s15072_s0 = inlined_call_operand.vmem [shape: f32[2,784,12], index: 0, kind: input, shape index: {}]   ;;  %s15073_s1 = inlined_call_operand.vmem [shape: f32[12,512], index: 1, kind: input, shape index: {}]   ;;  %s15074_s2 = inlined_call_operand.vmem [shape: f32[128,512], index: 2, kind: input, shape index: {}]   ;;  %s15075_s3 = inlined_call_operand.vmem [shape: f32[512,128], index: 3, kind: input, shape index: {}]   ;;  %s15076_s4 = inlined_call_operand.vmem [shape: f32[1,128], index: 4, kind: input, shape index: {}]   ;;  %s15077_s5 = inlined_call_operand.hbm [shape: f32[2,1,128], index: 5, kind: output, shape index: {}]  }
   0x1   :  { %12 = vsyncpa [#allocation3 + $0x1], 0  ;;  %s11473_s18 = smov 0   ;;  %s11475_s19 = smov 0  }
   0x2   :  { %s11477_s20 = smov 0   ;;  %s11479_s21 = smov 0  }
   0x3 LB: > { %s11494_s22 = sadd.s32 4294967295, %s11438_s21   ;;  %s9172_s23 = sadd.s32 4294967294, %s11438_s21   ;;  %s11438_s21 = sphi %s11479_s21, %s16139_s21   ;;  %s11434_s20 = sphi %s11477_s20, %s16138_s20   ;;  %s11430_s19 = sphi %s11475_s19, %s16137_s19   ;;  %s11426_s18 = sphi %s11473_s18, %s16136_s18  }
   0x4   : > { %s11498_s24 = sadd.s32 1, %s11438_s21   ;;  %s135_s25 = sadd.s32 1, %s11434_s20 }
   0x5   : > { %s132_s26 = ssub.s32 %s11438_s21, %s11498_s24  ;;  %p145_p0 = scmp.ne.s32.totalorder %s11434_s20, %s11430_s19 }
   0x6   : > { %p133_p1 = scmp.eq.s32.totalorder %s132_s26, 0  ;;  %p146_p2 = scmp.eq.s32.totalorder %s11494_s22, 1 }
   0x7   : > { %p151_p3 = scmp.ne.s32.totalorder %s11430_s19, %s11426_s18  ;;  %p152_p4 = scmp.eq.s32.totalorder %s9172_s23, 1 }
   0x8   : > { %s11509_s27 = scalar_select %p133_p1, %s11434_s20, %s135_s25  }
   0x9   : > { %p11511_p5 = por %p146_p2, %p145_p0  ;;  %p11515_p6 = por %p152_p4, %p151_p3 }
   0xa   : > { %p9175_p7 = scmp.ge.s32.totalorder %s11438_s21, 1  ;;  %p190_p8 = scmp.lt.s32.totalorder %s11438_s21, 3 }
   0xc   : > { %p191_p9 = pnand %p9175_p7, %p190_p8 }
   0xe   : > { %194 = sbr.rel (%p191_p9) target bundleno = 4000 (0xfa0), region = 40 }
  0x15   : > { %v450_v0 = vld [vmem:[%s15073_s1 + $0x8] sm:$0xff]  ;;  %vm752_vm0 = vcmask 1043456   ;;  %v449_v2 = vld [vmem:[%s15073_s1] sm:$0xff]  ;;  %vm11440_vm1 = vmmov 1   ;;  %v452_v6 = vld [vmem:[%s15073_s1 + $0x18] sm:$0xff]  ;;  %p217_p10 = scmp.lt.s32.totalorder %s11494_s22, 1 }
  0x16   : > { %v454_v1 = vld [vmem:[%s15073_s1 + $0x28] sm:$0xf]  ;;  %vm11530_vm2 = vmpackc.low %vm752_vm0, %vm11440_vm1  ;;  %v453_v5 = vld [vmem:[%s15073_s1 + $0x20] sm:$0xf]  ;;  %v15234_v11 = vmov 0.0   ;;  %vm457_vm3 = vcmask 97280  }
  0x17   : > { %v9450_v3 = vpack.c.bf16 %v454_v1, %v450_v0  ;;  %v9453_v7 = vpack.c.bf16 %v453_v5, %v449_v2  ;;  %v456_v8 = vld [vmem:[%s15073_s1 + $0x38] sm:$0xf]  ;;  %v451_v9 = vld [vmem:[%s15073_s1 + $0x10] sm:$0xff]  ;;  %829 = vmatprep.mubr.f32.mxu0 %v15234_v11  ;;  %1482 = vmatprep.mubr.f32.mxu1 %v15234_v11  ;;  %v321_v14 = vld [vmem:[%s15074_s2 + $0x8] sm:$0xff]  ;;  %s218_s9 = scalar_select %p217_p10, %s11494_s22, 1 }
  0x18   : > { %v455_v10 = vld [vmem:[%s15073_s1 + $0x30] sm:$0xf]  ;;  %v9456_v12 = vpack.c.bf16 %v456_v8, %v452_v6  ;;  %v325_v15 = vld [vmem:[%s15074_s2 + $0x28] sm:$0xff]  ;;  %v320_v16 = vld [vmem:[%s15074_s2] sm:$0xff]  ;;  %s9377_s26 = sshll.u32 %s11494_s22, 4  ;;  %s11442_s22 = smov [#allocation2]  }
  0x19   : > { %9452 = vmatprep.subr.msk.bf16.mxu0 %vm11530_vm2, %v9450_v3  ;;  %v9459_v13 = vpack.c.bf16 %v455_v10, %v451_v9  ;;  %v11566_v17 = vpack.c.bf16 %v325_v15, %v321_v14  ;;  %v324_v18 = vld [vmem:[%s15074_s2 + $0x20] sm:$0xff]  ;;  %v323_v19 = vld [vmem:[%s15074_s2 + $0x18] sm:$0xff]  ;;  %s11334_s23 = smul.u32 784, %s218_s9  ;;  %v322_v22 = vld [vmem:[%s15074_s2 + $0x10] sm:$0xff]  ;;  %s15030_s8 = scalar_lea.hbm %s15077_s5, %s9377_s26 }
  0x1a   : > { %9455 = vmatpush1.bf16.msk.msra.mxu0 %vm11530_vm2, %v9453_v7  ;;  %v327_v20 = vld [vmem:[%s15074_s2 + $0x38] sm:$0xff]  ;;  %9458 = vmatprep.subr.msk.bf16.mxu1 %vm11530_vm2, %v9456_v12  ;;  %v326_v23 = vld [vmem:[%s15074_s2 + $0x30] sm:$0xff]  ;;  %v329_v24 = vld [vmem:[%s15074_s2 + $0x48] sm:$0xff]  ;;  %v11593_v25 = vpack.c.bf16 %v324_v18, %v320_v16  ;;  %s11380_s11 = sshll.u32 %s11442_s22, 4  ;;  %s11381_s11 = int_to_ptr.vmem [resolvable:$false] %s11380_s11 }
  0x1b   : > { %15453 = vst [vmem:[#allocation5_spill] sm:$0xff] %v11566_v17  ;;  %v11579_v21 = vpack.c.bf16 %v327_v20, %v323_v19  ;;  %9461 = vmatpush1.bf16.msk.msra.mxu1 %vm11530_vm2, %v9459_v13  ;;  %9463 = vmatprep.subr.bf16.mxu0 %v11566_v17  ;;  %v11595_v26 = vpack.c.bf16 %v326_v23, %v322_v22  ;;  %v333_v27 = vld [vmem:[%s15074_s2 + $0x68] sm:$0xff]  ;;  %s11603_s13 = scalar_lea.vmem %s15072_s0, %s11334_s23  ;;  %v331_v28 = vld [vmem:[%s15074_s2 + $0x58] sm:$0xff]  ;;  %v328_v32 = vld [vmem:[%s15074_s2 + $0x40] sm:$0xff]  ;;  %s11382_s12 = scalar_lea.vmem %s11381_s11, 32 }
  0x1c   : > { %v335_v29 = vld [vmem:[%s15074_s2 + $0x78] sm:$0xff]  ;;  %v222_v30 = vld [vmem:[%s11603_s13] sm:$0xff]  ;;  %v11613_v31 = vpack.c.bf16 %v333_v27, %v329_v24  ;;  %v223_v35 = vld [vmem:[%s11603_s13 + $0x8] sm:$0xff] }
  0x1d   : > { %15454 = vst [vmem:[#allocation6_spill] sm:$0xff] %v11579_v21  ;;  %9495 = vmatprep.subr.bf16.mxu1 %v11579_v21  ;;  %v332_v33 = vld [vmem:[%s15074_s2 + $0x60] sm:$0xff]  ;;  %v11621_v34 = vpack.c.bf16 %v335_v29, %v331_v28  ;;  %9179 = vmatmul.mubr.msk.f32.vlgmr.msra.gmra.mrb[0].mxu0 %vm457_vm3, %v222_v30  ;;  %v330_v36 = vld [vmem:[%s15074_s2 + $0x50] sm:$0xff]  ;;  %v337_v41 = vld [vmem:[%s15074_s2 + $0x88] sm:$0xff] }
  0x1e   : > { %15455 = vst [vmem:[#allocation7_spill] sm:$0xff] %v11613_v31  ;;  %9279 = vmatmul.mubr.msk.f32.vlgmr.msra.gmra.mrb[0].mxu1 %vm457_vm3, %v222_v30  ;;  %9465 = vmatpush1.bf16.msra.mxu0 %v11593_v25  ;;  %v11633_v37 = vpack.c.bf16 %v332_v33, %v328_v32  ;;  %v334_v38 = vld [vmem:[%s15074_s2 + $0x70] sm:$0xff]  ;;  %v341_v42 = vld [vmem:[%s15074_s2 + $0xa8] sm:$0xff]  ;;  %v336_v43 = vld [vmem:[%s15074_s2 + $0x80] sm:$0xff] }
  0x1f   : > { %15456 = vst [vmem:[#allocation8_spill] sm:$0xff] %v11621_v34  ;;  %9497 = vmatpush1.bf16.msra.mxu1 %v11595_v26  ;;  %835 = vmatprep.mubr.f32.mxu0 %v15234_v11  ;;  %v11642_v39 = vpack.c.bf16 %v334_v38, %v330_v36  ;;  %v224_v40 = vld [vmem:[%s11603_s13 + $0x10] sm:$0xff]  ;;  %v340_v44 = vld [vmem:[%s15074_s2 + $0xa0] sm:$0xff]  ;;  %v225_v45 = vld [vmem:[%s11603_s13 + $0x18] sm:$0xff]  ;;  %v11666_v46 = vpack.c.bf16 %v341_v42, %v337_v41 }
  0x20   : > { %1488 = vmatprep.mubr.f32.mxu1 %v15234_v11  ;;  %15457 = vst [vmem:[#allocation9_spill] sm:$0xff] %v11633_v37  ;;  %9467 = vmatprep.subr.bf16.mxu0 %v11613_v31  ;;  %v339_v47 = vld [vmem:[%s15074_s2 + $0x98] sm:$0xff]  ;;  %v11674_v49 = vpack.c.bf16 %v340_v44, %v336_v43  ;;  %v338_v51 = vld [vmem:[%s15074_s2 + $0x90] sm:$0xff]  ;;  %v226_v54 = vld [vmem:[%s11603_s13 + $0x20] sm:$0xff] }
  0x21   : > { %9499 = vmatprep.subr.bf16.mxu1 %v11621_v34  ;;  %9180 = vmatmul.mubr.msk.f32.gmra.mrb[2].mxu0 %vm457_vm3, %v223_v35  ;;  %15458 = vst [vmem:[#allocation10_spill] sm:$0xff] %v11642_v39  ;;  %15459 = vst [vmem:[#allocation11_spill] sm:$0xff] %v11666_v46  ;;  %v343_v48 = vld [vmem:[%s15074_s2 + $0xb8] sm:$0xff]  ;;  %v342_v52 = vld [vmem:[%s15074_s2 + $0xb0] sm:$0xff] }
  0x22   : > { %9280 = vmatmul.mubr.msk.f32.gmra.mrb[2].mxu1 %vm457_vm3, %v223_v35  ;;  %841 = vmatprep.mubr.f32.mxu0 %v15234_v11  ;;  %15460 = vst [vmem:[#allocation12_spill] sm:$0xff] %v11674_v49  ;;  %v11676_v50 = vpack.c.bf16 %v343_v48, %v339_v47  ;;  %v11685_v53 = vpack.c.bf16 %v342_v52, %v338_v51  ;;  %v345_v55 = vld [vmem:[%s15074_s2 + $0xc8] sm:$0xff]  ;;  %v344_v59 = vld [vmem:[%s15074_s2 + $0xc0] sm:$0xff]  ;;  %v347_v62 = vld [vmem:[%s15074_s2 + $0xd8] sm:$0xff] }
  0x23   : > { %1494 = vmatprep.mubr.f32.mxu1 %v15234_v11  ;;  %9469 = vmatpush1.bf16.msra.mxu0 %v11633_v37  ;;  %v349_v56 = vld [vmem:[%s15074_s2 + $0xe8] sm:$0xff]  ;;  %v348_v60 = vld [vmem:[%s15074_s2 + $0xe0] sm:$0xff]  ;;  %v351_v63 = vld [vmem:[%s15074_s2 + $0xf8] sm:$0xff] }
  0x24   : > { %9501 = vmatpush1.bf16.msra.mxu1 %v11642_v39  ;;  %15461 = vst [vmem:[#allocation13_spill] sm:$0xff] %v11676_v50  ;;  %9471 = vmatprep.subr.bf16.mxu0 %v11666_v46  ;;  %15462 = vst [vmem:[#allocation14_spill] sm:$0xff] %v11685_v53  ;;  %v227_v57 = vld [vmem:[%s11603_s13 + $0x28] sm:$0xff]  ;;  %v11706_v58 = vpack.c.bf16 %v349_v56, %v345_v55  ;;  %v11714_v61 = vpack.c.bf16 %v348_v60, %v344_v59  ;;  %v346_v0 = vld [vmem:[%s15074_s2 + $0xd0] sm:$0xff] }
  0x25   : > { %9181 = vmatmul.mubr.msk.f32.gmra.mrb[4].mxu0 %vm457_vm3, %v224_v40  ;;  %9503 = vmatprep.subr.bf16.mxu1 %v11676_v50  ;;  %v228_v1 = vld [vmem:[%s11603_s13 + $0x30] sm:$0xff]  ;;  %v11731_v2 = vpack.c.bf16 %v351_v63, %v347_v62  ;;  %v229_v5 = vld [vmem:[%s11603_s13 + $0x38] sm:$0xff]  ;;  %v230_v6 = vld [vmem:[%s11603_s13 + $0x40] sm:$0xff] }
  0x26   : > { %9281 = vmatmul.mubr.msk.f32.gmra.mrb[4].mxu1 %vm457_vm3, %v224_v40  ;;  %847 = vmatprep.mubr.f32.mxu0 %v15234_v11  ;;  %15463 = vst [vmem:[#allocation15_spill] sm:$0xff] %v11706_v58  ;;  %15464 = vst [vmem:[#allocation16_spill] sm:$0xff] %v11714_v61  ;;  %v350_v3 = vld [vmem:[%s15074_s2 + $0xf0] sm:$0xff]  ;;  %v231_v7 = vld [vmem:[%s11603_s13 + $0x48] sm:$0xff] }
  0x27   : > { %1500 = vmatprep.mubr.f32.mxu1 %v15234_v11  ;;  %9473 = vmatpush1.bf16.msra.mxu0 %v11674_v49  ;;  %15465 = vst [vmem:[#allocation17_spill] sm:$0xff] %v11731_v2  ;;  %v11737_v4 = vpack.c.bf16 %v350_v3, %v346_v0  ;;  %v232_v8 = vld [vmem:[%s11603_s13 + $0x50] sm:$0xff]  ;;  %v233_v9 = vld [vmem:[%s11603_s13 + $0x58] sm:$0xff]  ;;  %v234_v10 = vld [vmem:[%s11603_s13 + $0x60] sm:$0xff] }
  0x28   : > { %9505 = vmatpush1.bf16.msra.mxu1 %v11685_v53  ;;  %9475 = vmatprep.subr.bf16.mxu0 %v11706_v58  ;;  %v235_v12 = vld [vmem:[%s11603_s13 + $0x68] sm:$0xff]  ;;  %v236_v13 = vld [vmem:[%s11603_s13 + $0x70] sm:$0xff]  ;;  %v237_v14 = vld [vmem:[%s11603_s13 + $0x78] sm:$0xff] }
  0x29   : > { %9182 = vmatmul.mubr.msk.f32.gmra.mrb[6].mxu0 %vm457_vm3, %v225_v45  ;;  %15466 = vst [vmem:[#allocation18_spill] sm:$0xff] %v11737_v4  ;;  %9507 = vmatprep.subr.bf16.mxu1 %v11731_v2  ;;  %v238_v15 = vld [vmem:[%s11603_s13 + $0x80] sm:$0xff]  ;;  %v239_v16 = vld [vmem:[%s11603_s13 + $0x88] sm:$0xff]  ;;  %v240_v22 = vld [vmem:[%s11603_s13 + $0x90] sm:$0xff] }
  0x2a   : > { %9282 = vmatmul.mubr.msk.f32.gmra.mrb[6].mxu1 %vm457_vm3, %v225_v45  ;;  %853 = vmatprep.mubr.f32.mxu0 %v15234_v11  ;;  %v353_v18 = vld [vmem:[%s15074_s2 + $0x108] sm:$0xff]  ;;  %v352_v23 = vld [vmem:[%s15074_s2 + $0x100] sm:$0xff]  ;;  %v355_v27 = vld [vmem:[%s15074_s2 + $0x118] sm:$0xff] }
  0x2b   : > { %1506 = vmatprep.mubr.f32.mxu1 %v15234_v11  ;;  %9477 = vmatpush1.bf16.msra.mxu0 %v11714_v61  ;;  %v357_v19 = vld [vmem:[%s15074_s2 + $0x128] sm:$0xff]  ;;  %v356_v24 = vld [vmem:[%s15074_s2 + $0x120] sm:$0xff]  ;;  %v359_v29 = vld [vmem:[%s15074_s2 + $0x138] sm:$0xff] }
  0x2c   : > { %9509 = vmatpush1.bf16.msra.mxu1 %v11737_v4  ;;  %v11802_v20 = vpack.c.bf16 %v357_v19, %v353_v18  ;;  %v11818_v28 = vpack.c.bf16 %v356_v24, %v352_v23  ;;  %v354_v30 = vld [vmem:[%s15074_s2 + $0x110] sm:$0xff]  ;;  %v11830_v33 = vpack.c.bf16 %v359_v29, %v355_v27  ;;  %v241_v36 = vld [vmem:[%s11603_s13 + $0x98] sm:$0xff]  ;;  %v242_v38 = vld [vmem:[%s11603_s13 + $0xa0] sm:$0xff] }
  0x2d   : > { %9183 = vmatmul.mubr.msk.f32.gmra.mrb[8].mxu0 %vm457_vm3, %v226_v54  ;;  %v358_v32 = vld [vmem:[%s15074_s2 + $0x130] sm:$0xff]  ;;  %v243_v40 = vld [vmem:[%s11603_s13 + $0xa8] sm:$0xff]  ;;  %v245_v42 = vld [vmem:[%s11603_s13 + $0xb8] sm:$0xff] }
  0x2e   : > { %9283 = vmatmul.mubr.msk.f32.gmra.mrb[8].mxu1 %vm457_vm3, %v226_v54  ;;  %859 = vmatprep.mubr.f32.mxu0 %v15234_v11  ;;  %15467 = vst [vmem:[#allocation19_spill] sm:$0xff] %v11802_v20  ;;  %15468 = vst [vmem:[#allocation20_spill] sm:$0xff] %v11818_v28  ;;  %v11833_v35 = vpack.c.bf16 %v358_v32, %v354_v30  ;;  %v244_v41 = vld [vmem:[%s11603_s13 + $0xb0] sm:$0xff]  ;;  %v246_v43 = vld [vmem:[%s11603_s13 + $0xc0] sm:$0xff] }
  0x2f   : > { %1512 = vmatprep.mubr.f32.mxu1 %v15234_v11  ;;  %9479 = vmatprep.subr.bf16.mxu0 %v11802_v20  ;;  %15469 = vst [vmem:[#allocation21_spill] sm:$0xff] %v11830_v33  ;;  %v247_v44 = vld [vmem:[%s11603_s13 + $0xc8] sm:$0xff]  ;;  %v248_v45 = vld [vmem:[%s11603_s13 + $0xd0] sm:$0xff]  ;;  %v249_v47 = vld [vmem:[%s11603_s13 + $0xd8] sm:$0xff] }
  0x30   : > { %9481 = vmatpush1.bf16.msra.mxu0 %v11818_v28  ;;  %15470 = vst [vmem:[#allocation22_spill] sm:$0xff] %v11833_v35  ;;  %9511 = vmatprep.subr.bf16.mxu1 %v11830_v33  ;;  %v250_v48 = vld [vmem:[%s11603_s13 + $0xe0] sm:$0xff]  ;;  %v251_v51 = vld [vmem:[%s11603_s13 + $0xe8] sm:$0xff]  ;;  %v252_v52 = vld [vmem:[%s11603_s13 + $0xf0] sm:$0xff] }
  0x31   : > { %9184 = vmatmul.mubr.msk.f32.gmra.mrb[10].mxu0 %vm457_vm3, %v227_v57  ;;  %9513 = vmatpush1.bf16.msra.mxu1 %v11833_v35  ;;  %v361_v54 = vld [vmem:[%s15074_s2 + $0x148] sm:$0xff]  ;;  %v360_v56 = vld [vmem:[%s15074_s2 + $0x140] sm:$0xff]  ;;  %v363_v60 = vld [vmem:[%s15074_s2 + $0x158] sm:$0xff] }
  0x32   : > { %9284 = vmatmul.mubr.msk.f32.gmra.mrb[10].mxu1 %vm457_vm3, %v227_v57  ;;  %865 = vmatprep.mubr.f32.mxu0 %v15234_v11  ;;  %v365_v55 = vld [vmem:[%s15074_s2 + $0x168] sm:$0xff]  ;;  %v364_v59 = vld [vmem:[%s15074_s2 + $0x160] sm:$0xff]  ;;  %v367_v62 = vld [vmem:[%s15074_s2 + $0x178] sm:$0xff] }
  0x33   : > { %1518 = vmatprep.mubr.f32.mxu1 %v15234_v11  ;;  %v11906_v57 = vpack.c.bf16 %v365_v55, %v361_v54  ;;  %v11917_v63 = vpack.c.bf16 %v364_v59, %v360_v56  ;;  %v11919_v0 = vpack.c.bf16 %v367_v62, %v363_v60  ;;  %v366_v3 = vld [vmem:[%s15074_s2 + $0x170] sm:$0xff]  ;;  %v263_v18 = vld [vmem:[%s11603_s13 + $0x148] sm:$0xff]  ;;  %v368_v23 = vld [vmem:[%s15074_s2 + $0x180] sm:$0xff] }
  0x34   : > { %v369_v19 = vld [vmem:[%s15074_s2 + $0x188] sm:$0xff]  ;;  %v264_v24 = vld [vmem:[%s11603_s13 + $0x150] sm:$0xff]  ;;  %v372_v29 = vld [vmem:[%s15074_s2 + $0x1a0] sm:$0xff] }
  0x35   : > { %9185 = vmatmul.mubr.msk.f32.gmra.mrb[12].mxu0 %vm457_vm3, %v228_v1  ;;  %15471 = vst [vmem:[#allocation23_spill] sm:$0xff] %v11906_v57  ;;  %15472 = vst [vmem:[#allocation24_spill] sm:$0xff] %v11917_v63  ;;  %9483 = vmatprep.subr.bf16.mxu0 %v11906_v57  ;;  %v12007_v30 = vpack.c.bf16 %v372_v29, %v368_v23  ;;  %v371_v32 = vld [vmem:[%s15074_s2 + $0x198] sm:$0xff]  ;;  %v272_v54 = vld [vmem:[%s11603_s13 + $0x190] sm:$0xff] }
  0x36   : > { %9285 = vmatmul.mubr.msk.f32.gmra.mrb[12].mxu1 %vm457_vm3, %v228_v1  ;;  %871 = vmatprep.mubr.f32.mxu0 %v15234_v11  ;;  %15473 = vst [vmem:[#allocation25_spill] sm:$0xff] %v11919_v0  ;;  %v362_v1 = vld [vmem:[%s15074_s2 + $0x150] sm:$0xff]  ;;  %v273_v55 = vld [vmem:[%s11603_s13 + $0x198] sm:$0xff]  ;;  %v274_v56 = vld [vmem:[%s11603_s13 + $0x1a0] sm:$0xff] }
  0x37   : > { %1524 = vmatprep.mubr.f32.mxu1 %v15234_v11  ;;  %9485 = vmatpush1.bf16.msra.mxu0 %v11917_v63  ;;  %15476 = vst [vmem:[#allocation28_spill] sm:$0xff] %v12007_v30  ;;  %v275_v59 = vld [vmem:[%s11603_s13 + $0x1a8] sm:$0xff]  ;;  %v378_v23 = vld [vmem:[%s15074_s2 + $0x1d0] sm:$0xff] }
  0x38   : > { %9515 = vmatprep.subr.bf16.mxu1 %v11919_v0 }
  0x39   : > { %9186 = vmatmul.mubr.msk.f32.gmra.mrb[14].mxu0 %vm457_vm3, %v229_v5 }
  0x3a   : > { %9286 = vmatmul.mubr.msk.f32.gmra.mrb[14].mxu1 %vm457_vm3, %v229_v5  ;;  %877 = vmatprep.mubr.f32.mxu0 %v15234_v11  ;;  %v11930_v5 = vpack.c.bf16 %v366_v3, %v362_v1 }
  0x3b   : > { %1530 = vmatprep.mubr.f32.mxu1 %v15234_v11 }
  0x3c   : > { %15474 = vst [vmem:[#allocation26_spill] sm:$0xff] %v11930_v5  ;;  %9517 = vmatpush1.bf16.msra.mxu1 %v11930_v5 }
  0x3d   : > { %9187 = vmatmul.mubr.msk.f32.gmra.mrb[16].mxu0 %vm457_vm3, %v230_v6 }
  0x3e   : > { %9287 = vmatmul.mubr.msk.f32.gmra.mrb[16].mxu1 %vm457_vm3, %v230_v6  ;;  %883 = vmatprep.mubr.f32.mxu0 %v15234_v11  ;;  %v253_v6 = vld [vmem:[%s11603_s13 + $0xf8] sm:$0xff] }
  0x3f   : > { %1536 = vmatprep.mubr.f32.mxu1 %v15234_v11 }
  0x41   : > { %9188 = vmatmul.mubr.msk.f32.gmra.mrb[18].mxu0 %vm457_vm3, %v231_v7 }
  0x42   : > { %9288 = vmatmul.mubr.msk.f32.gmra.mrb[18].mxu1 %vm457_vm3, %v231_v7  ;;  %889 = vmatprep.mubr.f32.mxu0 %v15234_v11  ;;  %v254_v7 = vld [vmem:[%s11603_s13 + $0x100] sm:$0xff] }
  0x43   : > { %1542 = vmatprep.mubr.f32.mxu1 %v15234_v11 }
  0x45   : > { %9189 = vmatmul.mubr.msk.f32.gmra.mrb[20].mxu0 %vm457_vm3, %v232_v8 }
  0x46   : > { %9289 = vmatmul.mubr.msk.f32.gmra.mrb[20].mxu1 %vm457_vm3, %v232_v8  ;;  %895 = vmatprep.mubr.f32.mxu0 %v15234_v11  ;;  %v255_v8 = vld [vmem:[%s11603_s13 + $0x108] sm:$0xff] }
  0x47   : > { %1548 = vmatprep.mubr.f32.mxu1 %v15234_v11 }
  0x49   : > { %9190 = vmatmul.mubr.msk.f32.gmra.mrb[22].mxu0 %vm457_vm3, %v233_v9 }
  0x4a   : > { %9290 = vmatmul.mubr.msk.f32.gmra.mrb[22].mxu1 %vm457_vm3, %v233_v9  ;;  %901 = vmatprep.mubr.f32.mxu0 %v15234_v11  ;;  %v256_v9 = vld [vmem:[%s11603_s13 + $0x110] sm:$0xff] }
  0x4b   : > { %1554 = vmatprep.mubr.f32.mxu1 %v15234_v11 }
  0x4d   : > { %9191 = vmatmul.mubr.msk.f32.gmra.mrb[24].mxu0 %vm457_vm3, %v234_v10 }
  0x4e   : > { %9291 = vmatmul.mubr.msk.f32.gmra.mrb[24].mxu1 %vm457_vm3, %v234_v10  ;;  %907 = vmatprep.mubr.f32.mxu0 %v15234_v11  ;;  %v257_v10 = vld [vmem:[%s11603_s13 + $0x118] sm:$0xff] }
  0x4f   : > { %1560 = vmatprep.mubr.f32.mxu1 %v15234_v11 }
  0x51   : > { %9192 = vmatmul.mubr.msk.f32.gmra.mrb[26].mxu0 %vm457_vm3, %v235_v12 }
  0x52   : > { %9292 = vmatmul.mubr.msk.f32.gmra.mrb[26].mxu1 %vm457_vm3, %v235_v12  ;;  %913 = vmatprep.mubr.f32.mxu0 %v15234_v11  ;;  %v258_v12 = vld [vmem:[%s11603_s13 + $0x120] sm:$0xff] }
  0x53   : > { %1566 = vmatprep.mubr.f32.mxu1 %v15234_v11 }
  0x55   : > { %9193 = vmatmul.mubr.msk.f32.gmra.mrb[28].mxu0 %vm457_vm3, %v236_v13 }
  0x56   : > { %9293 = vmatmul.mubr.msk.f32.gmra.mrb[28].mxu1 %vm457_vm3, %v236_v13  ;;  %919 = vmatprep.mubr.f32.mxu0 %v15234_v11  ;;  %v259_v13 = vld [vmem:[%s11603_s13 + $0x128] sm:$0xff] }
  0x57   : > { %1572 = vmatprep.mubr.f32.mxu1 %v15234_v11 }
  0x59   : > { %9194 = vmatmul.mubr.msk.f32.gmra.mrb[30].mxu0 %vm457_vm3, %v237_v14 }
  0x5a   : > { %9294 = vmatmul.mubr.msk.f32.gmra.mrb[30].mxu1 %vm457_vm3, %v237_v14  ;;  %925 = vmatprep.mubr.f32.mxu0 %v15234_v11  ;;  %v260_v14 = vld [vmem:[%s11603_s13 + $0x130] sm:$0xff] }
  0x5b   : > { %1578 = vmatprep.mubr.f32.mxu1 %v15234_v11 }
  0x5d   : > { %9195 = vmatmul.mubr.msk.f32.gmra.mrb[32].mxu0 %vm457_vm3, %v238_v15 }
  0x5e   : > { %9295 = vmatmul.mubr.msk.f32.gmra.mrb[32].mxu1 %vm457_vm3, %v238_v15  ;;  %931 = vmatprep.mubr.f32.mxu0 %v15234_v11  ;;  %v261_v15 = vld [vmem:[%s11603_s13 + $0x138] sm:$0xff] }
  0x5f   : > { %1584 = vmatprep.mubr.f32.mxu1 %v15234_v11 }
  0x61   : > { %9196 = vmatmul.mubr.msk.f32.gmra.mrb[34].mxu0 %vm457_vm3, %v239_v16 }
  0x62   : > { %9296 = vmatmul.mubr.msk.f32.gmra.mrb[34].mxu1 %vm457_vm3, %v239_v16  ;;  %937 = vmatprep.mubr.f32.mxu0 %v15234_v11  ;;  %v262_v16 = vld [vmem:[%s11603_s13 + $0x140] sm:$0xff] }
  0x63   : > { %1590 = vmatprep.mubr.f32.mxu1 %v15234_v11 }
  0x65   : > { %9197 = vmatmul.mubr.msk.f32.gmra.mrb[36].mxu0 %vm457_vm3, %v240_v22 }
  0x66   : > { %9297 = vmatmul.mubr.msk.f32.gmra.mrb[36].mxu1 %vm457_vm3, %v240_v22  ;;  %943 = vmatprep.mubr.f32.mxu0 %v15234_v11  ;;  %v373_v22 = vld [vmem:[%s15074_s2 + $0x1a8] sm:$0xff] }
  0x67   : > { %1596 = vmatprep.mubr.f32.mxu1 %v15234_v11  ;;  %v12002_v27 = vpack.c.bf16 %v373_v22, %v369_v19  ;;  %v379_v19 = vld [vmem:[%s15074_s2 + $0x1d8] sm:$0xff] }
  0x68   : > { %v383_v22 = vld [vmem:[%s15074_s2 + $0x1f8] sm:$0xff] }
  0x69   : > { %9198 = vmatmul.mubr.msk.f32.gmra.mrb[38].mxu0 %vm457_vm3, %v241_v36  ;;  %15475 = vst [vmem:[#allocation27_spill] sm:$0xff] %v12002_v27  ;;  %9487 = vmatprep.subr.bf16.mxu0 %v12002_v27  ;;  %v12136_v29 = vpack.c.bf16 %v383_v22, %v379_v19  ;;  %v281_v22 = vld [vmem:[%s11603_s13 + $0x1d8] sm:$0xff] }
  0x6a   : > { %9298 = vmatmul.mubr.msk.f32.gmra.mrb[38].mxu1 %vm457_vm3, %v241_v36  ;;  %949 = vmatprep.mubr.f32.mxu0 %v15234_v11  ;;  %v375_v36 = vld [vmem:[%s15074_s2 + $0x1b8] sm:$0xff] }
  0x6b   : > { %1602 = vmatprep.mubr.f32.mxu1 %v15234_v11  ;;  %9489 = vmatpush1.bf16.msra.mxu0 %v12007_v30  ;;  %15487 = vst [vmem:[#allocation39_spill] sm:$0xff] %v12136_v29 }
  0x6d   : > { %9199 = vmatmul.mubr.msk.f32.gmra.mrb[40].mxu0 %vm457_vm3, %v242_v38 }
  0x6e   : > { %9299 = vmatmul.mubr.msk.f32.gmra.mrb[40].mxu1 %vm457_vm3, %v242_v38  ;;  %955 = vmatprep.mubr.f32.mxu0 %v15234_v11  ;;  %v12018_v38 = vpack.c.bf16 %v375_v36, %v371_v32  ;;  %v382_v32 = vld [vmem:[%s15074_s2 + $0x1f0] sm:$0xff] }
  0x6f   : > { %1608 = vmatprep.mubr.f32.mxu1 %v15234_v11  ;;  %v12142_v36 = vpack.c.bf16 %v382_v32, %v378_v23 }
  0x70   : > { %15477 = vst [vmem:[#allocation29_spill] sm:$0xff] %v12018_v38  ;;  %9519 = vmatprep.subr.bf16.mxu1 %v12018_v38 }
  0x71   : > { %9200 = vmatmul.mubr.msk.f32.gmra.mrb[42].mxu0 %vm457_vm3, %v243_v40  ;;  %15488 = vst [vmem:[#allocation40_spill] sm:$0xff] %v12142_v36 }
  0x72   : > { %9300 = vmatmul.mubr.msk.f32.gmra.mrb[42].mxu1 %vm457_vm3, %v243_v40  ;;  %961 = vmatprep.mubr.f32.mxu0 %v15234_v11  ;;  %v370_v40 = vld [vmem:[%s15074_s2 + $0x190] sm:$0xff] }
  0x73   : > { %1614 = vmatprep.mubr.f32.mxu1 %v15234_v11 }
  0x75   : > { %9201 = vmatmul.mubr.msk.f32.gmra.mrb[44].mxu0 %vm457_vm3, %v244_v41 }
  0x76   : > { %9301 = vmatmul.mubr.msk.f32.gmra.mrb[44].mxu1 %vm457_vm3, %v244_v41  ;;  %967 = vmatprep.mubr.f32.mxu0 %v15234_v11  ;;  %v374_v41 = vld [vmem:[%s15074_s2 + $0x1b0] sm:$0xff] }
  0x77   : > { %1620 = vmatprep.mubr.f32.mxu1 %v15234_v11 }
  0x79   : > { %9202 = vmatmul.mubr.msk.f32.gmra.mrb[46].mxu0 %vm457_vm3, %v245_v42 }
  0x7a   : > { %9302 = vmatmul.mubr.msk.f32.gmra.mrb[46].mxu1 %vm457_vm3, %v245_v42  ;;  %973 = vmatprep.mubr.f32.mxu0 %v15234_v11  ;;  %v265_v42 = vld [vmem:[%s11603_s13 + $0x158] sm:$0xff] }
  0x7b   : > { %1626 = vmatprep.mubr.f32.mxu1 %v15234_v11 }
  0x7d   : > { %9203 = vmatmul.mubr.msk.f32.gmra.mrb[48].mxu0 %vm457_vm3, %v246_v43 }
  0x7e   : > { %9303 = vmatmul.mubr.msk.f32.gmra.mrb[48].mxu1 %vm457_vm3, %v246_v43  ;;  %979 = vmatprep.mubr.f32.mxu0 %v15234_v11  ;;  %v12029_v43 = vpack.c.bf16 %v374_v41, %v370_v40 }
  0x7f   : > { %1632 = vmatprep.mubr.f32.mxu1 %v15234_v11 }
  0x80   : > { %15478 = vst [vmem:[#allocation30_spill] sm:$0xff] %v12029_v43  ;;  %9521 = vmatpush1.bf16.msra.mxu1 %v12029_v43 }
  0x81   : > { %9204 = vmatmul.mubr.msk.f32.gmra.mrb[50].mxu0 %vm457_vm3, %v247_v44  ;;  %9523 = vmatprep.subr.bf16.mxu1 %v12136_v29 }
  0x82   : > { %9304 = vmatmul.mubr.msk.f32.gmra.mrb[50].mxu1 %vm457_vm3, %v247_v44  ;;  %985 = vmatprep.mubr.f32.mxu0 %v15234_v11  ;;  %v266_v44 = vld [vmem:[%s11603_s13 + $0x160] sm:$0xff] }
  0x83   : > { %1638 = vmatprep.mubr.f32.mxu1 %v15234_v11 }
  0x84   : > { %9525 = vmatpush1.bf16.msra.mxu1 %v12142_v36 }
  0x85   : > { %9205 = vmatmul.mubr.msk.f32.gmra.mrb[52].mxu0 %vm457_vm3, %v248_v45  ;;  %9559 = vmatprep.subr.bf16.mxu1 %v11579_v21 }
  0x86   : > { %9305 = vmatmul.mubr.msk.f32.gmra.mrb[52].mxu1 %vm457_vm3, %v248_v45  ;;  %991 = vmatprep.mubr.f32.mxu0 %v15234_v11  ;;  %v267_v45 = vld [vmem:[%s11603_s13 + $0x168] sm:$0xff] }
  0x87   : > { %1644 = vmatprep.mubr.f32.mxu1 %v15234_v11 }
  0x89   : > { %9206 = vmatmul.mubr.msk.f32.gmra.mrb[54].mxu0 %vm457_vm3, %v249_v47 }
  0x8a   : > { %9306 = vmatmul.mubr.msk.f32.gmra.mrb[54].mxu1 %vm457_vm3, %v249_v47  ;;  %997 = vmatprep.mubr.f32.mxu0 %v15234_v11  ;;  %v268_v47 = vld [vmem:[%s11603_s13 + $0x170] sm:$0xff] }
  0x8b   : > { %1650 = vmatprep.mubr.f32.mxu1 %v15234_v11 }
  0x8d   : > { %9207 = vmatmul.mubr.msk.f32.gmra.mrb[56].mxu0 %vm457_vm3, %v250_v48 }
  0x8e   : > { %9307 = vmatmul.mubr.msk.f32.gmra.mrb[56].mxu1 %vm457_vm3, %v250_v48  ;;  %1003 = vmatprep.mubr.f32.mxu0 %v15234_v11  ;;  %v269_v48 = vld [vmem:[%s11603_s13 + $0x178] sm:$0xff] }
  0x8f   : > { %1656 = vmatprep.mubr.f32.mxu1 %v15234_v11 }
  0x91   : > { %9208 = vmatmul.mubr.msk.f32.gmra.mrb[58].mxu0 %vm457_vm3, %v251_v51 }
  0x92   : > { %9308 = vmatmul.mubr.msk.f32.gmra.mrb[58].mxu1 %vm457_vm3, %v251_v51  ;;  %1009 = vmatprep.mubr.f32.mxu0 %v15234_v11  ;;  %v270_v51 = vld [vmem:[%s11603_s13 + $0x180] sm:$0xff] }
  0x93   : > { %1662 = vmatprep.mubr.f32.mxu1 %v15234_v11 }
  0x95   : > { %9209 = vmatmul.mubr.msk.f32.gmra.mrb[60].mxu0 %vm457_vm3, %v252_v52 }
  0x96   : > { %9309 = vmatmul.mubr.msk.f32.gmra.mrb[60].mxu1 %vm457_vm3, %v252_v52  ;;  %1015 = vmatprep.mubr.f32.mxu0 %v15234_v11  ;;  %v271_v52 = vld [vmem:[%s11603_s13 + $0x188] sm:$0xff] }
  0x97   : > { %1668 = vmatprep.mubr.f32.mxu1 %v15234_v11 }
  0x99   : > { %9210 = vmatmul.mubr.msk.f32.gmra.mrb[62].mxu0 %vm457_vm3, %v253_v6 }
  0x9a   : > { %9310 = vmatmul.mubr.msk.f32.gmra.mrb[62].mxu1 %vm457_vm3, %v253_v6  ;;  %1021 = vmatprep.mubr.f32.mxu0 %v15234_v11  ;;  %v377_v6 = vld [vmem:[%s15074_s2 + $0x1c8] sm:$0xff] }
  0x9b   : > { %1674 = vmatprep.mubr.f32.mxu1 %v15234_v11 }
  0x9d   : > { %9211 = vmatmul.mubr.msk.f32.gmra.mrb[64].mxu0 %vm457_vm3, %v254_v7 }
  0x9e   : > { %9311 = vmatmul.mubr.msk.f32.gmra.mrb[64].mxu1 %vm457_vm3, %v254_v7  ;;  %1027 = vmatprep.mubr.f32.mxu0 %v15234_v11  ;;  %v381_v7 = vld [vmem:[%s15074_s2 + $0x1e8] sm:$0xff] }
  0x9f   : > { %1680 = vmatprep.mubr.f32.mxu1 %v15234_v11 }
  0xa1   : > { %9212 = vmatmul.mubr.msk.f32.gmra.mrb[66].mxu0 %vm457_vm3, %v255_v8 }
  0xa2   : > { %9312 = vmatmul.mubr.msk.f32.gmra.mrb[66].mxu1 %vm457_vm3, %v255_v8  ;;  %1033 = vmatprep.mubr.f32.mxu0 %v15234_v11  ;;  %v276_v8 = vld [vmem:[%s11603_s13 + $0x1b0] sm:$0xff] }
  0xa3   : > { %1686 = vmatprep.mubr.f32.mxu1 %v15234_v11 }
  0xa5   : > { %9213 = vmatmul.mubr.msk.f32.gmra.mrb[68].mxu0 %vm457_vm3, %v256_v9 }
  0xa6   : > { %9313 = vmatmul.mubr.msk.f32.gmra.mrb[68].mxu1 %vm457_vm3, %v256_v9  ;;  %1039 = vmatprep.mubr.f32.mxu0 %v15234_v11  ;;  %v12103_v9 = vpack.c.bf16 %v381_v7, %v377_v6  ;;  %v280_v7 = vld [vmem:[%s11603_s13 + $0x1d0] sm:$0xff] }
  0xa7   : > { %1692 = vmatprep.mubr.f32.mxu1 %v15234_v11 }
  0xa8   : > { %15482 = vst [vmem:[#allocation34_spill] sm:$0xff] %v12103_v9  ;;  %9491 = vmatprep.subr.bf16.mxu0 %v12103_v9 }
  0xa9   : > { %9214 = vmatmul.mubr.msk.f32.gmra.mrb[70].mxu0 %vm457_vm3, %v257_v10 }
  0xaa   : > { %9314 = vmatmul.mubr.msk.f32.gmra.mrb[70].mxu1 %vm457_vm3, %v257_v10  ;;  %1045 = vmatprep.mubr.f32.mxu0 %v15234_v11 }
  0xab   : > { %1698 = vmatprep.mubr.f32.mxu1 %v15234_v11 }
  0xad   : > { %9215 = vmatmul.mubr.msk.f32.gmra.mrb[72].mxu0 %vm457_vm3, %v258_v12 }
  0xae   : > { %9315 = vmatmul.mubr.msk.f32.gmra.mrb[72].mxu1 %vm457_vm3, %v258_v12  ;;  %1051 = vmatprep.mubr.f32.mxu0 %v15234_v11 }
  0xaf   : > { %1704 = vmatprep.mubr.f32.mxu1 %v15234_v11 }
  0xb1   : > { %9216 = vmatmul.mubr.msk.f32.gmra.mrb[74].mxu0 %vm457_vm3, %v259_v13 }
  0xb2   : > { %9316 = vmatmul.mubr.msk.f32.gmra.mrb[74].mxu1 %vm457_vm3, %v259_v13  ;;  %1057 = vmatprep.mubr.f32.mxu0 %v15234_v11  ;;  %v376_v13 = vld [vmem:[%s15074_s2 + $0x1c0] sm:$0xff] }
  0xb3   : > { %1710 = vmatprep.mubr.f32.mxu1 %v15234_v11 }
  0xb5   : > { %9217 = vmatmul.mubr.msk.f32.gmra.mrb[76].mxu0 %vm457_vm3, %v260_v14 }
  0xb6   : > { %9317 = vmatmul.mubr.msk.f32.gmra.mrb[76].mxu1 %vm457_vm3, %v260_v14  ;;  %1063 = vmatprep.mubr.f32.mxu0 %v15234_v11  ;;  %v380_v14 = vld [vmem:[%s15074_s2 + $0x1e0] sm:$0xff] }
  0xb7   : > { %1716 = vmatprep.mubr.f32.mxu1 %v15234_v11 }
  0xb9   : > { %9218 = vmatmul.mubr.msk.f32.gmra.mrb[78].mxu0 %vm457_vm3, %v261_v15 }
  0xba   : > { %9318 = vmatmul.mubr.msk.f32.gmra.mrb[78].mxu1 %vm457_vm3, %v261_v15  ;;  %1069 = vmatprep.mubr.f32.mxu0 %v15234_v11 }
  0xbb   : > { %1722 = vmatprep.mubr.f32.mxu1 %v15234_v11 }
  0xbd   : > { %9219 = vmatmul.mubr.msk.f32.gmra.mrb[80].mxu0 %vm457_vm3, %v262_v16 }
  0xbe   : > { %9319 = vmatmul.mubr.msk.f32.gmra.mrb[80].mxu1 %vm457_vm3, %v262_v16  ;;  %1075 = vmatprep.mubr.f32.mxu0 %v15234_v11 }
  0xbf   : > { %1728 = vmatprep.mubr.f32.mxu1 %v15234_v11 }
  0xc1   : > { %9220 = vmatmul.mubr.msk.f32.gmra.mrb[82].mxu0 %vm457_vm3, %v263_v18 }
  0xc2   : > { %9320 = vmatmul.mubr.msk.f32.gmra.mrb[82].mxu1 %vm457_vm3, %v263_v18  ;;  %1081 = vmatprep.mubr.f32.mxu0 %v15234_v11  ;;  %v12122_v18 = vpack.c.bf16 %v380_v14, %v376_v13 }
  0xc3   : > { %1734 = vmatprep.mubr.f32.mxu1 %v15234_v11 }
  0xc4   : > { %15486 = vst [vmem:[#allocation38_spill] sm:$0xff] %v12122_v18  ;;  %9493 = vmatpush1.bf16.msra.mxu0 %v12122_v18 }
  0xc5   : > { %9221 = vmatmul.mubr.msk.f32.gmra.mrb[84].mxu0 %vm457_vm3, %v264_v24  ;;  %9527 = vmatprep.subr.bf16.mxu0 %v11566_v17 }
  0xc6   : > { %9321 = vmatmul.mubr.msk.f32.gmra.mrb[84].mxu1 %vm457_vm3, %v264_v24  ;;  %1087 = vmatprep.mubr.f32.mxu0 %v15234_v11  ;;  %v277_v24 = vld [vmem:[%s11603_s13 + $0x1b8] sm:$0xff] }
  0xc7   : > { %1740 = vmatprep.mubr.f32.mxu1 %v15234_v11 }
  0xc9   : > { %9222 = vmatmul.mubr.msk.f32.gmra.mrb[86].mxu0 %vm457_vm3, %v265_v42 }
  0xca   : > { %9322 = vmatmul.mubr.msk.f32.gmra.mrb[86].mxu1 %vm457_vm3, %v265_v42  ;;  %1093 = vmatprep.mubr.f32.mxu0 %v15234_v11 }
  0xcb   : > { %1746 = vmatprep.mubr.f32.mxu1 %v15234_v11 }
  0xcd   : > { %9223 = vmatmul.mubr.msk.f32.gmra.mrb[88].mxu0 %vm457_vm3, %v266_v44 }
  0xce   : > { %9323 = vmatmul.mubr.msk.f32.gmra.mrb[88].mxu1 %vm457_vm3, %v266_v44  ;;  %1099 = vmatprep.mubr.f32.mxu0 %v15234_v11 }
  0xcf   : > { %1752 = vmatprep.mubr.f32.mxu1 %v15234_v11 }
  0xd1   : > { %9224 = vmatmul.mubr.msk.f32.gmra.mrb[90].mxu0 %vm457_vm3, %v267_v45 }
  0xd2   : > { %9324 = vmatmul.mubr.msk.f32.gmra.mrb[90].mxu1 %vm457_vm3, %v267_v45  ;;  %1105 = vmatprep.mubr.f32.mxu0 %v15234_v11  ;;  %v278_v45 = vld [vmem:[%s11603_s13 + $0x1c0] sm:$0xff] }
  0xd3   : > { %1758 = vmatprep.mubr.f32.mxu1 %v15234_v11 }
  0xd5   : > { %9225 = vmatmul.mubr.msk.f32.gmra.mrb[92].mxu0 %vm457_vm3, %v268_v47 }
  0xd6   : > { %9325 = vmatmul.mubr.msk.f32.gmra.mrb[92].mxu1 %vm457_vm3, %v268_v47  ;;  %1111 = vmatprep.mubr.f32.mxu0 %v15234_v11 }
  0xd7   : > { %1764 = vmatprep.mubr.f32.mxu1 %v15234_v11 }
  0xd9   : > { %9226 = vmatmul.mubr.msk.f32.gmra.mrb[94].mxu0 %vm457_vm3, %v269_v48 }
  0xda   : > { %9326 = vmatmul.mubr.msk.f32.gmra.mrb[94].mxu1 %vm457_vm3, %v269_v48  ;;  %1117 = vmatprep.mubr.f32.mxu0 %v15234_v11 }
  0xdb   : > { %1770 = vmatprep.mubr.f32.mxu1 %v15234_v11 }
  0xdd   : > { %9227 = vmatmul.mubr.msk.f32.gmra.mrb[96].mxu0 %vm457_vm3, %v270_v51 }
  0xde   : > { %9327 = vmatmul.mubr.msk.f32.gmra.mrb[96].mxu1 %vm457_vm3, %v270_v51  ;;  %1123 = vmatprep.mubr.f32.mxu0 %v15234_v11 }
  0xdf   : > { %1776 = vmatprep.mubr.f32.mxu1 %v15234_v11 }
  0xe1   : > { %9228 = vmatmul.mubr.msk.f32.gmra.mrb[98].mxu0 %vm457_vm3, %v271_v52 }
  0xe2   : > { %9328 = vmatmul.mubr.msk.f32.gmra.mrb[98].mxu1 %vm457_vm3, %v271_v52  ;;  %1129 = vmatprep.mubr.f32.mxu0 %v15234_v11 }
  0xe3   : > { %1782 = vmatprep.mubr.f32.mxu1 %v15234_v11 }
  0xe5   : > { %9229 = vmatmul.mubr.msk.f32.gmra.mrb[100].mxu0 %vm457_vm3, %v272_v54 }
  0xe6   : > { %9329 = vmatmul.mubr.msk.f32.gmra.mrb[100].mxu1 %vm457_vm3, %v272_v54  ;;  %1135 = vmatprep.mubr.f32.mxu0 %v15234_v11  ;;  %v279_v54 = vld [vmem:[%s11603_s13 + $0x1c8] sm:$0xff] }
  0xe7   : > { %1788 = vmatprep.mubr.f32.mxu1 %v15234_v11 }
  0xe9   : > { %9230 = vmatmul.mubr.msk.f32.gmra.mrb[102].mxu0 %vm457_vm3, %v273_v55 }
  0xea   : > { %9330 = vmatmul.mubr.msk.f32.gmra.mrb[102].mxu1 %vm457_vm3, %v273_v55  ;;  %1141 = vmatprep.mubr.f32.mxu0 %v15234_v11 }
  0xeb   : > { %1794 = vmatprep.mubr.f32.mxu1 %v15234_v11 }
  0xed   : > { %9231 = vmatmul.mubr.msk.f32.gmra.mrb[104].mxu0 %vm457_vm3, %v274_v56 }
  0xee   : > { %9331 = vmatmul.mubr.msk.f32.gmra.mrb[104].mxu1 %vm457_vm3, %v274_v56  ;;  %1147 = vmatprep.mubr.f32.mxu0 %v15234_v11 }
  0xef   : > { %1800 = vmatprep.mubr.f32.mxu1 %v15234_v11 }
  0xf0   : > { %v12084_v60 = vpop.f32.mrb[0].mxu0 }
  0xf1   : > { %v12086_v62 = vpop.f32.mrb[0].mxu1  ;;  %v12088_v1 = vpop.f32.mrb[1].mxu0  ;;  %9232 = vmatmul.mubr.msk.f32.gmra.mrb[106].mxu0 %vm457_vm3, %v275_v59 }
  0xf2   : > { %15479 = vst [vmem:[#allocation31_spill] sm:$0xff] %v12086_v62  ;;  %15480 = vst [vmem:[#allocation32_spill] sm:$0xff] %v12088_v1  ;;  %9332 = vmatmul.mubr.msk.f32.gmra.mrb[106].mxu1 %vm457_vm3, %v275_v59  ;;  %v12092_v3 = vpop.f32.mrb[1].mxu1  ;;  %1153 = vmatprep.mubr.f32.mxu0 %v15234_v11 }
  0xf3   : > { %15481 = vst [vmem:[#allocation33_spill] sm:$0xff] %v12092_v3  ;;  %1806 = vmatprep.mubr.f32.mxu1 %v15234_v11 }
  0xf4   : > { %v12105_v10 = vpop.f32.mrb[2].mxu0 }
  0xf5   : > { %v12107_v12 = vpop.f32.mrb[2].mxu1  ;;  %v12116_v15 = vpop.f32.mrb[3].mxu0  ;;  %9233 = vmatmul.mubr.msk.f32.gmra.mrb[108].mxu0 %vm457_vm3, %v276_v8 }
  0xf6   : > { %15483 = vst [vmem:[#allocation35_spill] sm:$0xff] %v12107_v12  ;;  %15484 = vst [vmem:[#allocation36_spill] sm:$0xff] %v12116_v15  ;;  %9333 = vmatmul.mubr.msk.f32.gmra.mrb[108].mxu1 %vm457_vm3, %v276_v8  ;;  %v12120_v16 = vpop.f32.mrb[3].mxu1  ;;  %1159 = vmatprep.mubr.f32.mxu0 %v15234_v11 }
  0xf7   : > { %15485 = vst [vmem:[#allocation37_spill] sm:$0xff] %v12120_v16  ;;  %1812 = vmatprep.mubr.f32.mxu1 %v15234_v11 }
  0xf8   : > { %v12144_v40 = vpop.f32.mrb[4].mxu0 }
  0xf9   : > { %v12146_v41 = vpop.f32.mrb[4].mxu1  ;;  %v12150_v42 = vpop.f32.mrb[5].mxu0  ;;  %9234 = vmatmul.mubr.msk.f32.gmra.mrb[110].mxu0 %vm457_vm3, %v277_v24 }
  0xfa   : > { %15489 = vst [vmem:[#allocation41_spill] sm:$0xff] %v12146_v41  ;;  %15490 = vst [vmem:[#allocation42_spill] sm:$0xff] %v12150_v42  ;;  %9334 = vmatmul.mubr.msk.f32.gmra.mrb[110].mxu1 %vm457_vm3, %v277_v24  ;;  %v12154_v44 = vpop.f32.mrb[5].mxu1  ;;  %1165 = vmatprep.mubr.f32.mxu0 %v15234_v11 }
  0xfb   : > { %15491 = vst [vmem:[#allocation43_spill] sm:$0xff] %v12154_v44  ;;  %1818 = vmatprep.mubr.f32.mxu1 %v15234_v11 }
  0xfc   : > { %v12160_v47 = vpop.f32.mrb[6].mxu0 }
  0xfd   : > { %v12162_v48 = vpop.f32.mrb[6].mxu1  ;;  %v12165_v51 = vpop.f32.mrb[7].mxu0  ;;  %9235 = vmatmul.mubr.msk.f32.gmra.mrb[112].mxu0 %vm457_vm3, %v278_v45 }
  0xfe   : > { %15492 = vst [vmem:[#allocation44_spill] sm:$0xff] %v12162_v48  ;;  %15493 = vst [vmem:[#allocation45_spill] sm:$0xff] %v12165_v51  ;;  %9335 = vmatmul.mubr.msk.f32.gmra.mrb[112].mxu1 %vm457_vm3, %v278_v45  ;;  %v12169_v52 = vpop.f32.mrb[7].mxu1  ;;  %1171 = vmatprep.mubr.f32.mxu0 %v15234_v11 }
  0xff   : > { %15494 = vst [vmem:[#allocation46_spill] sm:$0xff] %v12169_v52  ;;  %1824 = vmatprep.mubr.f32.mxu1 %v15234_v11 }
 0x100   : > { %v12174_v55 = vpop.f32.mrb[8].mxu0 }
 0x101   : > { %v12176_v56 = vpop.f32.mrb[8].mxu1  ;;  %v12178_v59 = vpop.f32.mrb[9].mxu0  ;;  %9236 = vmatmul.mubr.msk.f32.gmra.mrb[114].mxu0 %vm457_vm3, %v279_v54 }
 0x102   : > { %15495 = vst [vmem:[#allocation47_spill] sm:$0xff] %v12176_v56  ;;  %15496 = vst [vmem:[#allocation48_spill] sm:$0xff] %v12178_v59  ;;  %9336 = vmatmul.mubr.msk.f32.gmra.mrb[114].mxu1 %vm457_vm3, %v279_v54  ;;  %v12182_v6 = vpop.f32.mrb[9].mxu1  ;;  %1177 = vmatprep.mubr.f32.mxu0 %v15234_v11  ;;  %v282_v54 = vld [vmem:[%s11603_s13 + $0x1e0] sm:$0xff] }
 0x103   : > { %15497 = vst [vmem:[#allocation49_spill] sm:$0xff] %v12182_v6  ;;  %1830 = vmatprep.mubr.f32.mxu1 %v15234_v11 }
 0x104   : > { %v12187_v8 = vpop.f32.mrb[10].mxu0 }
 0x105   : > { %v12189_v13 = vpop.f32.mrb[10].mxu1  ;;  %v12191_v14 = vpop.f32.mrb[11].mxu0  ;;  %9237 = vmatmul.mubr.msk.f32.gmra.mrb[116].mxu0 %vm457_vm3, %v280_v7 }
 0x106   : > { %15498 = vst [vmem:[#allocation50_spill] sm:$0xff] %v12189_v13  ;;  %15499 = vst [vmem:[#allocation51_spill] sm:$0xff] %v12191_v14  ;;  %9337 = vmatmul.mubr.msk.f32.gmra.mrb[116].mxu1 %vm457_vm3, %v280_v7  ;;  %v12195_v19 = vpop.f32.mrb[11].mxu1  ;;  %1183 = vmatprep.mubr.f32.mxu0 %v15234_v11 }
 0x107   : > { %15500 = vst [vmem:[#allocation52_spill] sm:$0xff] %v12195_v19  ;;  %1836 = vmatprep.mubr.f32.mxu1 %v15234_v11 }
 0x108   : > { %v12200_v23 = vpop.f32.mrb[12].mxu0 }
 0x109   : > { %v12202_v24 = vpop.f32.mrb[12].mxu1  ;;  %v12204_v32 = vpop.f32.mrb[13].mxu0  ;;  %9238 = vmatmul.mubr.msk.f32.gmra.mrb[118].mxu0 %vm457_vm3, %v281_v22 }
 0x10a   : > { %15501 = vst [vmem:[#allocation53_spill] sm:$0xff] %v12202_v24  ;;  %15502 = vst [vmem:[#allocation54_spill] sm:$0xff] %v12204_v32  ;;  %9338 = vmatmul.mubr.msk.f32.gmra.mrb[118].mxu1 %vm457_vm3, %v281_v22  ;;  %v12208_v45 = vpop.f32.mrb[13].mxu1  ;;  %1189 = vmatprep.mubr.f32.mxu0 %v15234_v11  ;;  %v283_v22 = vld [vmem:[%s11603_s13 + $0x1e8] sm:$0xff] }
 0x10b   : > { %15503 = vst [vmem:[#allocation55_spill] sm:$0xff] %v12208_v45  ;;  %1842 = vmatprep.mubr.f32.mxu1 %v15234_v11 }
 0x10c   : > { %v12213_v7 = vpop.f32.mrb[14].mxu0 }
 0x10d   : > { %v12215_v19 = vpop.f32.mrb[14].mxu1  ;;  %v12217_v6 = vpop.f32.mrb[15].mxu0  ;;  %9239 = vmatmul.mubr.msk.f32.gmra.mrb[120].mxu0 %vm457_vm3, %v282_v54 }
 0x10e   : > { %15504 = vst [vmem:[#allocation56_spill] sm:$0xff] %v12215_v19  ;;  %15505 = vst [vmem:[#allocation57_spill] sm:$0xff] %v12217_v6  ;;  %9339 = vmatmul.mubr.msk.f32.gmra.mrb[120].mxu1 %vm457_vm3, %v282_v54  ;;  %v12221_v52 = vpop.f32.mrb[15].mxu1  ;;  %1195 = vmatprep.mubr.f32.mxu0 %v15234_v11  ;;  %v284_v54 = vld [vmem:[%s11603_s13 + $0x1f0] sm:$0xff] }
 0x10f   : > { %15506 = vst [vmem:[#allocation58_spill] sm:$0xff] %v12221_v52  ;;  %1848 = vmatprep.mubr.f32.mxu1 %v15234_v11 }
 0x110   : > { %v12226_v45 = vpop.f32.mrb[16].mxu0 }
 0x111   : > { %v12228_v44 = vpop.f32.mrb[16].mxu1  ;;  %v12230_v16 = vpop.f32.mrb[17].mxu0  ;;  %9240 = vmatmul.mubr.msk.f32.gmra.mrb[122].mxu0 %vm457_vm3, %v283_v22 }
 0x112   : > { %15507 = vst [vmem:[#allocation59_spill] sm:$0xff] %v12228_v44  ;;  %15508 = vst [vmem:[#allocation60_spill] sm:$0xff] %v12230_v16  ;;  %9340 = vmatmul.mubr.msk.f32.gmra.mrb[122].mxu1 %vm457_vm3, %v283_v22  ;;  %v12234_v3 = vpop.f32.mrb[17].mxu1  ;;  %1201 = vmatprep.mubr.f32.mxu0 %v15234_v11  ;;  %v285_v22 = vld [vmem:[%s11603_s13 + $0x1f8] sm:$0xff] }
 0x113   : > { %15509 = vst [vmem:[#allocation61_spill] sm:$0xff] %v12234_v3  ;;  %1854 = vmatprep.mubr.f32.mxu1 %v15234_v11 }
 0x114   : > { %v12239_v52 = vpop.f32.mrb[18].mxu0 }
 0x115   : > { %v12241_v19 = vpop.f32.mrb[18].mxu1  ;;  %v12243_v44 = vpop.f32.mrb[19].mxu0  ;;  %9241 = vmatmul.mubr.msk.f32.gmra.mrb[124].mxu0 %vm457_vm3, %v284_v54 }
 0x116   : > { %15510 = vst [vmem:[#allocation62_spill] sm:$0xff] %v12241_v19  ;;  %15511 = vst [vmem:[#allocation63_spill] sm:$0xff] %v12243_v44  ;;  %9341 = vmatmul.mubr.msk.f32.gmra.mrb[124].mxu1 %vm457_vm3, %v284_v54  ;;  %v12247_v24 = vpop.f32.mrb[19].mxu1  ;;  %1207 = vmatprep.mubr.f32.mxu0 %v15234_v11  ;;  %v286_v54 = vld [vmem:[%s11603_s13 + $0x200] sm:$0xff] }
 0x117   : > { %15512 = vst [vmem:[#allocation64_spill] sm:$0xff] %v12247_v24  ;;  %1860 = vmatprep.mubr.f32.mxu1 %v15234_v11 }
 0x118   : > { %v12252_v3 = vpop.f32.mrb[20].mxu0 }
 0x119   : > { %v12254_v13 = vpop.f32.mrb[20].mxu1  ;;  %v12256_v19 = vpop.f32.mrb[21].mxu0  ;;  %9242 = vmatmul.mubr.msk.f32.gmra.mrb[126].mxu0 %vm457_vm3, %v285_v22 }
 0x11a   : > { %15513 = vst [vmem:[#allocation65_spill] sm:$0xff] %v12254_v13  ;;  %15514 = vst [vmem:[#allocation66_spill] sm:$0xff] %v12256_v19  ;;  %9342 = vmatmul.mubr.msk.f32.gmra.mrb[126].mxu1 %vm457_vm3, %v285_v22  ;;  %v12260_v56 = vpop.f32.mrb[21].mxu1  ;;  %1213 = vmatprep.mubr.f32.mxu0 %v15234_v11  ;;  %v287_v22 = vld [vmem:[%s11603_s13 + $0x208] sm:$0xff] }
 0x11b   : > { %15515 = vst [vmem:[#allocation67_spill] sm:$0xff] %v12260_v56  ;;  %1866 = vmatprep.mubr.f32.mxu1 %v15234_v11 }
 0x11c   : > { %v12265_v24 = vpop.f32.mrb[22].mxu0 }
 0x11d   : > { %v12267_v48 = vpop.f32.mrb[22].mxu1  ;;  %v12269_v13 = vpop.f32.mrb[23].mxu0  ;;  %9243 = vmatmul.mubr.msk.f32.gmra.mrb[128].mxu0 %vm457_vm3, %v286_v54 }
 0x11e   : > { %15516 = vst [vmem:[#allocation68_spill] sm:$0xff] %v12267_v48  ;;  %15517 = vst [vmem:[#allocation69_spill] sm:$0xff] %v12269_v13  ;;  %9343 = vmatmul.mubr.msk.f32.gmra.mrb[128].mxu1 %vm457_vm3, %v286_v54  ;;  %v12273_v41 = vpop.f32.mrb[23].mxu1  ;;  %1219 = vmatprep.mubr.f32.mxu0 %v15234_v11  ;;  %v288_v54 = vld [vmem:[%s11603_s13 + $0x210] sm:$0xff] }
 0x11f   : > { %15518 = vst [vmem:[#allocation70_spill] sm:$0xff] %v12273_v41  ;;  %1872 = vmatprep.mubr.f32.mxu1 %v15234_v11 }
 0x120   : > { %v12278_v56 = vpop.f32.mrb[24].mxu0 }
 0x121   : > { %v12280_v12 = vpop.f32.mrb[24].mxu1  ;;  %v12282_v48 = vpop.f32.mrb[25].mxu0  ;;  %9244 = vmatmul.mubr.msk.f32.gmra.mrb[130].mxu0 %vm457_vm3, %v287_v22 }
 0x122   : > { %15519 = vst [vmem:[#allocation71_spill] sm:$0xff] %v12280_v12  ;;  %15520 = vst [vmem:[#allocation72_spill] sm:$0xff] %v12282_v48  ;;  %9344 = vmatmul.mubr.msk.f32.gmra.mrb[130].mxu1 %vm457_vm3, %v287_v22  ;;  %v12286_v62 = vpop.f32.mrb[25].mxu1  ;;  %1225 = vmatprep.mubr.f32.mxu0 %v15234_v11  ;;  %v289_v22 = vld [vmem:[%s11603_s13 + $0x218] sm:$0xff] }
 0x123   : > { %15521 = vst [vmem:[#allocation73_spill] sm:$0xff] %v12286_v62  ;;  %1878 = vmatprep.mubr.f32.mxu1 %v15234_v11 }
 0x124   : > { %v12291_v41 = vpop.f32.mrb[26].mxu0 }
 0x125   : > { %v12293_v13 = vpop.f32.mrb[26].mxu1  ;;  %v12295_v12 = vpop.f32.mrb[27].mxu0  ;;  %9245 = vmatmul.mubr.msk.f32.gmra.mrb[132].mxu0 %vm457_vm3, %v288_v54 }
 0x126   : > { %15522 = vst [vmem:[#allocation74_spill] sm:$0xff] %v12293_v13  ;;  %15523 = vst [vmem:[#allocation75_spill] sm:$0xff] %v12295_v12  ;;  %9345 = vmatmul.mubr.msk.f32.gmra.mrb[132].mxu1 %vm457_vm3, %v288_v54  ;;  %v12299_v48 = vpop.f32.mrb[27].mxu1  ;;  %1231 = vmatprep.mubr.f32.mxu0 %v15234_v11  ;;  %v290_v54 = vld [vmem:[%s11603_s13 + $0x220] sm:$0xff] }
 0x127   : > { %15524 = vst [vmem:[#allocation76_spill] sm:$0xff] %v12299_v48  ;;  %1884 = vmatprep.mubr.f32.mxu1 %v15234_v11 }
 0x128   : > { %v12304_v62 = vpop.f32.mrb[28].mxu0 }
 0x129   : > { %v12306_v19 = vpop.f32.mrb[28].mxu1  ;;  %v12308_v13 = vpop.f32.mrb[29].mxu0  ;;  %9246 = vmatmul.mubr.msk.f32.gmra.mrb[134].mxu0 %vm457_vm3, %v289_v22 }
 0x12a   : > { %15525 = vst [vmem:[#allocation77_spill] sm:$0xff] %v12306_v19  ;;  %15526 = vst [vmem:[#allocation78_spill] sm:$0xff] %v12308_v13  ;;  %9346 = vmatmul.mubr.msk.f32.gmra.mrb[134].mxu1 %vm457_vm3, %v289_v22  ;;  %v12312_v12 = vpop.f32.mrb[29].mxu1  ;;  %1237 = vmatprep.mubr.f32.mxu0 %v15234_v11  ;;  %v291_v22 = vld [vmem:[%s11603_s13 + $0x228] sm:$0xff] }
 0x12b   : > { %15527 = vst [vmem:[#allocation79_spill] sm:$0xff] %v12312_v12  ;;  %1890 = vmatprep.mubr.f32.mxu1 %v15234_v11 }
 0x12c   : > { %v12317_v48 = vpop.f32.mrb[30].mxu0 }
 0x12d   : > { %v12319_v44 = vpop.f32.mrb[30].mxu1  ;;  %v12321_v19 = vpop.f32.mrb[31].mxu0  ;;  %9247 = vmatmul.mubr.msk.f32.gmra.mrb[136].mxu0 %vm457_vm3, %v290_v54 }
 0x12e   : > { %15528 = vst [vmem:[#allocation80_spill] sm:$0xff] %v12319_v44  ;;  %15529 = vst [vmem:[#allocation81_spill] sm:$0xff] %v12321_v19  ;;  %9347 = vmatmul.mubr.msk.f32.gmra.mrb[136].mxu1 %vm457_vm3, %v290_v54  ;;  %v12325_v13 = vpop.f32.mrb[31].mxu1  ;;  %1243 = vmatprep.mubr.f32.mxu0 %v15234_v11  ;;  %v292_v54 = vld [vmem:[%s11603_s13 + $0x230] sm:$0xff] }
 0x12f   : > { %15530 = vst [vmem:[#allocation82_spill] sm:$0xff] %v12325_v13  ;;  %1896 = vmatprep.mubr.f32.mxu1 %v15234_v11 }
 0x130   : > { %v12330_v12 = vpop.f32.mrb[32].mxu0 }
 0x131   : > { %v12332_v16 = vpop.f32.mrb[32].mxu1  ;;  %v12334_v44 = vpop.f32.mrb[33].mxu0  ;;  %9248 = vmatmul.mubr.msk.f32.gmra.mrb[138].mxu0 %vm457_vm3, %v291_v22 }
 0x132   : > { %15531 = vst [vmem:[#allocation83_spill] sm:$0xff] %v12332_v16  ;;  %15532 = vst [vmem:[#allocation84_spill] sm:$0xff] %v12334_v44  ;;  %9348 = vmatmul.mubr.msk.f32.gmra.mrb[138].mxu1 %vm457_vm3, %v291_v22  ;;  %v12338_v19 = vpop.f32.mrb[33].mxu1  ;;  %1249 = vmatprep.mubr.f32.mxu0 %v15234_v11  ;;  %v293_v22 = vld [vmem:[%s11603_s13 + $0x238] sm:$0xff] }
 0x133   : > { %15533 = vst [vmem:[#allocation85_spill] sm:$0xff] %v12338_v19  ;;  %1902 = vmatprep.mubr.f32.mxu1 %v15234_v11 }
 0x134   : > { %v12343_v13 = vpop.f32.mrb[34].mxu0 }
 0x135   : > { %v12345_v6 = vpop.f32.mrb[34].mxu1  ;;  %v12347_v16 = vpop.f32.mrb[35].mxu0  ;;  %9249 = vmatmul.mubr.msk.f32.gmra.mrb[140].mxu0 %vm457_vm3, %v292_v54 }
 0x136   : > { %15534 = vst [vmem:[#allocation86_spill] sm:$0xff] %v12345_v6  ;;  %15535 = vst [vmem:[#allocation87_spill] sm:$0xff] %v12347_v16  ;;  %9349 = vmatmul.mubr.msk.f32.gmra.mrb[140].mxu1 %vm457_vm3, %v292_v54  ;;  %v12351_v44 = vpop.f32.mrb[35].mxu1  ;;  %1255 = vmatprep.mubr.f32.mxu0 %v15234_v11  ;;  %v294_v54 = vld [vmem:[%s11603_s13 + $0x240] sm:$0xff] }
 0x137   : > { %15536 = vst [vmem:[#allocation88_spill] sm:$0xff] %v12351_v44  ;;  %1908 = vmatprep.mubr.f32.mxu1 %v15234_v11 }
 0x138   : > { %v12356_v19 = vpop.f32.mrb[36].mxu0 }
 0x139   : > { %v12358_v32 = vpop.f32.mrb[36].mxu1  ;;  %v12360_v6 = vpop.f32.mrb[37].mxu0  ;;  %9250 = vmatmul.mubr.msk.f32.gmra.mrb[142].mxu0 %vm457_vm3, %v293_v22 }
 0x13a   : > { %15537 = vst [vmem:[#allocation89_spill] sm:$0xff] %v12358_v32  ;;  %15538 = vst [vmem:[#allocation90_spill] sm:$0xff] %v12360_v6  ;;  %9350 = vmatmul.mubr.msk.f32.gmra.mrb[142].mxu1 %vm457_vm3, %v293_v22  ;;  %v12364_v16 = vpop.f32.mrb[37].mxu1  ;;  %1261 = vmatprep.mubr.f32.mxu0 %v15234_v11  ;;  %v295_v22 = vld [vmem:[%s11603_s13 + $0x248] sm:$0xff] }
 0x13b   : > { %15539 = vst [vmem:[#allocation91_spill] sm:$0xff] %v12364_v16  ;;  %1914 = vmatprep.mubr.f32.mxu1 %v15234_v11 }
 0x13c   : > { %v12369_v44 = vpop.f32.mrb[38].mxu0 }
 0x13d   : > { %v12371_v14 = vpop.f32.mrb[38].mxu1  ;;  %v12373_v32 = vpop.f32.mrb[39].mxu0  ;;  %9251 = vmatmul.mubr.msk.f32.gmra.mrb[144].mxu0 %vm457_vm3, %v294_v54 }
 0x13e   : > { %15540 = vst [vmem:[#allocation92_spill] sm:$0xff] %v12371_v14  ;;  %15541 = vst [vmem:[#allocation93_spill] sm:$0xff] %v12373_v32  ;;  %9351 = vmatmul.mubr.msk.f32.gmra.mrb[144].mxu1 %vm457_vm3, %v294_v54  ;;  %v12377_v6 = vpop.f32.mrb[39].mxu1  ;;  %1267 = vmatprep.mubr.f32.mxu0 %v15234_v11  ;;  %v296_v54 = vld [vmem:[%s11603_s13 + $0x250] sm:$0xff] }
 0x13f   : > { %15542 = vst [vmem:[#allocation94_spill] sm:$0xff] %v12377_v6  ;;  %1920 = vmatprep.mubr.f32.mxu1 %v15234_v11 }
 0x140   : > { %v12382_v16 = vpop.f32.mrb[40].mxu0 }
 0x141   : > { %v12384_v59 = vpop.f32.mrb[40].mxu1  ;;  %v12386_v14 = vpop.f32.mrb[41].mxu0  ;;  %9252 = vmatmul.mubr.msk.f32.gmra.mrb[146].mxu0 %vm457_vm3, %v295_v22 }
 0x142   : > { %15543 = vst [vmem:[#allocation95_spill] sm:$0xff] %v12384_v59  ;;  %15544 = vst [vmem:[#allocation96_spill] sm:$0xff] %v12386_v14  ;;  %9352 = vmatmul.mubr.msk.f32.gmra.mrb[146].mxu1 %vm457_vm3, %v295_v22  ;;  %v12390_v32 = vpop.f32.mrb[41].mxu1  ;;  %1273 = vmatprep.mubr.f32.mxu0 %v15234_v11  ;;  %v297_v22 = vld [vmem:[%s11603_s13 + $0x258] sm:$0xff] }
 0x143   : > { %15545 = vst [vmem:[#allocation97_spill] sm:$0xff] %v12390_v32  ;;  %1926 = vmatprep.mubr.f32.mxu1 %v15234_v11 }
 0x144   : > { %v12395_v6 = vpop.f32.mrb[42].mxu0 }
 0x145   : > { %v12397_v51 = vpop.f32.mrb[42].mxu1  ;;  %v12399_v59 = vpop.f32.mrb[43].mxu0  ;;  %9253 = vmatmul.mubr.msk.f32.gmra.mrb[148].mxu0 %vm457_vm3, %v296_v54 }
 0x146   : > { %15546 = vst [vmem:[#allocation98_spill] sm:$0xff] %v12397_v51  ;;  %15547 = vst [vmem:[#allocation99_spill] sm:$0xff] %v12399_v59  ;;  %9353 = vmatmul.mubr.msk.f32.gmra.mrb[148].mxu1 %vm457_vm3, %v296_v54  ;;  %v12403_v14 = vpop.f32.mrb[43].mxu1  ;;  %1279 = vmatprep.mubr.f32.mxu0 %v15234_v11  ;;  %v298_v54 = vld [vmem:[%s11603_s13 + $0x260] sm:$0xff] }
 0x147   : > { %15548 = vst [vmem:[#allocation100_spill] sm:$0xff] %v12403_v14  ;;  %1932 = vmatprep.mubr.f32.mxu1 %v15234_v11 }
 0x148   : > { %v12408_v32 = vpop.f32.mrb[44].mxu0 }
 0x149   : > { %v12410_v42 = vpop.f32.mrb[44].mxu1  ;;  %v12412_v51 = vpop.f32.mrb[45].mxu0  ;;  %9254 = vmatmul.mubr.msk.f32.gmra.mrb[150].mxu0 %vm457_vm3, %v297_v22 }
 0x14a   : > { %15549 = vst [vmem:[#allocation101_spill] sm:$0xff] %v12410_v42  ;;  %15550 = vst [vmem:[#allocation102_spill] sm:$0xff] %v12412_v51  ;;  %9354 = vmatmul.mubr.msk.f32.gmra.mrb[150].mxu1 %vm457_vm3, %v297_v22  ;;  %v12416_v59 = vpop.f32.mrb[45].mxu1  ;;  %1285 = vmatprep.mubr.f32.mxu0 %v15234_v11  ;;  %v299_v22 = vld [vmem:[%s11603_s13 + $0x268] sm:$0xff] }
 0x14b   : > { %15551 = vst [vmem:[#allocation103_spill] sm:$0xff] %v12416_v59  ;;  %1938 = vmatprep.mubr.f32.mxu1 %v15234_v11 }
 0x14c   : > { %v12421_v14 = vpop.f32.mrb[46].mxu0 }
 0x14d   : > { %15552 = vst [vmem:[#allocation104_spill] sm:$0xff] %v12421_v14  ;;  %v12423_v15 = vpop.f32.mrb[46].mxu1  ;;  %v12425_v42 = vpop.f32.mrb[47].mxu0  ;;  %9255 = vmatmul.mubr.msk.f32.gmra.mrb[152].mxu0 %vm457_vm3, %v298_v54 }
 0x14e   : > { %15553 = vst [vmem:[#allocation105_spill] sm:$0xff] %v12423_v15  ;;  %15554 = vst [vmem:[#allocation106_spill] sm:$0xff] %v12425_v42  ;;  %9355 = vmatmul.mubr.msk.f32.gmra.mrb[152].mxu1 %vm457_vm3, %v298_v54  ;;  %v12429_v51 = vpop.f32.mrb[47].mxu1  ;;  %1291 = vmatprep.mubr.f32.mxu0 %v15234_v11  ;;  %v300_v54 = vld [vmem:[%s11603_s13 + $0x270] sm:$0xff] }
 0x14f   : > { %15555 = vst [vmem:[#allocation107_spill] sm:$0xff] %v12429_v51  ;;  %1944 = vmatprep.mubr.f32.mxu1 %v15234_v11 }
 0x150   : > { %v12434_v59 = vpop.f32.mrb[48].mxu0 }
 0x151   : > { %15556 = vst [vmem:[#allocation108_spill] sm:$0xff] %v12434_v59  ;;  %v12436_v1 = vpop.f32.mrb[48].mxu1  ;;  %v12438_v15 = vpop.f32.mrb[49].mxu0  ;;  %9256 = vmatmul.mubr.msk.f32.gmra.mrb[154].mxu0 %vm457_vm3, %v299_v22 }
 0x152   : > { %15557 = vst [vmem:[#allocation109_spill] sm:$0xff] %v12436_v1  ;;  %15558 = vst [vmem:[#allocation110_spill] sm:$0xff] %v12438_v15  ;;  %9356 = vmatmul.mubr.msk.f32.gmra.mrb[154].mxu1 %vm457_vm3, %v299_v22  ;;  %v12442_v42 = vpop.f32.mrb[49].mxu1  ;;  %1297 = vmatprep.mubr.f32.mxu0 %v15234_v11  ;;  %v301_v22 = vld [vmem:[%s11603_s13 + $0x278] sm:$0xff] }
 0x153   : > { %15559 = vst [vmem:[#allocation111_spill] sm:$0xff] %v12442_v42  ;;  %1950 = vmatprep.mubr.f32.mxu1 %v15234_v11 }
 0x154   : > { %v12447_v51 = vpop.f32.mrb[50].mxu0 }
 0x155   : > { %15560 = vst [vmem:[#allocation112_spill] sm:$0xff] %v12447_v51  ;;  %v12449_v14 = vpop.f32.mrb[50].mxu1  ;;  %v12451_v1 = vpop.f32.mrb[51].mxu0  ;;  %9257 = vmatmul.mubr.msk.f32.gmra.mrb[156].mxu0 %vm457_vm3, %v300_v54 }
 0x156   : > { %15561 = vst [vmem:[#allocation113_spill] sm:$0xff] %v12449_v14  ;;  %15562 = vst [vmem:[#allocation114_spill] sm:$0xff] %v12451_v1  ;;  %9357 = vmatmul.mubr.msk.f32.gmra.mrb[156].mxu1 %vm457_vm3, %v300_v54  ;;  %v12455_v15 = vpop.f32.mrb[51].mxu1  ;;  %1303 = vmatprep.mubr.f32.mxu0 %v15234_v11  ;;  %v302_v54 = vld [vmem:[%s11603_s13 + $0x280] sm:$0xff] }
 0x157   : > { %15563 = vst [vmem:[#allocation115_spill] sm:$0xff] %v12455_v15  ;;  %1956 = vmatprep.mubr.f32.mxu1 %v15234_v11 }
 0x158   : > { %v12460_v42 = vpop.f32.mrb[52].mxu0 }
 0x159   : > { %15564 = vst [vmem:[#allocation116_spill] sm:$0xff] %v12460_v42  ;;  %v12462_v59 = vpop.f32.mrb[52].mxu1  ;;  %v12464_v14 = vpop.f32.mrb[53].mxu0  ;;  %9258 = vmatmul.mubr.msk.f32.gmra.mrb[158].mxu0 %vm457_vm3, %v301_v22 }
 0x15a   : > { %15565 = vst [vmem:[#allocation117_spill] sm:$0xff] %v12462_v59  ;;  %15566 = vst [vmem:[#allocation118_spill] sm:$0xff] %v12464_v14  ;;  %9358 = vmatmul.mubr.msk.f32.gmra.mrb[158].mxu1 %vm457_vm3, %v301_v22  ;;  %v12468_v1 = vpop.f32.mrb[53].mxu1  ;;  %1309 = vmatprep.mubr.f32.mxu0 %v15234_v11  ;;  %v303_v22 = vld [vmem:[%s11603_s13 + $0x288] sm:$0xff] }
 0x15b   : > { %15567 = vst [vmem:[#allocation119_spill] sm:$0xff] %v12468_v1  ;;  %1962 = vmatprep.mubr.f32.mxu1 %v15234_v11 }
 0x15c   : > { %v12473_v15 = vpop.f32.mrb[54].mxu0 }
 0x15d   : > { %15568 = vst [vmem:[#allocation120_spill] sm:$0xff] %v12473_v15  ;;  %v12475_v51 = vpop.f32.mrb[54].mxu1  ;;  %v12477_v59 = vpop.f32.mrb[55].mxu0  ;;  %9259 = vmatmul.mubr.msk.f32.gmra.mrb[160].mxu0 %vm457_vm3, %v302_v54 }
 0x15e   : > { %15569 = vst [vmem:[#allocation121_spill] sm:$0xff] %v12475_v51  ;;  %15570 = vst [vmem:[#allocation122_spill] sm:$0xff] %v12477_v59  ;;  %9359 = vmatmul.mubr.msk.f32.gmra.mrb[160].mxu1 %vm457_vm3, %v302_v54  ;;  %v12481_v14 = vpop.f32.mrb[55].mxu1  ;;  %1315 = vmatprep.mubr.f32.mxu0 %v15234_v11  ;;  %v304_v54 = vld [vmem:[%s11603_s13 + $0x290] sm:$0xff] }
 0x15f   : > { %15571 = vst [vmem:[#allocation123_spill] sm:$0xff] %v12481_v14  ;;  %1968 = vmatprep.mubr.f32.mxu1 %v15234_v11 }
 0x160   : > { %v12486_v1 = vpop.f32.mrb[56].mxu0 }
 0x161   : > { %15572 = vst [vmem:[#allocation124_spill] sm:$0xff] %v12486_v1  ;;  %v12488_v42 = vpop.f32.mrb[56].mxu1  ;;  %v12490_v51 = vpop.f32.mrb[57].mxu0  ;;  %9260 = vmatmul.mubr.msk.f32.gmra.mrb[162].mxu0 %vm457_vm3, %v303_v22 }
 0x162   : > { %15573 = vst [vmem:[#allocation125_spill] sm:$0xff] %v12488_v42  ;;  %15574 = vst [vmem:[#allocation126_spill] sm:$0xff] %v12490_v51  ;;  %9360 = vmatmul.mubr.msk.f32.gmra.mrb[162].mxu1 %vm457_vm3, %v303_v22  ;;  %v12494_v59 = vpop.f32.mrb[57].mxu1  ;;  %1321 = vmatprep.mubr.f32.mxu0 %v15234_v11  ;;  %v305_v22 = vld [vmem:[%s11603_s13 + $0x298] sm:$0xff] }
 0x163   : > { %15575 = vst [vmem:[#allocation127_spill] sm:$0xff] %v12494_v59  ;;  %1974 = vmatprep.mubr.f32.mxu1 %v15234_v11 }
 0x164   : > { %v12499_v14 = vpop.f32.mrb[58].mxu0 }
 0x165   : > { %15576 = vst [vmem:[#allocation128_spill] sm:$0xff] %v12499_v14  ;;  %v12501_v15 = vpop.f32.mrb[58].mxu1  ;;  %v12503_v42 = vpop.f32.mrb[59].mxu0  ;;  %9261 = vmatmul.mubr.msk.f32.gmra.mrb[164].mxu0 %vm457_vm3, %v304_v54 }
 0x166   : > { %15577 = vst [vmem:[#allocation129_spill] sm:$0xff] %v12501_v15  ;;  %15578 = vst [vmem:[#allocation130_spill] sm:$0xff] %v12503_v42  ;;  %9361 = vmatmul.mubr.msk.f32.gmra.mrb[164].mxu1 %vm457_vm3, %v304_v54  ;;  %v12507_v51 = vpop.f32.mrb[59].mxu1  ;;  %1327 = vmatprep.mubr.f32.mxu0 %v15234_v11  ;;  %v306_v54 = vld [vmem:[%s11603_s13 + $0x2a0] sm:$0xff] }
 0x167   : > { %15579 = vst [vmem:[#allocation131_spill] sm:$0xff] %v12507_v51  ;;  %1980 = vmatprep.mubr.f32.mxu1 %v15234_v11 }
 0x168   : > { %v12512_v59 = vpop.f32.mrb[60].mxu0 }
 0x169   : > { %15580 = vst [vmem:[#allocation132_spill] sm:$0xff] %v12512_v59  ;;  %v12514_v1 = vpop.f32.mrb[60].mxu1  ;;  %v12516_v15 = vpop.f32.mrb[61].mxu0  ;;  %9262 = vmatmul.mubr.msk.f32.gmra.mrb[166].mxu0 %vm457_vm3, %v305_v22 }
 0x16a   : > { %15581 = vst [vmem:[#allocation133_spill] sm:$0xff] %v12514_v1  ;;  %15582 = vst [vmem:[#allocation134_spill] sm:$0xff] %v12516_v15  ;;  %9362 = vmatmul.mubr.msk.f32.gmra.mrb[166].mxu1 %vm457_vm3, %v305_v22  ;;  %v12520_v42 = vpop.f32.mrb[61].mxu1  ;;  %1333 = vmatprep.mubr.f32.mxu0 %v15234_v11  ;;  %v307_v22 = vld [vmem:[%s11603_s13 + $0x2a8] sm:$0xff] }
 0x16b   : > { %15583 = vst [vmem:[#allocation135_spill] sm:$0xff] %v12520_v42  ;;  %1986 = vmatprep.mubr.f32.mxu1 %v15234_v11 }
 0x16c   : > { %v12525_v51 = vpop.f32.mrb[62].mxu0 }
 0x16d   : > { %15584 = vst [vmem:[#allocation136_spill] sm:$0xff] %v12525_v51  ;;  %v12527_v14 = vpop.f32.mrb[62].mxu1  ;;  %v12529_v1 = vpop.f32.mrb[63].mxu0  ;;  %9263 = vmatmul.mubr.msk.f32.gmra.mrb[168].mxu0 %vm457_vm3, %v306_v54 }
 0x16e   : > { %15585 = vst [vmem:[#allocation137_spill] sm:$0xff] %v12527_v14  ;;  %15586 = vst [vmem:[#allocation138_spill] sm:$0xff] %v12529_v1  ;;  %9363 = vmatmul.mubr.msk.f32.gmra.mrb[168].mxu1 %vm457_vm3, %v306_v54  ;;  %v12533_v15 = vpop.f32.mrb[63].mxu1  ;;  %1339 = vmatprep.mubr.f32.mxu0 %v15234_v11  ;;  %v308_v54 = vld [vmem:[%s11603_s13 + $0x2b0] sm:$0xff] }
 0x16f   : > { %15587 = vst [vmem:[#allocation139_spill] sm:$0xff] %v12533_v15  ;;  %1992 = vmatprep.mubr.f32.mxu1 %v15234_v11 }
 0x170   : > { %v12538_v42 = vpop.f32.mrb[64].mxu0 }
 0x171   : > { %15588 = vst [vmem:[#allocation140_spill] sm:$0xff] %v12538_v42  ;;  %v12540_v59 = vpop.f32.mrb[64].mxu1  ;;  %v12542_v14 = vpop.f32.mrb[65].mxu0  ;;  %9264 = vmatmul.mubr.msk.f32.gmra.mrb[170].mxu0 %vm457_vm3, %v307_v22 }
 0x172   : > { %15589 = vst [vmem:[#allocation141_spill] sm:$0xff] %v12540_v59  ;;  %15590 = vst [vmem:[#allocation142_spill] sm:$0xff] %v12542_v14  ;;  %9364 = vmatmul.mubr.msk.f32.gmra.mrb[170].mxu1 %vm457_vm3, %v307_v22  ;;  %v12546_v1 = vpop.f32.mrb[65].mxu1  ;;  %1345 = vmatprep.mubr.f32.mxu0 %v15234_v11  ;;  %v309_v22 = vld [vmem:[%s11603_s13 + $0x2b8] sm:$0xff] }
 0x173   : > { %15591 = vst [vmem:[#allocation143_spill] sm:$0xff] %v12546_v1  ;;  %1998 = vmatprep.mubr.f32.mxu1 %v15234_v11 }
 0x174   : > { %v12551_v15 = vpop.f32.mrb[66].mxu0 }
 0x175   : > { %15592 = vst [vmem:[#allocation144_spill] sm:$0xff] %v12551_v15  ;;  %v12553_v51 = vpop.f32.mrb[66].mxu1  ;;  %v12555_v59 = vpop.f32.mrb[67].mxu0  ;;  %9265 = vmatmul.mubr.msk.f32.gmra.mrb[172].mxu0 %vm457_vm3, %v308_v54 }
 0x176   : > { %15593 = vst [vmem:[#allocation145_spill] sm:$0xff] %v12553_v51  ;;  %15594 = vst [vmem:[#allocation146_spill] sm:$0xff] %v12555_v59  ;;  %9365 = vmatmul.mubr.msk.f32.gmra.mrb[172].mxu1 %vm457_vm3, %v308_v54  ;;  %v12559_v14 = vpop.f32.mrb[67].mxu1  ;;  %1351 = vmatprep.mubr.f32.mxu0 %v15234_v11  ;;  %v310_v54 = vld [vmem:[%s11603_s13 + $0x2c0] sm:$0xff] }
 0x177   : > { %15595 = vst [vmem:[#allocation147_spill] sm:$0xff] %v12559_v14  ;;  %2004 = vmatprep.mubr.f32.mxu1 %v15234_v11 }
 0x178   : > { %v12564_v1 = vpop.f32.mrb[68].mxu0 }
 0x179   : > { %15596 = vst [vmem:[#allocation148_spill] sm:$0xff] %v12564_v1  ;;  %v12566_v42 = vpop.f32.mrb[68].mxu1  ;;  %v12568_v51 = vpop.f32.mrb[69].mxu0  ;;  %9266 = vmatmul.mubr.msk.f32.gmra.mrb[174].mxu0 %vm457_vm3, %v309_v22 }
 0x17a   : > { %15597 = vst [vmem:[#allocation149_spill] sm:$0xff] %v12566_v42  ;;  %15598 = vst [vmem:[#allocation150_spill] sm:$0xff] %v12568_v51  ;;  %9366 = vmatmul.mubr.msk.f32.gmra.mrb[174].mxu1 %vm457_vm3, %v309_v22  ;;  %v12572_v59 = vpop.f32.mrb[69].mxu1  ;;  %1357 = vmatprep.mubr.f32.mxu0 %v15234_v11  ;;  %v311_v22 = vld [vmem:[%s11603_s13 + $0x2c8] sm:$0xff] }
 0x17b   : > { %15599 = vst [vmem:[#allocation151_spill] sm:$0xff] %v12572_v59  ;;  %2010 = vmatprep.mubr.f32.mxu1 %v15234_v11 }
 0x17c   : > { %v12577_v14 = vpop.f32.mrb[70].mxu0 }
 0x17d   : > { %15600 = vst [vmem:[#allocation152_spill] sm:$0xff] %v12577_v14  ;;  %v12579_v15 = vpop.f32.mrb[70].mxu1  ;;  %v12581_v42 = vpop.f32.mrb[71].mxu0  ;;  %9267 = vmatmul.mubr.msk.f32.gmra.mrb[176].mxu0 %vm457_vm3, %v310_v54 }
 0x17e   : > { %15601 = vst [vmem:[#allocation153_spill] sm:$0xff] %v12579_v15  ;;  %15602 = vst [vmem:[#allocation154_spill] sm:$0xff] %v12581_v42  ;;  %9367 = vmatmul.mubr.msk.f32.gmra.mrb[176].mxu1 %vm457_vm3, %v310_v54  ;;  %v12585_v51 = vpop.f32.mrb[71].mxu1  ;;  %1363 = vmatprep.mubr.f32.mxu0 %v15234_v11  ;;  %v312_v54 = vld [vmem:[%s11603_s13 + $0x2d0] sm:$0xff] }
 0x17f   : > { %15603 = vst [vmem:[#allocation155_spill] sm:$0xff] %v12585_v51  ;;  %2016 = vmatprep.mubr.f32.mxu1 %v15234_v11 }
 0x180   : > { %v12590_v59 = vpop.f32.mrb[72].mxu0 }
 0x181   : > { %15604 = vst [vmem:[#allocation156_spill] sm:$0xff] %v12590_v59  ;;  %v12592_v1 = vpop.f32.mrb[72].mxu1  ;;  %v12594_v15 = vpop.f32.mrb[73].mxu0  ;;  %9268 = vmatmul.mubr.msk.f32.gmra.mrb[178].mxu0 %vm457_vm3, %v311_v22 }
 0x182   : > { %15605 = vst [vmem:[#allocation157_spill] sm:$0xff] %v12592_v1  ;;  %15606 = vst [vmem:[#allocation158_spill] sm:$0xff] %v12594_v15  ;;  %9368 = vmatmul.mubr.msk.f32.gmra.mrb[178].mxu1 %vm457_vm3, %v311_v22  ;;  %v12598_v42 = vpop.f32.mrb[73].mxu1  ;;  %1369 = vmatprep.mubr.f32.mxu0 %v15234_v11  ;;  %v313_v22 = vld [vmem:[%s11603_s13 + $0x2d8] sm:$0xff] }
 0x183   : > { %15607 = vst [vmem:[#allocation159_spill] sm:$0xff] %v12598_v42  ;;  %2022 = vmatprep.mubr.f32.mxu1 %v15234_v11 }
 0x184   : > { %v12603_v51 = vpop.f32.mrb[74].mxu0 }
 0x185   : > { %15608 = vst [vmem:[#allocation160_spill] sm:$0xff] %v12603_v51  ;;  %v12605_v14 = vpop.f32.mrb[74].mxu1  ;;  %v12607_v1 = vpop.f32.mrb[75].mxu0  ;;  %9269 = vmatmul.mubr.msk.f32.gmra.mrb[180].mxu0 %vm457_vm3, %v312_v54 }
 0x186   : > { %15609 = vst [vmem:[#allocation161_spill] sm:$0xff] %v12605_v14  ;;  %15610 = vst [vmem:[#allocation162_spill] sm:$0xff] %v12607_v1  ;;  %9369 = vmatmul.mubr.msk.f32.gmra.mrb[180].mxu1 %vm457_vm3, %v312_v54  ;;  %v12611_v15 = vpop.f32.mrb[75].mxu1  ;;  %1375 = vmatprep.mubr.f32.mxu0 %v15234_v11  ;;  %v314_v54 = vld [vmem:[%s11603_s13 + $0x2e0] sm:$0xff] }
 0x187   : > { %15611 = vst [vmem:[#allocation163_spill] sm:$0xff] %v12611_v15  ;;  %2028 = vmatprep.mubr.f32.mxu1 %v15234_v11 }
 0x188   : > { %v12616_v42 = vpop.f32.mrb[76].mxu0 }
 0x189   : > { %15612 = vst [vmem:[#allocation164_spill] sm:$0xff] %v12616_v42  ;;  %v12618_v59 = vpop.f32.mrb[76].mxu1  ;;  %v12620_v14 = vpop.f32.mrb[77].mxu0  ;;  %9270 = vmatmul.mubr.msk.f32.gmra.mrb[182].mxu0 %vm457_vm3, %v313_v22 }
 0x18a   : > { %15613 = vst [vmem:[#allocation165_spill] sm:$0xff] %v12618_v59  ;;  %15614 = vst [vmem:[#allocation166_spill] sm:$0xff] %v12620_v14  ;;  %9370 = vmatmul.mubr.msk.f32.gmra.mrb[182].mxu1 %vm457_vm3, %v313_v22  ;;  %v12624_v1 = vpop.f32.mrb[77].mxu1  ;;  %1381 = vmatprep.mubr.f32.mxu0 %v15234_v11  ;;  %v315_v22 = vld [vmem:[%s11603_s13 + $0x2e8] sm:$0xff] }
 0x18b   : > { %15615 = vst [vmem:[#allocation167_spill] sm:$0xff] %v12624_v1  ;;  %2034 = vmatprep.mubr.f32.mxu1 %v15234_v11 }
 0x18c   : > { %v12629_v15 = vpop.f32.mrb[78].mxu0 }
 0x18d   : > { %15616 = vst [vmem:[#allocation168_spill] sm:$0xff] %v12629_v15  ;;  %v12631_v51 = vpop.f32.mrb[78].mxu1  ;;  %v12633_v59 = vpop.f32.mrb[79].mxu0  ;;  %9271 = vmatmul.mubr.msk.f32.gmra.mrb[184].mxu0 %vm457_vm3, %v314_v54 }
 0x18e   : > { %15617 = vst [vmem:[#allocation169_spill] sm:$0xff] %v12631_v51  ;;  %15618 = vst [vmem:[#allocation170_spill] sm:$0xff] %v12633_v59  ;;  %9371 = vmatmul.mubr.msk.f32.gmra.mrb[184].mxu1 %vm457_vm3, %v314_v54  ;;  %v12637_v14 = vpop.f32.mrb[79].mxu1  ;;  %1387 = vmatprep.mubr.f32.mxu0 %v15234_v11  ;;  %v316_v54 = vld [vmem:[%s11603_s13 + $0x2f0] sm:$0xff] }
 0x18f   : > { %15619 = vst [vmem:[#allocation171_spill] sm:$0xff] %v12637_v14  ;;  %2040 = vmatprep.mubr.f32.mxu1 %v15234_v11 }
 0x190   : > { %v12642_v1 = vpop.f32.mrb[80].mxu0 }
 0x191   : > { %15620 = vst [vmem:[#allocation172_spill] sm:$0xff] %v12642_v1  ;;  %v12644_v42 = vpop.f32.mrb[80].mxu1  ;;  %v12646_v51 = vpop.f32.mrb[81].mxu0  ;;  %9272 = vmatmul.mubr.msk.f32.gmra.mrb[186].mxu0 %vm457_vm3, %v315_v22 }
 0x192   : > { %15621 = vst [vmem:[#allocation173_spill] sm:$0xff] %v12644_v42  ;;  %15622 = vst [vmem:[#allocation174_spill] sm:$0xff] %v12646_v51  ;;  %9372 = vmatmul.mubr.msk.f32.gmra.mrb[186].mxu1 %vm457_vm3, %v315_v22  ;;  %v12650_v59 = vpop.f32.mrb[81].mxu1  ;;  %1393 = vmatprep.mubr.f32.mxu0 %v15234_v11  ;;  %v317_v22 = vld [vmem:[%s11603_s13 + $0x2f8] sm:$0xff] }
 0x193   : > { %15623 = vst [vmem:[#allocation175_spill] sm:$0xff] %v12650_v59  ;;  %2046 = vmatprep.mubr.f32.mxu1 %v15234_v11 }
 0x194   : > { %v12655_v14 = vpop.f32.mrb[82].mxu0 }
 0x195   : > { %15624 = vst [vmem:[#allocation176_spill] sm:$0xff] %v12655_v14  ;;  %v12657_v15 = vpop.f32.mrb[82].mxu1  ;;  %v12659_v42 = vpop.f32.mrb[83].mxu0  ;;  %9273 = vmatmul.mubr.msk.f32.gmra.mrb[188].mxu0 %vm457_vm3, %v316_v54 }
 0x196   : > { %15625 = vst [vmem:[#allocation177_spill] sm:$0xff] %v12657_v15  ;;  %15626 = vst [vmem:[#allocation178_spill] sm:$0xff] %v12659_v42  ;;  %9373 = vmatmul.mubr.msk.f32.gmra.mrb[188].mxu1 %vm457_vm3, %v316_v54  ;;  %v12663_v51 = vpop.f32.mrb[83].mxu1  ;;  %1399 = vmatprep.mubr.f32.mxu0 %v15234_v11  ;;  %v318_v54 = vld [vmem:[%s11603_s13 + $0x300] sm:$0xff] }
 0x197   : > { %15627 = vst [vmem:[#allocation179_spill] sm:$0xff] %v12663_v51  ;;  %2052 = vmatprep.mubr.f32.mxu1 %v15234_v11 }
 0x198   : > { %v12668_v59 = vpop.f32.mrb[84].mxu0 }
 0x199   : > { %15628 = vst [vmem:[#allocation180_spill] sm:$0xff] %v12668_v59  ;;  %v12670_v1 = vpop.f32.mrb[84].mxu1  ;;  %v12672_v15 = vpop.f32.mrb[85].mxu0  ;;  %9274 = vmatmul.mubr.msk.f32.gmra.mrb[190].mxu0 %vm457_vm3, %v317_v22 }
 0x19a   : > { %15629 = vst [vmem:[#allocation181_spill] sm:$0xff] %v12670_v1  ;;  %15630 = vst [vmem:[#allocation182_spill] sm:$0xff] %v12672_v15  ;;  %9374 = vmatmul.mubr.msk.f32.gmra.mrb[190].mxu1 %vm457_vm3, %v317_v22  ;;  %v12676_v42 = vpop.f32.mrb[85].mxu1  ;;  %1405 = vmatprep.mubr.f32.mxu0 %v15234_v11  ;;  %v319_v22 = vld [vmem:[%s11603_s13 + $0x308] sm:$0xff]  ;;  %s215_s13 = sand.u32 1, %s11430_s19  }
 0x19b   : > { %15631 = vst [vmem:[#allocation183_spill] sm:$0xff] %v12676_v42  ;;  %2058 = vmatprep.mubr.f32.mxu1 %v15234_v11  ;;  %s216_s23 = scalar_lea.vmem [#allocation2], %s215_s13  ;;  %s9105_s9 = scalar_lea.sflag [#allocation3], %s215_s13 }
 0x19c   : > { %v12681_v51 = vpop.f32.mrb[86].mxu0  ;;  %s9117_s30 = sshll.u32 %s216_s23, 4  ;;  %s15032_s30 = int_to_ptr.vmem [resolvable:$true] %s9117_s30 }
 0x19d   : > { %15632 = vst [vmem:[#allocation184_spill] sm:$0xff] %v12681_v51  ;;  %v12683_v14 = vpop.f32.mrb[86].mxu1  ;;  %v12685_v59 = vpop.f32.mrb[87].mxu0  ;;  %9275 = vmatmul.mubr.msk.f32.gmra.mrb[192].mxu0 %vm457_vm3, %v318_v54  ;;  %s11376_s10 = scalar_lea.vmem %s15032_s30, 16  ;;  %p11383_p0 = scmp.lt.s32.totalorder %s15032_s30, %s11381_s11 }
 0x19e   : > { %15633 = vst [vmem:[#allocation185_spill] sm:$0xff] %v12683_v14  ;;  %15634 = vst [vmem:[#allocation186_spill] sm:$0xff] %v12685_v59  ;;  %9375 = vmatmul.mubr.msk.f32.gmra.mrb[192].mxu1 %vm457_vm3, %v318_v54  ;;  %v12689_v1 = vpop.f32.mrb[87].mxu1  ;;  %1411 = vmatprep.mubr.f32.mxu0 %v15234_v11  ;;  %p11377_p11 = scmp.ne.s32.totalorder %s15032_s30, %s11376_s10  ;;  %p11384_p1 = scmp.lt.s32.totalorder %s11382_s12, %s11376_s10 }
 0x19f   : > { %15635 = vst [vmem:[#allocation187_spill] sm:$0xff] %v12689_v1  ;;  %2064 = vmatprep.mubr.f32.mxu1 %v15234_v11 }
 0x1a0   : > { %v12694_v42 = vpop.f32.mrb[88].mxu0  ;;  %p11378_p12 = pnand %p11377_p11, %p11511_p5  ;;  %p11385_p2 = por %p11384_p1, %p11383_p0 }
 0x1a1   : > { %v12696_v15 = vpop.f32.mrb[88].mxu1  ;;  %v12698_v51 = vpop.f32.mrb[89].mxu0  ;;  %9276 = vmatmul.mubr.msk.f32.gmra.mrb[194].mxu0 %vm457_vm3, %v319_v22 }
 0x1a2   : > { %15636 = vst [vmem:[#allocation188_spill] sm:$0xff] %v12696_v15  ;;  %15637 = vst [vmem:[#allocation189_spill] sm:$0xff] %v12698_v51  ;;  %9376 = vmatmul.mubr.msk.f32.gmra.mrb[194].mxu1 %vm457_vm3, %v319_v22  ;;  %v12702_v14 = vpop.f32.mrb[89].mxu1  ;;  %2135 = vmatprep.mubr.f32.mxu0 %v15234_v11  ;;  %p11379_p13 = pneg %p11378_p12 }
 0x1a3   : > { %15638 = vst [vmem:[#allocation190_spill] sm:$0xff] %v12702_v14  ;;  %2788 = vmatprep.mubr.f32.mxu1 %v15234_v11 }
 0x1a4   : > { %v12706_v54 = vpop.f32.mrb[90].mxu0  ;;  %p11386_p3 = pnand %p11385_p2, %p11379_p13 }
 0x1a5   : > { %v12708_v1 = vpop.f32.mrb[90].mxu1  ;;  %v12710_v59 = vpop.f32.mrb[91].mxu0  ;;  %2136 = vmatmul.mubr.f32.vlgmr.msra.gmra.mrb[196].mxu0 %v12084_v60 }
 0x1a6   : > { %15639 = vst [vmem:[#allocation191_spill] sm:$0xff] %v12708_v1  ;;  %15640 = vst [vmem:[#allocation192_spill] sm:$0xff] %v12710_v59  ;;  %2789 = vmatmul.mubr.f32.vlgmr.msra.gmra.mrb[196].mxu1 %v12084_v60  ;;  %v12714_v15 = vpop.f32.mrb[91].mxu1  ;;  %9529 = vmatpush1.bf16.msra.mxu0 %v11593_v25 }
 0x1a7   : > { %15641 = vst [vmem:[#allocation193_spill] sm:$0xff] %v12714_v15  ;;  %9561 = vmatpush1.bf16.msra.mxu1 %v11595_v26  ;;  %2141 = vmatprep.mubr.f32.mxu0 %v15234_v11 }
 0x1a8   : > { %2794 = vmatprep.mubr.f32.mxu1 %v15234_v11  ;;  %v12720_v22 = vpop.f32.mrb[92].mxu0  ;;  %9531 = vmatprep.subr.bf16.mxu0 %v11613_v31 }
 0x1a9   : > { %v12722_v14 = vpop.f32.mrb[92].mxu1  ;;  %9563 = vmatprep.subr.bf16.mxu1 %v11621_v34  ;;  %v12726_v1 = vpop.f32.mrb[93].mxu0 }
 0x1aa   : > { %15642 = vst [vmem:[#allocation194_spill] sm:$0xff] %v12722_v14  ;;  %15643 = vst [vmem:[#allocation195_spill] sm:$0xff] %v12726_v1  ;;  %v12728_v60 = vpop.f32.mrb[93].mxu1  ;;  %9533 = vmatpush1.bf16.msra.mxu0 %v11633_v37 }
 0x1ab   : > { %15644 = vst [vmem:[#allocation196_spill] sm:$0xff] %v12728_v60  ;;  %9565 = vmatpush1.bf16.msra.mxu1 %v11642_v39  ;;  %9535 = vmatprep.subr.bf16.mxu0 %v11666_v46  ;;  %v15648_v60 = vmov 0.0  }
 0x1ac   : > { %9567 = vmatprep.subr.bf16.mxu1 %v11676_v50  ;;  %v12734_v11 = vpop.f32.mrb[94].mxu0 }
 0x1ad   : > { %v12736_v15 = vpop.f32.mrb[94].mxu1  ;;  %v12738_v14 = vpop.f32.mrb[95].mxu0  ;;  %2142 = vmatmul.mubr.f32.gmra.mrb[196].mxu0 %v12105_v10 }
 0x1ae   : > { %15645 = vst [vmem:[#allocation197_spill] sm:$0xff] %v12736_v15  ;;  %15646 = vst [vmem:[#allocation198_spill] sm:$0xff] %v12738_v14  ;;  %2795 = vmatmul.mubr.f32.gmra.mrb[196].mxu1 %v12105_v10  ;;  %v12742_v1 = vpop.f32.mrb[95].mxu1  ;;  %2147 = vmatprep.mubr.f32.mxu0 %v15648_v60 }
 0x1af   : > { %15647 = vst [vmem:[#allocation199_spill] sm:$0xff] %v12742_v1  ;;  %2800 = vmatprep.mubr.f32.mxu1 %v15648_v60  ;;  %9537 = vmatpush1.bf16.msra.mxu0 %v11674_v49 }
 0x1b0   : > { %9569 = vmatpush1.bf16.msra.mxu1 %v11685_v53  ;;  %v12748_v59 = vpop.f32.mrb[96].mxu0  ;;  %9539 = vmatprep.subr.bf16.mxu0 %v11706_v58 }
 0x1b1   : > { %v12750_v51 = vpop.f32.mrb[96].mxu1  ;;  %9571 = vmatprep.subr.bf16.mxu1 %v11731_v2  ;;  %v12754_v15 = vpop.f32.mrb[97].mxu0 }
 0x1b2   : > { %15649 = vst [vmem:[#allocation200_spill] sm:$0xff] %v12750_v51  ;;  %15650 = vst [vmem:[#allocation201_spill] sm:$0xff] %v12754_v15  ;;  %v12756_v10 = vpop.f32.mrb[97].mxu1 }
 0x1b3   : > { %15651 = vst [vmem:[#allocation202_spill] sm:$0xff] %v12756_v10  ;;  %9541 = vmatpush1.bf16.msra.mxu0 %v11714_v61 }
 0x1b4   : > { %9573 = vmatpush1.bf16.msra.mxu1 %v11737_v4  ;;  %v12760_v1 = vpop.f32.mrb[98].mxu0  ;;  %9543 = vmatprep.subr.bf16.mxu0 %v11802_v20 }
 0x1b5   : > { %v12762_v14 = vpop.f32.mrb[98].mxu1  ;;  %9575 = vmatprep.subr.bf16.mxu1 %v11830_v33  ;;  %v12766_v51 = vpop.f32.mrb[99].mxu0  ;;  %2148 = vmatmul.mubr.f32.gmra.mrb[196].mxu0 %v12144_v40 }
 0x1b6   : > { %15652 = vst [vmem:[#allocation203_spill] sm:$0xff] %v12762_v14  ;;  %15653 = vst [vmem:[#allocation204_spill] sm:$0xff] %v12766_v51  ;;  %2801 = vmatmul.mubr.f32.gmra.mrb[196].mxu1 %v12144_v40  ;;  %v12770_v15 = vpop.f32.mrb[99].mxu1  ;;  %2153 = vmatprep.mubr.f32.mxu0 %v15648_v60 }
 0x1b7   : > { %15654 = vst [vmem:[#allocation205_spill] sm:$0xff] %v12770_v15  ;;  %2806 = vmatprep.mubr.f32.mxu1 %v15648_v60  ;;  %9545 = vmatpush1.bf16.msra.mxu0 %v11818_v28 }
 0x1b8   : > { %9577 = vmatpush1.bf16.msra.mxu1 %v11833_v35  ;;  %v12776_v10 = vpop.f32.mrb[100].mxu0  ;;  %9547 = vmatprep.subr.bf16.mxu0 %v11906_v57 }
 0x1b9   : > { %v12778_v14 = vpop.f32.mrb[100].mxu1  ;;  %9579 = vmatprep.subr.bf16.mxu1 %v11919_v0  ;;  %v12782_v51 = vpop.f32.mrb[101].mxu0 }
 0x1ba   : > { %15655 = vst [vmem:[#allocation206_spill] sm:$0xff] %v12778_v14  ;;  %15656 = vst [vmem:[#allocation207_spill] sm:$0xff] %v12782_v51  ;;  %v12784_v40 = vpop.f32.mrb[101].mxu1 }
 0x1bb   : > { %15657 = vst [vmem:[#allocation208_spill] sm:$0xff] %v12784_v40  ;;  %9549 = vmatpush1.bf16.msra.mxu0 %v11917_v63 }
 0x1bc   : > { %9581 = vmatpush1.bf16.msra.mxu1 %v11930_v5  ;;  %v12788_v15 = vpop.f32.mrb[102].mxu0  ;;  %9551 = vmatprep.subr.bf16.mxu0 %v12002_v27 }
 0x1bd   : > { %v12790_v28 = vpop.f32.mrb[102].mxu1  ;;  %9583 = vmatprep.subr.bf16.mxu1 %v12018_v38  ;;  %v12794_v14 = vpop.f32.mrb[103].mxu0  ;;  %2154 = vmatmul.mubr.f32.gmra.mrb[196].mxu0 %v12160_v47 }
 0x1be   : > { %15658 = vst [vmem:[#allocation209_spill] sm:$0xff] %v12790_v28  ;;  %15659 = vst [vmem:[#allocation210_spill] sm:$0xff] %v12794_v14  ;;  %2807 = vmatmul.mubr.f32.gmra.mrb[196].mxu1 %v12160_v47  ;;  %v12798_v51 = vpop.f32.mrb[103].mxu1  ;;  %2159 = vmatprep.mubr.f32.mxu0 %v15648_v60 }
 0x1bf   : > { %15660 = vst [vmem:[#allocation211_spill] sm:$0xff] %v12798_v51  ;;  %2812 = vmatprep.mubr.f32.mxu1 %v15648_v60  ;;  %9553 = vmatpush1.bf16.msra.mxu0 %v12007_v30 }
 0x1c0   : > { %9585 = vmatpush1.bf16.msra.mxu1 %v12029_v43  ;;  %v12804_v40 = vpop.f32.mrb[104].mxu0  ;;  %9555 = vmatprep.subr.bf16.mxu0 %v12103_v9 }
 0x1c1   : > { %v12806_v28 = vpop.f32.mrb[104].mxu1  ;;  %9587 = vmatprep.subr.bf16.mxu1 %v12136_v29  ;;  %v12810_v14 = vpop.f32.mrb[105].mxu0 }
 0x1c2   : > { %15661 = vst [vmem:[#allocation212_spill] sm:$0xff] %v12806_v28  ;;  %15662 = vst [vmem:[#allocation213_spill] sm:$0xff] %v12810_v14  ;;  %v12812_v47 = vpop.f32.mrb[105].mxu1 }
 0x1c3   : > { %15663 = vst [vmem:[#allocation214_spill] sm:$0xff] %v12812_v47  ;;  %9557 = vmatpush1.bf16.msra.mxu0 %v12122_v18 }
 0x1c4   : > { %9589 = vmatpush1.bf16.msra.mxu1 %v12142_v36  ;;  %v12816_v51 = vpop.f32.mrb[106].mxu0  ;;  %9591 = vmatprep.subr.bf16.mxu0 %v11566_v17 }
 0x1c5   : > { %v12818_v30 = vpop.f32.mrb[106].mxu1  ;;  %9623 = vmatprep.subr.bf16.mxu1 %v11579_v21  ;;  %v12822_v28 = vpop.f32.mrb[107].mxu0  ;;  %2160 = vmatmul.mubr.f32.gmra.mrb[196].mxu0 %v12174_v55 }
 0x1c6   : > { %15664 = vst [vmem:[#allocation215_spill] sm:$0xff] %v12818_v30  ;;  %15665 = vst [vmem:[#allocation216_spill] sm:$0xff] %v12822_v28  ;;  %2813 = vmatmul.mubr.f32.gmra.mrb[196].mxu1 %v12174_v55  ;;  %v12826_v14 = vpop.f32.mrb[107].mxu1  ;;  %2165 = vmatprep.mubr.f32.mxu0 %v15648_v60 }
 0x1c7   : > { %15666 = vst [vmem:[#allocation217_spill] sm:$0xff] %v12826_v14  ;;  %2818 = vmatprep.mubr.f32.mxu1 %v15648_v60 }
 0x1c8   : > { %v12830_v47 = vpop.f32.mrb[108].mxu0 }
 0x1c9   : > { %v12832_v36 = vpop.f32.mrb[108].mxu1  ;;  %v12834_v30 = vpop.f32.mrb[109].mxu0 }
 0x1ca   : > { %15667 = vst [vmem:[#allocation218_spill] sm:$0xff] %v12832_v36  ;;  %15668 = vst [vmem:[#allocation219_spill] sm:$0xff] %v12834_v30  ;;  %v12836_v17 = vpop.f32.mrb[109].mxu1 }
 0x1cb   : > { %15669 = vst [vmem:[#allocation220_spill] sm:$0xff] %v12836_v17 }
 0x1cc   : > { %v12838_v21 = vpop.f32.mrb[110].mxu0 }
 0x1cd   : > { %v12840_v28 = vpop.f32.mrb[110].mxu1  ;;  %v12842_v18 = vpop.f32.mrb[111].mxu0  ;;  %2166 = vmatmul.mubr.f32.gmra.mrb[196].mxu0 %v12187_v8 }
 0x1ce   : > { %15670 = vst [vmem:[#allocation221_spill] sm:$0xff] %v12840_v28  ;;  %15671 = vst [vmem:[#allocation222_spill] sm:$0xff] %v12842_v18  ;;  %2819 = vmatmul.mubr.f32.gmra.mrb[196].mxu1 %v12187_v8  ;;  %v12846_v55 = vpop.f32.mrb[111].mxu1  ;;  %2171 = vmatprep.mubr.f32.mxu0 %v15648_v60 }
 0x1cf   : > { %15672 = vst [vmem:[#allocation223_spill] sm:$0xff] %v12846_v55  ;;  %2824 = vmatprep.mubr.f32.mxu1 %v15648_v60 }
 0x1d0   : > { %v12850_v14 = vpop.f32.mrb[112].mxu0 }
 0x1d1   : > { %v12852_v36 = vpop.f32.mrb[112].mxu1  ;;  %v12854_v17 = vpop.f32.mrb[113].mxu0 }
 0x1d2   : > { %15673 = vst [vmem:[#allocation224_spill] sm:$0xff] %v12852_v36  ;;  %15674 = vst [vmem:[#allocation225_spill] sm:$0xff] %v12854_v17  ;;  %v12856_v30 = vpop.f32.mrb[113].mxu1 }
 0x1d3   : > { %15675 = vst [vmem:[#allocation226_spill] sm:$0xff] %v12856_v30 }
 0x1d4   : > { %v12858_v28 = vpop.f32.mrb[114].mxu0 }
 0x1d5   : > { %v12860_v18 = vpop.f32.mrb[114].mxu1  ;;  %v12862_v29 = vpop.f32.mrb[115].mxu0  ;;  %2172 = vmatmul.mubr.f32.gmra.mrb[196].mxu0 %v12200_v23 }
 0x1d6   : > { %15676 = vst [vmem:[#allocation227_spill] sm:$0xff] %v12860_v18  ;;  %15677 = vst [vmem:[#allocation228_spill] sm:$0xff] %v12862_v29  ;;  %2825 = vmatmul.mubr.f32.gmra.mrb[196].mxu1 %v12200_v23  ;;  %v12866_v8 = vpop.f32.mrb[115].mxu1  ;;  %2177 = vmatprep.mubr.f32.mxu0 %v15648_v60 }
 0x1d7   : > { %15678 = vst [vmem:[#allocation229_spill] sm:$0xff] %v12866_v8  ;;  %2830 = vmatprep.mubr.f32.mxu1 %v15648_v60 }
 0x1d8   : > { %v12870_v55 = vpop.f32.mrb[116].mxu0 }
 0x1d9   : > { %v12872_v36 = vpop.f32.mrb[116].mxu1  ;;  %v12874_v30 = vpop.f32.mrb[117].mxu0 }
 0x1da   : > { %15679 = vst [vmem:[#allocation230_spill] sm:$0xff] %v12872_v36  ;;  %15680 = vst [vmem:[#allocation231_spill] sm:$0xff] %v12874_v30  ;;  %v12876_v17 = vpop.f32.mrb[117].mxu1 }
 0x1db   : > { %15681 = vst [vmem:[#allocation232_spill] sm:$0xff] %v12876_v17 }
 0x1dc   : > { %v12878_v18 = vpop.f32.mrb[118].mxu0 }
 0x1dd   : > { %v12880_v29 = vpop.f32.mrb[118].mxu1  ;;  %v12882_v9 = vpop.f32.mrb[119].mxu0  ;;  %2178 = vmatmul.mubr.f32.gmra.mrb[196].mxu0 %v12213_v7 }
 0x1de   : > { %15682 = vst [vmem:[#allocation233_spill] sm:$0xff] %v12880_v29  ;;  %15683 = vst [vmem:[#allocation234_spill] sm:$0xff] %v12882_v9  ;;  %2831 = vmatmul.mubr.f32.gmra.mrb[196].mxu1 %v12213_v7  ;;  %v12886_v23 = vpop.f32.mrb[119].mxu1  ;;  %2183 = vmatprep.mubr.f32.mxu0 %v15648_v60 }
 0x1df   : > { %15684 = vst [vmem:[#allocation235_spill] sm:$0xff] %v12886_v23  ;;  %2836 = vmatprep.mubr.f32.mxu1 %v15648_v60 }
 0x1e0   : > { %v12890_v8 = vpop.f32.mrb[120].mxu0 }
 0x1e1   : > { %v12892_v36 = vpop.f32.mrb[120].mxu1  ;;  %v12894_v17 = vpop.f32.mrb[121].mxu0 }
 0x1e2   : > { %15685 = vst [vmem:[#allocation236_spill] sm:$0xff] %v12892_v36  ;;  %15686 = vst [vmem:[#allocation237_spill] sm:$0xff] %v12894_v17  ;;  %v12896_v30 = vpop.f32.mrb[121].mxu1 }
 0x1e3   : > { %15687 = vst [vmem:[#allocation238_spill] sm:$0xff] %v12896_v30 }
 0x1e4   : > { %v12898_v29 = vpop.f32.mrb[122].mxu0 }
 0x1e5   : > { %v12900_v9 = vpop.f32.mrb[122].mxu1  ;;  %v12902_v43 = vpop.f32.mrb[123].mxu0  ;;  %2184 = vmatmul.mubr.f32.gmra.mrb[196].mxu0 %v12226_v45 }
 0x1e6   : > { %15688 = vst [vmem:[#allocation239_spill] sm:$0xff] %v12900_v9  ;;  %15689 = vst [vmem:[#allocation240_spill] sm:$0xff] %v12902_v43  ;;  %2837 = vmatmul.mubr.f32.gmra.mrb[196].mxu1 %v12226_v45  ;;  %v12906_v7 = vpop.f32.mrb[123].mxu1  ;;  %2189 = vmatprep.mubr.f32.mxu0 %v15648_v60 }
 0x1e7   : > { %15690 = vst [vmem:[#allocation241_spill] sm:$0xff] %v12906_v7  ;;  %2842 = vmatprep.mubr.f32.mxu1 %v15648_v60 }
 0x1e8   : > { %v12910_v23 = vpop.f32.mrb[124].mxu0 }
 0x1e9   : > { %v12912_v36 = vpop.f32.mrb[124].mxu1  ;;  %v12914_v30 = vpop.f32.mrb[125].mxu0 }
 0x1ea   : > { %15691 = vst [vmem:[#allocation242_spill] sm:$0xff] %v12912_v36  ;;  %15692 = vst [vmem:[#allocation243_spill] sm:$0xff] %v12914_v30  ;;  %v12916_v17 = vpop.f32.mrb[125].mxu1 }
 0x1eb   : > { %15693 = vst [vmem:[#allocation244_spill] sm:$0xff] %v12916_v17 }
 0x1ec   : > { %v12918_v9 = vpop.f32.mrb[126].mxu0 }
 0x1ed   : > { %v12920_v43 = vpop.f32.mrb[126].mxu1  ;;  %v12922_v38 = vpop.f32.mrb[127].mxu0  ;;  %2190 = vmatmul.mubr.f32.gmra.mrb[196].mxu0 %v12239_v52 }
 0x1ee   : > { %15694 = vst [vmem:[#allocation245_spill] sm:$0xff] %v12920_v43  ;;  %15695 = vst [vmem:[#allocation246_spill] sm:$0xff] %v12922_v38  ;;  %2843 = vmatmul.mubr.f32.gmra.mrb[196].mxu1 %v12239_v52  ;;  %v12926_v45 = vpop.f32.mrb[127].mxu1  ;;  %2195 = vmatprep.mubr.f32.mxu0 %v15648_v60 }
 0x1ef   : > { %15696 = vst [vmem:[#allocation247_spill] sm:$0xff] %v12926_v45  ;;  %2848 = vmatprep.mubr.f32.mxu1 %v15648_v60 }
 0x1f0   : > { %v12930_v7 = vpop.f32.mrb[128].mxu0 }
 0x1f1   : > { %v12932_v36 = vpop.f32.mrb[128].mxu1  ;;  %v12934_v17 = vpop.f32.mrb[129].mxu0 }
 0x1f2   : > { %15697 = vst [vmem:[#allocation248_spill] sm:$0xff] %v12932_v36  ;;  %15698 = vst [vmem:[#allocation249_spill] sm:$0xff] %v12934_v17  ;;  %v12936_v30 = vpop.f32.mrb[129].mxu1 }
 0x1f3   : > { %15699 = vst [vmem:[#allocation250_spill] sm:$0xff] %v12936_v30 }
 0x1f4   : > { %v12938_v43 = vpop.f32.mrb[130].mxu0 }
 0x1f5   : > { %v12940_v38 = vpop.f32.mrb[130].mxu1  ;;  %v12942_v27 = vpop.f32.mrb[131].mxu0  ;;  %2196 = vmatmul.mubr.f32.gmra.mrb[196].mxu0 %v12252_v3 }
 0x1f6   : > { %15700 = vst [vmem:[#allocation251_spill] sm:$0xff] %v12940_v38  ;;  %15701 = vst [vmem:[#allocation252_spill] sm:$0xff] %v12942_v27  ;;  %2849 = vmatmul.mubr.f32.gmra.mrb[196].mxu1 %v12252_v3  ;;  %v12946_v52 = vpop.f32.mrb[131].mxu1  ;;  %2201 = vmatprep.mubr.f32.mxu0 %v15648_v60 }
 0x1f7   : > { %15702 = vst [vmem:[#allocation253_spill] sm:$0xff] %v12946_v52  ;;  %2854 = vmatprep.mubr.f32.mxu1 %v15648_v60 }
 0x1f8   : > { %v12950_v45 = vpop.f32.mrb[132].mxu0 }
 0x1f9   : > { %v12952_v36 = vpop.f32.mrb[132].mxu1  ;;  %v12954_v30 = vpop.f32.mrb[133].mxu0 }
 0x1fa   : > { %15703 = vst [vmem:[#allocation254_spill] sm:$0xff] %v12952_v36  ;;  %15704 = vst [vmem:[#allocation255_spill] sm:$0xff] %v12954_v30  ;;  %v12956_v17 = vpop.f32.mrb[133].mxu1 }
 0x1fb   : > { %15705 = vst [vmem:[#allocation256_spill] sm:$0xff] %v12956_v17 }
 0x1fc   : > { %v12958_v38 = vpop.f32.mrb[134].mxu0 }
 0x1fd   : > { %v12960_v27 = vpop.f32.mrb[134].mxu1  ;;  %v12962_v5 = vpop.f32.mrb[135].mxu0  ;;  %2202 = vmatmul.mubr.f32.gmra.mrb[196].mxu0 %v12265_v24 }
 0x1fe   : > { %15706 = vst [vmem:[#allocation257_spill] sm:$0xff] %v12960_v27  ;;  %15707 = vst [vmem:[#allocation258_spill] sm:$0xff] %v12962_v5  ;;  %2855 = vmatmul.mubr.f32.gmra.mrb[196].mxu1 %v12265_v24  ;;  %v12966_v3 = vpop.f32.mrb[135].mxu1  ;;  %2207 = vmatprep.mubr.f32.mxu0 %v15648_v60 }
 0x1ff   : > { %15708 = vst [vmem:[#allocation259_spill] sm:$0xff] %v12966_v3  ;;  %2860 = vmatprep.mubr.f32.mxu1 %v15648_v60 }
 0x200   : > { %v12970_v52 = vpop.f32.mrb[136].mxu0 }
 0x201   : > { %v12972_v36 = vpop.f32.mrb[136].mxu1  ;;  %v12974_v17 = vpop.f32.mrb[137].mxu0 }
 0x202   : > { %15709 = vst [vmem:[#allocation260_spill] sm:$0xff] %v12972_v36  ;;  %15710 = vst [vmem:[#allocation261_spill] sm:$0xff] %v12974_v17  ;;  %v12976_v30 = vpop.f32.mrb[137].mxu1 }
 0x203   : > { %15711 = vst [vmem:[#allocation262_spill] sm:$0xff] %v12976_v30 }
 0x204   : > { %v12978_v27 = vpop.f32.mrb[138].mxu0 }
 0x205   : > { %v12980_v5 = vpop.f32.mrb[138].mxu1  ;;  %v12982_v63 = vpop.f32.mrb[139].mxu0  ;;  %2208 = vmatmul.mubr.f32.gmra.mrb[196].mxu0 %v12278_v56 }
 0x206   : > { %15712 = vst [vmem:[#allocation263_spill] sm:$0xff] %v12980_v5  ;;  %15713 = vst [vmem:[#allocation264_spill] sm:$0xff] %v12982_v63  ;;  %2861 = vmatmul.mubr.f32.gmra.mrb[196].mxu1 %v12278_v56  ;;  %v12986_v24 = vpop.f32.mrb[139].mxu1  ;;  %2213 = vmatprep.mubr.f32.mxu0 %v15648_v60 }
 0x207   : > { %15714 = vst [vmem:[#allocation265_spill] sm:$0xff] %v12986_v24  ;;  %2866 = vmatprep.mubr.f32.mxu1 %v15648_v60 }
 0x208   : > { %v12990_v3 = vpop.f32.mrb[140].mxu0 }
 0x209   : > { %v12992_v36 = vpop.f32.mrb[140].mxu1  ;;  %v12994_v30 = vpop.f32.mrb[141].mxu0 }
 0x20a   : > { %15715 = vst [vmem:[#allocation266_spill] sm:$0xff] %v12992_v36  ;;  %15716 = vst [vmem:[#allocation267_spill] sm:$0xff] %v12994_v30  ;;  %v12996_v17 = vpop.f32.mrb[141].mxu1 }
 0x20b   : > { %15717 = vst [vmem:[#allocation268_spill] sm:$0xff] %v12996_v17 }
 0x20c   : > { %v12998_v5 = vpop.f32.mrb[142].mxu0 }
 0x20d   : > { %v13000_v63 = vpop.f32.mrb[142].mxu1  ;;  %v13002_v0 = vpop.f32.mrb[143].mxu0  ;;  %2214 = vmatmul.mubr.f32.gmra.mrb[196].mxu0 %v12291_v41 }
 0x20e   : > { %15718 = vst [vmem:[#allocation269_spill] sm:$0xff] %v13000_v63  ;;  %15719 = vst [vmem:[#allocation270_spill] sm:$0xff] %v13002_v0  ;;  %2867 = vmatmul.mubr.f32.gmra.mrb[196].mxu1 %v12291_v41  ;;  %v13006_v56 = vpop.f32.mrb[143].mxu1  ;;  %2219 = vmatprep.mubr.f32.mxu0 %v15648_v60 }
 0x20f   : > { %15720 = vst [vmem:[#allocation271_spill] sm:$0xff] %v13006_v56  ;;  %2872 = vmatprep.mubr.f32.mxu1 %v15648_v60 }
 0x210   : > { %v13010_v24 = vpop.f32.mrb[144].mxu0 }
 0x211   : > { %v13012_v36 = vpop.f32.mrb[144].mxu1  ;;  %v13014_v17 = vpop.f32.mrb[145].mxu0 }
 0x212   : > { %15721 = vst [vmem:[#allocation272_spill] sm:$0xff] %v13012_v36  ;;  %15722 = vst [vmem:[#allocation273_spill] sm:$0xff] %v13014_v17  ;;  %v13016_v30 = vpop.f32.mrb[145].mxu1 }
 0x213   : > { %15723 = vst [vmem:[#allocation274_spill] sm:$0xff] %v13016_v30 }
 0x214   : > { %v13018_v63 = vpop.f32.mrb[146].mxu0 }
 0x215   : > { %v13020_v0 = vpop.f32.mrb[146].mxu1  ;;  %v13022_v57 = vpop.f32.mrb[147].mxu0  ;;  %2220 = vmatmul.mubr.f32.gmra.mrb[196].mxu0 %v12304_v62 }
 0x216   : > { %15724 = vst [vmem:[#allocation275_spill] sm:$0xff] %v13020_v0  ;;  %15725 = vst [vmem:[#allocation276_spill] sm:$0xff] %v13022_v57  ;;  %2873 = vmatmul.mubr.f32.gmra.mrb[196].mxu1 %v12304_v62  ;;  %v13026_v41 = vpop.f32.mrb[147].mxu1  ;;  %2225 = vmatprep.mubr.f32.mxu0 %v15648_v60 }
 0x217   : > { %15726 = vst [vmem:[#allocation277_spill] sm:$0xff] %v13026_v41  ;;  %2878 = vmatprep.mubr.f32.mxu1 %v15648_v60 }
 0x218   : > { %v13030_v56 = vpop.f32.mrb[148].mxu0 }
 0x219   : > { %v13032_v36 = vpop.f32.mrb[148].mxu1  ;;  %v13034_v30 = vpop.f32.mrb[149].mxu0 }
 0x21a   : > { %15727 = vst [vmem:[#allocation278_spill] sm:$0xff] %v13032_v36  ;;  %15728 = vst [vmem:[#allocation279_spill] sm:$0xff] %v13034_v30  ;;  %v13036_v17 = vpop.f32.mrb[149].mxu1 }
 0x21b   : > { %15729 = vst [vmem:[#allocation280_spill] sm:$0xff] %v13036_v17 }
 0x21c   : > { %v13038_v0 = vpop.f32.mrb[150].mxu0 }
 0x21d   : > { %v13040_v57 = vpop.f32.mrb[150].mxu1  ;;  %v13042_v35 = vpop.f32.mrb[151].mxu0  ;;  %2226 = vmatmul.mubr.f32.gmra.mrb[196].mxu0 %v12317_v48 }
 0x21e   : > { %15730 = vst [vmem:[#allocation281_spill] sm:$0xff] %v13040_v57  ;;  %15731 = vst [vmem:[#allocation282_spill] sm:$0xff] %v13042_v35  ;;  %2879 = vmatmul.mubr.f32.gmra.mrb[196].mxu1 %v12317_v48  ;;  %v13046_v62 = vpop.f32.mrb[151].mxu1  ;;  %2231 = vmatprep.mubr.f32.mxu0 %v15648_v60 }
 0x21f   : > { %15732 = vst [vmem:[#allocation283_spill] sm:$0xff] %v13046_v62  ;;  %2884 = vmatprep.mubr.f32.mxu1 %v15648_v60 }
 0x220   : > { %v13050_v41 = vpop.f32.mrb[152].mxu0 }
 0x221   : > { %v13052_v36 = vpop.f32.mrb[152].mxu1  ;;  %v13054_v17 = vpop.f32.mrb[153].mxu0 }
 0x222   : > { %15733 = vst [vmem:[#allocation284_spill] sm:$0xff] %v13052_v36  ;;  %15734 = vst [vmem:[#allocation285_spill] sm:$0xff] %v13054_v17  ;;  %v13056_v30 = vpop.f32.mrb[153].mxu1 }
 0x223   : > { %15735 = vst [vmem:[#allocation286_spill] sm:$0xff] %v13056_v30 }
 0x224   : > { %v13058_v57 = vpop.f32.mrb[154].mxu0 }
 0x225   : > { %v13060_v35 = vpop.f32.mrb[154].mxu1  ;;  %v13062_v33 = vpop.f32.mrb[155].mxu0  ;;  %2232 = vmatmul.mubr.f32.gmra.mrb[196].mxu0 %v12330_v12 }
 0x226   : > { %15736 = vst [vmem:[#allocation287_spill] sm:$0xff] %v13060_v35  ;;  %15737 = vst [vmem:[#allocation288_spill] sm:$0xff] %v13062_v33  ;;  %2885 = vmatmul.mubr.f32.gmra.mrb[196].mxu1 %v12330_v12  ;;  %v13066_v48 = vpop.f32.mrb[155].mxu1  ;;  %2237 = vmatprep.mubr.f32.mxu0 %v15648_v60 }
 0x227   : > { %15738 = vst [vmem:[#allocation289_spill] sm:$0xff] %v13066_v48  ;;  %2890 = vmatprep.mubr.f32.mxu1 %v15648_v60 }
 0x228   : > { %v13070_v62 = vpop.f32.mrb[156].mxu0 }
 0x229   : > { %v13072_v36 = vpop.f32.mrb[156].mxu1  ;;  %v13074_v30 = vpop.f32.mrb[157].mxu0 }
 0x22a   : > { %15739 = vst [vmem:[#allocation290_spill] sm:$0xff] %v13072_v36  ;;  %15740 = vst [vmem:[#allocation291_spill] sm:$0xff] %v13074_v30  ;;  %v13076_v17 = vpop.f32.mrb[157].mxu1 }
 0x22b   : > { %15741 = vst [vmem:[#allocation292_spill] sm:$0xff] %v13076_v17 }
 0x22c   : > { %v13078_v35 = vpop.f32.mrb[158].mxu0 }
 0x22d   : > { %v13080_v33 = vpop.f32.mrb[158].mxu1  ;;  %v13082_v20 = vpop.f32.mrb[159].mxu0  ;;  %2238 = vmatmul.mubr.f32.gmra.mrb[196].mxu0 %v12343_v13 }
 0x22e   : > { %15742 = vst [vmem:[#allocation293_spill] sm:$0xff] %v13080_v33  ;;  %15743 = vst [vmem:[#allocation294_spill] sm:$0xff] %v13082_v20  ;;  %2891 = vmatmul.mubr.f32.gmra.mrb[196].mxu1 %v12343_v13  ;;  %v13086_v12 = vpop.f32.mrb[159].mxu1  ;;  %2243 = vmatprep.mubr.f32.mxu0 %v15648_v60 }
 0x22f   : > { %15744 = vst [vmem:[#allocation295_spill] sm:$0xff] %v13086_v12  ;;  %2896 = vmatprep.mubr.f32.mxu1 %v15648_v60 }
 0x230   : > { %v13090_v48 = vpop.f32.mrb[160].mxu0 }
 0x231   : > { %v13092_v36 = vpop.f32.mrb[160].mxu1  ;;  %v13094_v17 = vpop.f32.mrb[161].mxu0 }
 0x232   : > { %15745 = vst [vmem:[#allocation296_spill] sm:$0xff] %v13092_v36  ;;  %15746 = vst [vmem:[#allocation297_spill] sm:$0xff] %v13094_v17  ;;  %v13096_v30 = vpop.f32.mrb[161].mxu1 }
 0x233   : > { %15747 = vst [vmem:[#allocation298_spill] sm:$0xff] %v13096_v30 }
 0x234   : > { %v13098_v33 = vpop.f32.mrb[162].mxu0 }
 0x235   : > { %v13100_v20 = vpop.f32.mrb[162].mxu1  ;;  %v13102_v4 = vpop.f32.mrb[163].mxu0  ;;  %2244 = vmatmul.mubr.f32.gmra.mrb[196].mxu0 %v12356_v19 }
 0x236   : > { %15748 = vst [vmem:[#allocation299_spill] sm:$0xff] %v13100_v20  ;;  %15749 = vst [vmem:[#allocation300_spill] sm:$0xff] %v13102_v4  ;;  %2897 = vmatmul.mubr.f32.gmra.mrb[196].mxu1 %v12356_v19  ;;  %v13106_v13 = vpop.f32.mrb[163].mxu1  ;;  %2249 = vmatprep.mubr.f32.mxu0 %v15648_v60 }
 0x237   : > { %15750 = vst [vmem:[#allocation301_spill] sm:$0xff] %v13106_v13  ;;  %2902 = vmatprep.mubr.f32.mxu1 %v15648_v60 }
 0x238   : > { %v13110_v12 = vpop.f32.mrb[164].mxu0 }
 0x239   : > { %v13112_v36 = vpop.f32.mrb[164].mxu1  ;;  %v13114_v30 = vpop.f32.mrb[165].mxu0 }
 0x23a   : > { %15751 = vst [vmem:[#allocation302_spill] sm:$0xff] %v13112_v36  ;;  %15752 = vst [vmem:[#allocation303_spill] sm:$0xff] %v13114_v30  ;;  %v13116_v17 = vpop.f32.mrb[165].mxu1 }
 0x23b   : > { %15753 = vst [vmem:[#allocation304_spill] sm:$0xff] %v13116_v17 }
 0x23c   : > { %v13118_v20 = vpop.f32.mrb[166].mxu0 }
 0x23d   : > { %v13120_v4 = vpop.f32.mrb[166].mxu1  ;;  %v13122_v61 = vpop.f32.mrb[167].mxu0  ;;  %2250 = vmatmul.mubr.f32.gmra.mrb[196].mxu0 %v12369_v44 }
 0x23e   : > { %15754 = vst [vmem:[#allocation305_spill] sm:$0xff] %v13120_v4  ;;  %15755 = vst [vmem:[#allocation306_spill] sm:$0xff] %v13122_v61  ;;  %2903 = vmatmul.mubr.f32.gmra.mrb[196].mxu1 %v12369_v44  ;;  %v13126_v19 = vpop.f32.mrb[167].mxu1  ;;  %2255 = vmatprep.mubr.f32.mxu0 %v15648_v60 }
 0x23f   : > { %15756 = vst [vmem:[#allocation307_spill] sm:$0xff] %v13126_v19  ;;  %2908 = vmatprep.mubr.f32.mxu1 %v15648_v60 }
 0x240   : > { %v13130_v13 = vpop.f32.mrb[168].mxu0 }
 0x241   : > { %v13132_v36 = vpop.f32.mrb[168].mxu1  ;;  %v13134_v17 = vpop.f32.mrb[169].mxu0 }
 0x242   : > { %15757 = vst [vmem:[#allocation308_spill] sm:$0xff] %v13132_v36  ;;  %15758 = vst [vmem:[#allocation309_spill] sm:$0xff] %v13134_v17  ;;  %v13136_v30 = vpop.f32.mrb[169].mxu1 }
 0x243   : > { %15759 = vst [vmem:[#allocation310_spill] sm:$0xff] %v13136_v30 }
 0x244   : > { %v13138_v4 = vpop.f32.mrb[170].mxu0 }
 0x245   : > { %v13140_v61 = vpop.f32.mrb[170].mxu1  ;;  %v13142_v2 = vpop.f32.mrb[171].mxu0  ;;  %2256 = vmatmul.mubr.f32.gmra.mrb[196].mxu0 %v12382_v16 }
 0x246   : > { %15760 = vst [vmem:[#allocation311_spill] sm:$0xff] %v13140_v61  ;;  %15761 = vst [vmem:[#allocation312_spill] sm:$0xff] %v13142_v2  ;;  %2909 = vmatmul.mubr.f32.gmra.mrb[196].mxu1 %v12382_v16  ;;  %v13146_v44 = vpop.f32.mrb[171].mxu1  ;;  %2261 = vmatprep.mubr.f32.mxu0 %v15648_v60 }
 0x247   : > { %15762 = vst [vmem:[#allocation313_spill] sm:$0xff] %v13146_v44  ;;  %2914 = vmatprep.mubr.f32.mxu1 %v15648_v60 }
 0x248   : > { %v13150_v19 = vpop.f32.mrb[172].mxu0 }
 0x249   : > { %v13152_v36 = vpop.f32.mrb[172].mxu1  ;;  %v13154_v30 = vpop.f32.mrb[173].mxu0 }
 0x24a   : > { %15763 = vst [vmem:[#allocation314_spill] sm:$0xff] %v13152_v36  ;;  %15764 = vst [vmem:[#allocation315_spill] sm:$0xff] %v13154_v30  ;;  %v13156_v17 = vpop.f32.mrb[173].mxu1 }
 0x24b   : > { %15765 = vst [vmem:[#allocation316_spill] sm:$0xff] %v13156_v17 }
 0x24c   : > { %v13158_v61 = vpop.f32.mrb[174].mxu0 }
 0x24d   : > { %v13160_v2 = vpop.f32.mrb[174].mxu1  ;;  %v13162_v58 = vpop.f32.mrb[175].mxu0  ;;  %2262 = vmatmul.mubr.f32.gmra.mrb[196].mxu0 %v12395_v6 }
 0x24e   : > { %15766 = vst [vmem:[#allocation317_spill] sm:$0xff] %v13160_v2  ;;  %15767 = vst [vmem:[#allocation318_spill] sm:$0xff] %v13162_v58  ;;  %2915 = vmatmul.mubr.f32.gmra.mrb[196].mxu1 %v12395_v6  ;;  %v13166_v16 = vpop.f32.mrb[175].mxu1  ;;  %2267 = vmatprep.mubr.f32.mxu0 %v15648_v60 }
 0x24f   : > { %15768 = vst [vmem:[#allocation319_spill] sm:$0xff] %v13166_v16  ;;  %2920 = vmatprep.mubr.f32.mxu1 %v15648_v60 }
 0x250   : > { %v13170_v44 = vpop.f32.mrb[176].mxu0 }
 0x251   : > { %v13172_v36 = vpop.f32.mrb[176].mxu1  ;;  %v13174_v17 = vpop.f32.mrb[177].mxu0 }
 0x252   : > { %15769 = vst [vmem:[#allocation320_spill] sm:$0xff] %v13172_v36  ;;  %15770 = vst [vmem:[#allocation321_spill] sm:$0xff] %v13174_v17  ;;  %v13176_v30 = vpop.f32.mrb[177].mxu1 }
 0x253   : > { %15771 = vst [vmem:[#allocation322_spill] sm:$0xff] %v13176_v30 }
 0x254   : > { %v13178_v2 = vpop.f32.mrb[178].mxu0 }
 0x255   : > { %v13180_v58 = vpop.f32.mrb[178].mxu1  ;;  %v13182_v53 = vpop.f32.mrb[179].mxu0  ;;  %2268 = vmatmul.mubr.f32.gmra.mrb[196].mxu0 %v12408_v32 }
 0x256   : > { %15772 = vst [vmem:[#allocation323_spill] sm:$0xff] %v13180_v58  ;;  %15773 = vst [vmem:[#allocation324_spill] sm:$0xff] %v13182_v53  ;;  %2921 = vmatmul.mubr.f32.gmra.mrb[196].mxu1 %v12408_v32  ;;  %v13186_v6 = vpop.f32.mrb[179].mxu1  ;;  %2273 = vmatprep.mubr.f32.mxu0 %v15648_v60  ;;  %v15780_v32 = vld [vmem:[#allocation104_spill] sm:$0xff] }
 0x257   : > { %15774 = vst [vmem:[#allocation325_spill] sm:$0xff] %v13186_v6  ;;  %2926 = vmatprep.mubr.f32.mxu1 %v15648_v60 }
 0x258   : > { %v13190_v16 = vpop.f32.mrb[180].mxu0 }
 0x259   : > { %v13192_v36 = vpop.f32.mrb[180].mxu1  ;;  %v13194_v30 = vpop.f32.mrb[181].mxu0 }
 0x25a   : > { %15775 = vst [vmem:[#allocation326_spill] sm:$0xff] %v13192_v36  ;;  %15776 = vst [vmem:[#allocation327_spill] sm:$0xff] %v13194_v30  ;;  %v13196_v17 = vpop.f32.mrb[181].mxu1 }
 0x25b   : > { %15777 = vst [vmem:[#allocation328_spill] sm:$0xff] %v13196_v17 }
 0x25c   : > { %v13198_v58 = vpop.f32.mrb[182].mxu0 }
 0x25d   : > { %v13200_v53 = vpop.f32.mrb[182].mxu1  ;;  %v13202_v49 = vpop.f32.mrb[183].mxu0  ;;  %2274 = vmatmul.mubr.f32.gmra.mrb[196].mxu0 %v15780_v32 }
 0x25e   : > { %15778 = vst [vmem:[#allocation329_spill] sm:$0xff] %v13200_v53  ;;  %15779 = vst [vmem:[#allocation330_spill] sm:$0xff] %v13202_v49  ;;  %2927 = vmatmul.mubr.f32.gmra.mrb[196].mxu1 %v15780_v32  ;;  %v13206_v6 = vpop.f32.mrb[183].mxu1  ;;  %2279 = vmatprep.mubr.f32.mxu0 %v15648_v60  ;;  %v15787_v32 = vld [vmem:[#allocation108_spill] sm:$0xff] }
 0x25f   : > { %15781 = vst [vmem:[#allocation104_spill] sm:$0xff] %v13206_v6  ;;  %2932 = vmatprep.mubr.f32.mxu1 %v15648_v60 }
 0x260   : > { %v13210_v36 = vpop.f32.mrb[184].mxu0 }
 0x261   : > { %v13212_v30 = vpop.f32.mrb[184].mxu1  ;;  %v13214_v17 = vpop.f32.mrb[185].mxu0 }
 0x262   : > { %15782 = vst [vmem:[#allocation331_spill] sm:$0xff] %v13212_v30  ;;  %15783 = vst [vmem:[#allocation332_spill] sm:$0xff] %v13214_v17  ;;  %v13216_v50 = vpop.f32.mrb[185].mxu1 }
 0x263   : > { %15784 = vst [vmem:[#allocation333_spill] sm:$0xff] %v13216_v50 }
 0x264   : > { %v13218_v53 = vpop.f32.mrb[186].mxu0 }
 0x265   : > { %v13220_v49 = vpop.f32.mrb[186].mxu1  ;;  %v13222_v46 = vpop.f32.mrb[187].mxu0  ;;  %2280 = vmatmul.mubr.f32.gmra.mrb[196].mxu0 %v15787_v32 }
 0x266   : > { %15785 = vst [vmem:[#allocation334_spill] sm:$0xff] %v13220_v49  ;;  %15786 = vst [vmem:[#allocation335_spill] sm:$0xff] %v13222_v46  ;;  %2933 = vmatmul.mubr.f32.gmra.mrb[196].mxu1 %v15787_v32  ;;  %v13226_v6 = vpop.f32.mrb[187].mxu1  ;;  %2285 = vmatprep.mubr.f32.mxu0 %v15648_v60  ;;  %v15794_v32 = vld [vmem:[#allocation112_spill] sm:$0xff] }
 0x267   : > { %15788 = vst [vmem:[#allocation108_spill] sm:$0xff] %v13226_v6  ;;  %2938 = vmatprep.mubr.f32.mxu1 %v15648_v60 }
 0x268   : > { %v13230_v30 = vpop.f32.mrb[188].mxu0 }
 0x269   : > { %v13232_v17 = vpop.f32.mrb[188].mxu1  ;;  %v13234_v50 = vpop.f32.mrb[189].mxu0 }
 0x26a   : > { %15789 = vst [vmem:[#allocation336_spill] sm:$0xff] %v13232_v17  ;;  %15790 = vst [vmem:[#allocation337_spill] sm:$0xff] %v13234_v50  ;;  %v13236_v39 = vpop.f32.mrb[189].mxu1 }
 0x26b   : > { %15791 = vst [vmem:[#allocation338_spill] sm:$0xff] %v13236_v39 }
 0x26c   : > { %v13238_v49 = vpop.f32.mrb[190].mxu0 }
 0x26d   : > { %v13240_v46 = vpop.f32.mrb[190].mxu1  ;;  %v13242_v37 = vpop.f32.mrb[191].mxu0  ;;  %2286 = vmatmul.mubr.f32.gmra.mrb[196].mxu0 %v15794_v32 }
 0x26e   : > { %15792 = vst [vmem:[#allocation339_spill] sm:$0xff] %v13240_v46  ;;  %15793 = vst [vmem:[#allocation340_spill] sm:$0xff] %v13242_v37  ;;  %2939 = vmatmul.mubr.f32.gmra.mrb[196].mxu1 %v15794_v32  ;;  %v13246_v6 = vpop.f32.mrb[191].mxu1  ;;  %2291 = vmatprep.mubr.f32.mxu0 %v15648_v60  ;;  %v15798_v32 = vld [vmem:[#allocation116_spill] sm:$0xff] }
 0x26f   : > { %15795 = vst [vmem:[#allocation112_spill] sm:$0xff] %v13246_v6  ;;  %2944 = vmatprep.mubr.f32.mxu1 %v15648_v60 }
 0x270   : > { %v13250_v17 = vpop.f32.mrb[192].mxu0 }
 0x271   : > { %v13252_v50 = vpop.f32.mrb[192].mxu1  ;;  %v13254_v39 = vpop.f32.mrb[193].mxu0 }
 0x272   : > { %15796 = vst [vmem:[#allocation341_spill] sm:$0xff] %v13252_v50  ;;  %v13256_v34 = vpop.f32.mrb[193].mxu1  ;;  %v15799_v50 = vld [vmem:[#allocation120_spill] sm:$0xff] }
 0x273   : > { %15797 = vst [vmem:[#allocation342_spill] sm:$0xff] %v13256_v34  ;;  %v15800_v34 = vld [vmem:[#allocation124_spill] sm:$0xff] }
 0x274   : > { %v13258_v46 = vpop.f32.mrb[194].mxu0 }
 0x275   : > { %v13260_v37 = vpop.f32.mrb[194].mxu1  ;;  %v13262_v31 = vpop.f32.mrb[195].mxu0  ;;  %2292 = vmatmul.mubr.f32.gmra.mrb[196].mxu0 %v15798_v32 }
 0x276   : > { %2945 = vmatmul.mubr.f32.gmra.mrb[196].mxu1 %v15798_v32  ;;  %v13266_v6 = vpop.f32.mrb[195].mxu1  ;;  %2297 = vmatprep.mubr.f32.mxu0 %v15648_v60  ;;  %v15801_v32 = vld [vmem:[#allocation128_spill] sm:$0xff] }
 0x277   : > { %2950 = vmatprep.mubr.f32.mxu1 %v15648_v60 }
 0x27d   : > { %2298 = vmatmul.mubr.f32.gmra.mrb[196].mxu0 %v15799_v50 }
 0x27e   : > { %2951 = vmatmul.mubr.f32.gmra.mrb[196].mxu1 %v15799_v50  ;;  %2303 = vmatprep.mubr.f32.mxu0 %v15648_v60  ;;  %v15802_v50 = vld [vmem:[#allocation132_spill] sm:$0xff] }
 0x27f   : > { %2956 = vmatprep.mubr.f32.mxu1 %v15648_v60 }
 0x285   : > { %2304 = vmatmul.mubr.f32.gmra.mrb[196].mxu0 %v15800_v34 }
 0x286   : > { %2957 = vmatmul.mubr.f32.gmra.mrb[196].mxu1 %v15800_v34  ;;  %2309 = vmatprep.mubr.f32.mxu0 %v15648_v60  ;;  %v15803_v34 = vld [vmem:[#allocation136_spill] sm:$0xff] }
 0x287   : > { %2962 = vmatprep.mubr.f32.mxu1 %v15648_v60 }
 0x28d   : > { %2310 = vmatmul.mubr.f32.gmra.mrb[196].mxu0 %v15801_v32 }
 0x28e   : > { %2963 = vmatmul.mubr.f32.gmra.mrb[196].mxu1 %v15801_v32  ;;  %2315 = vmatprep.mubr.f32.mxu0 %v15648_v60  ;;  %v15804_v32 = vld [vmem:[#allocation140_spill] sm:$0xff] }
 0x28f   : > { %2968 = vmatprep.mubr.f32.mxu1 %v15648_v60 }
 0x295   : > { %2316 = vmatmul.mubr.f32.gmra.mrb[196].mxu0 %v15802_v50 }
 0x296   : > { %2969 = vmatmul.mubr.f32.gmra.mrb[196].mxu1 %v15802_v50  ;;  %2321 = vmatprep.mubr.f32.mxu0 %v15648_v60  ;;  %v15805_v50 = vld [vmem:[#allocation144_spill] sm:$0xff] }
 0x297   : > { %2974 = vmatprep.mubr.f32.mxu1 %v15648_v60 }
 0x29d   : > { %2322 = vmatmul.mubr.f32.gmra.mrb[196].mxu0 %v15803_v34 }
 0x29e   : > { %2975 = vmatmul.mubr.f32.gmra.mrb[196].mxu1 %v15803_v34  ;;  %2327 = vmatprep.mubr.f32.mxu0 %v15648_v60  ;;  %v15806_v34 = vld [vmem:[#allocation148_spill] sm:$0xff] }
 0x29f   : > { %2980 = vmatprep.mubr.f32.mxu1 %v15648_v60 }
 0x2a5   : > { %2328 = vmatmul.mubr.f32.gmra.mrb[196].mxu0 %v15804_v32 }
 0x2a6   : > { %2981 = vmatmul.mubr.f32.gmra.mrb[196].mxu1 %v15804_v32  ;;  %2333 = vmatprep.mubr.f32.mxu0 %v15648_v60  ;;  %v15807_v32 = vld [vmem:[#allocation152_spill] sm:$0xff] }
 0x2a7   : > { %2986 = vmatprep.mubr.f32.mxu1 %v15648_v60 }
 0x2ad   : > { %2334 = vmatmul.mubr.f32.gmra.mrb[196].mxu0 %v15805_v50 }
 0x2ae   : > { %2987 = vmatmul.mubr.f32.gmra.mrb[196].mxu1 %v15805_v50  ;;  %2339 = vmatprep.mubr.f32.mxu0 %v15648_v60  ;;  %v15808_v50 = vld [vmem:[#allocation156_spill] sm:$0xff] }
 0x2af   : > { %2992 = vmatprep.mubr.f32.mxu1 %v15648_v60 }
 0x2b5   : > { %2340 = vmatmul.mubr.f32.gmra.mrb[196].mxu0 %v15806_v34 }
 0x2b6   : > { %2993 = vmatmul.mubr.f32.gmra.mrb[196].mxu1 %v15806_v34  ;;  %2345 = vmatprep.mubr.f32.mxu0 %v15648_v60  ;;  %v15809_v34 = vld [vmem:[#allocation160_spill] sm:$0xff] }
 0x2b7   : > { %2998 = vmatprep.mubr.f32.mxu1 %v15648_v60 }
 0x2bd   : > { %2346 = vmatmul.mubr.f32.gmra.mrb[196].mxu0 %v15807_v32 }
 0x2be   : > { %2999 = vmatmul.mubr.f32.gmra.mrb[196].mxu1 %v15807_v32  ;;  %2351 = vmatprep.mubr.f32.mxu0 %v15648_v60  ;;  %v15810_v32 = vld [vmem:[#allocation164_spill] sm:$0xff] }
 0x2bf   : > { %3004 = vmatprep.mubr.f32.mxu1 %v15648_v60 }
 0x2c5   : > { %2352 = vmatmul.mubr.f32.gmra.mrb[196].mxu0 %v15808_v50 }
 0x2c6   : > { %3005 = vmatmul.mubr.f32.gmra.mrb[196].mxu1 %v15808_v50  ;;  %2357 = vmatprep.mubr.f32.mxu0 %v15648_v60  ;;  %v15811_v50 = vld [vmem:[#allocation168_spill] sm:$0xff] }
 0x2c7   : > { %3010 = vmatprep.mubr.f32.mxu1 %v15648_v60 }
 0x2cd   : > { %2358 = vmatmul.mubr.f32.gmra.mrb[196].mxu0 %v15809_v34 }
 0x2ce   : > { %3011 = vmatmul.mubr.f32.gmra.mrb[196].mxu1 %v15809_v34  ;;  %2363 = vmatprep.mubr.f32.mxu0 %v15648_v60  ;;  %v15812_v34 = vld [vmem:[#allocation172_spill] sm:$0xff] }
 0x2cf   : > { %3016 = vmatprep.mubr.f32.mxu1 %v15648_v60 }
 0x2d5   : > { %2364 = vmatmul.mubr.f32.gmra.mrb[196].mxu0 %v15810_v32 }
 0x2d6   : > { %3017 = vmatmul.mubr.f32.gmra.mrb[196].mxu1 %v15810_v32  ;;  %2369 = vmatprep.mubr.f32.mxu0 %v15648_v60  ;;  %v15813_v32 = vld [vmem:[#allocation176_spill] sm:$0xff] }
 0x2d7   : > { %3022 = vmatprep.mubr.f32.mxu1 %v15648_v60 }
 0x2dd   : > { %2370 = vmatmul.mubr.f32.gmra.mrb[196].mxu0 %v15811_v50 }
 0x2de   : > { %3023 = vmatmul.mubr.f32.gmra.mrb[196].mxu1 %v15811_v50  ;;  %2375 = vmatprep.mubr.f32.mxu0 %v15648_v60  ;;  %v15814_v50 = vld [vmem:[#allocation180_spill] sm:$0xff] }
 0x2df   : > { %3028 = vmatprep.mubr.f32.mxu1 %v15648_v60 }
 0x2e5   : > { %2376 = vmatmul.mubr.f32.gmra.mrb[196].mxu0 %v15812_v34 }
 0x2e6   : > { %3029 = vmatmul.mubr.f32.gmra.mrb[196].mxu1 %v15812_v34  ;;  %2381 = vmatprep.mubr.f32.mxu0 %v15648_v60  ;;  %v15815_v34 = vld [vmem:[#allocation184_spill] sm:$0xff] }
 0x2e7   : > { %3034 = vmatprep.mubr.f32.mxu1 %v15648_v60 }
 0x2ed   : > { %2382 = vmatmul.mubr.f32.gmra.mrb[196].mxu0 %v15813_v32 }
 0x2ee   : > { %3035 = vmatmul.mubr.f32.gmra.mrb[196].mxu1 %v15813_v32  ;;  %2387 = vmatprep.mubr.f32.mxu0 %v15648_v60  ;;  %v15870_v32 = vld [vmem:[#allocation110_spill] sm:$0xff] }
 0x2ef   : > { %3040 = vmatprep.mubr.f32.mxu1 %v15648_v60 }
 0x2f5   : > { %2388 = vmatmul.mubr.f32.gmra.mrb[196].mxu0 %v15814_v50 }
 0x2f6   : > { %3041 = vmatmul.mubr.f32.gmra.mrb[196].mxu1 %v15814_v50  ;;  %2393 = vmatprep.mubr.f32.mxu0 %v15648_v60  ;;  %v15871_v50 = vld [vmem:[#allocation114_spill] sm:$0xff] }
 0x2f7   : > { %3046 = vmatprep.mubr.f32.mxu1 %v15648_v60 }
 0x2fd   : > { %2394 = vmatmul.mubr.f32.gmra.mrb[196].mxu0 %v15815_v34 }
 0x2fe   : > { %3047 = vmatmul.mubr.f32.gmra.mrb[196].mxu1 %v15815_v34  ;;  %2399 = vmatprep.mubr.f32.mxu0 %v15648_v60 }
 0x2ff   : > { %3052 = vmatprep.mubr.f32.mxu1 %v15648_v60 }
 0x305   : > { %2400 = vmatmul.mubr.f32.gmra.mrb[196].mxu0 %v12694_v42 }
 0x306   : > { %3053 = vmatmul.mubr.f32.gmra.mrb[196].mxu1 %v12694_v42  ;;  %2405 = vmatprep.mubr.f32.mxu0 %v15648_v60  ;;  %v15844_v42 = vld [vmem:[#allocation34_spill] sm:$0xff] }
 0x307   : > { %3058 = vmatprep.mubr.f32.mxu1 %v15648_v60 }
 0x30d   : > { %2406 = vmatmul.mubr.f32.gmra.mrb[196].mxu0 %v12706_v54 }
 0x30e   : > { %3059 = vmatmul.mubr.f32.gmra.mrb[196].mxu1 %v12706_v54  ;;  %2411 = vmatprep.mubr.f32.mxu0 %v15648_v60  ;;  %v15848_v54 = vld [vmem:[#allocation5_spill] sm:$0xff] }
 0x30f   : > { %3064 = vmatprep.mubr.f32.mxu1 %v15648_v60 }
 0x315   : > { %2412 = vmatmul.mubr.f32.gmra.mrb[196].mxu0 %v12720_v22 }
 0x316   : > { %3065 = vmatmul.mubr.f32.gmra.mrb[196].mxu1 %v12720_v22  ;;  %2417 = vmatprep.mubr.f32.mxu0 %v15648_v60  ;;  %v15849_v22 = vld [vmem:[#allocation6_spill] sm:$0xff] }
 0x317   : > { %3070 = vmatprep.mubr.f32.mxu1 %v15648_v60 }
 0x31d   : > { %2418 = vmatmul.mubr.f32.gmra.mrb[196].mxu0 %v12734_v11 }
 0x31e   : > { %3071 = vmatmul.mubr.f32.gmra.mrb[196].mxu1 %v12734_v11  ;;  %2423 = vmatprep.mubr.f32.mxu0 %v15648_v60  ;;  %v15816_v11 = vld [vmem:[#allocation32_spill] sm:$0xff] }
 0x31f   : > { %3076 = vmatprep.mubr.f32.mxu1 %v15648_v60 }
 0x325   : > { %2424 = vmatmul.mubr.f32.gmra.mrb[196].mxu0 %v12748_v59 }
 0x326   : > { %3077 = vmatmul.mubr.f32.gmra.mrb[196].mxu1 %v12748_v59  ;;  %2429 = vmatprep.mubr.f32.mxu0 %v15648_v60  ;;  %v15846_v59 = vld [vmem:[#allocation38_spill] sm:$0xff] }
 0x327   : > { %3082 = vmatprep.mubr.f32.mxu1 %v15648_v60 }
 0x32d   : > { %2430 = vmatmul.mubr.f32.gmra.mrb[196].mxu0 %v12760_v1 }
 0x32e   : > { %3083 = vmatmul.mubr.f32.gmra.mrb[196].mxu1 %v12760_v1  ;;  %2435 = vmatprep.mubr.f32.mxu0 %v15648_v60  ;;  %v15838_v1 = vld [vmem:[#allocation26_spill] sm:$0xff] }
 0x32f   : > { %3088 = vmatprep.mubr.f32.mxu1 %v15648_v60 }
 0x335   : > { %2436 = vmatmul.mubr.f32.gmra.mrb[196].mxu0 %v12776_v10 }
 0x336   : > { %3089 = vmatmul.mubr.f32.gmra.mrb[196].mxu1 %v12776_v10  ;;  %2441 = vmatprep.mubr.f32.mxu0 %v15648_v60  ;;  %v15850_v10 = vld [vmem:[#allocation48_spill] sm:$0xff] }
 0x337   : > { %3094 = vmatprep.mubr.f32.mxu1 %v15648_v60 }
 0x33d   : > { %2442 = vmatmul.mubr.f32.gmra.mrb[196].mxu0 %v12788_v15 }
 0x33e   : > { %3095 = vmatmul.mubr.f32.gmra.mrb[196].mxu1 %v12788_v15  ;;  %2447 = vmatprep.mubr.f32.mxu0 %v15648_v60  ;;  %v15840_v15 = vld [vmem:[#allocation29_spill] sm:$0xff] }
 0x33f   : > { %3100 = vmatprep.mubr.f32.mxu1 %v15648_v60 }
 0x345   : > { %2448 = vmatmul.mubr.f32.gmra.mrb[196].mxu0 %v12804_v40 }
 0x346   : > { %3101 = vmatmul.mubr.f32.gmra.mrb[196].mxu1 %v12804_v40  ;;  %2453 = vmatprep.mubr.f32.mxu0 %v15648_v60  ;;  %v15851_v40 = vld [vmem:[#allocation51_spill] sm:$0xff] }
 0x347   : > { %3106 = vmatprep.mubr.f32.mxu1 %v15648_v60 }
 0x34d   : > { %2454 = vmatmul.mubr.f32.gmra.mrb[196].mxu0 %v12816_v51 }
 0x34e   : > { %3107 = vmatmul.mubr.f32.gmra.mrb[196].mxu1 %v12816_v51  ;;  %2459 = vmatprep.mubr.f32.mxu0 %v15648_v60  ;;  %v15845_v51 = vld [vmem:[#allocation39_spill] sm:$0xff] }
 0x34f   : > { %3112 = vmatprep.mubr.f32.mxu1 %v15648_v60 }
 0x355   : > { %2460 = vmatmul.mubr.f32.gmra.mrb[196].mxu0 %v12830_v47 }
 0x356   : > { %3113 = vmatmul.mubr.f32.gmra.mrb[196].mxu1 %v12830_v47  ;;  %2465 = vmatprep.mubr.f32.mxu0 %v15648_v60  ;;  %v15852_v47 = vld [vmem:[#allocation54_spill] sm:$0xff] }
 0x357   : > { %3118 = vmatprep.mubr.f32.mxu1 %v15648_v60 }
 0x35d   : > { %2466 = vmatmul.mubr.f32.gmra.mrb[196].mxu0 %v12838_v21 }
 0x35e   : > { %3119 = vmatmul.mubr.f32.gmra.mrb[196].mxu1 %v12838_v21  ;;  %2471 = vmatprep.mubr.f32.mxu0 %v15648_v60  ;;  %v15818_v21 = vld [vmem:[#allocation8_spill] sm:$0xff] }
 0x35f   : > { %3124 = vmatprep.mubr.f32.mxu1 %v15648_v60 }
 0x365   : > { %2472 = vmatmul.mubr.f32.gmra.mrb[196].mxu0 %v12850_v14 }
 0x366   : > { %3125 = vmatmul.mubr.f32.gmra.mrb[196].mxu1 %v12850_v14  ;;  %2477 = vmatprep.mubr.f32.mxu0 %v15648_v60  ;;  %v15847_v14 = vld [vmem:[#allocation40_spill] sm:$0xff] }
 0x367   : > { %3130 = vmatprep.mubr.f32.mxu1 %v15648_v60 }
 0x36d   : > { %2478 = vmatmul.mubr.f32.gmra.mrb[196].mxu0 %v12858_v28 }
 0x36e   : > { %3131 = vmatmul.mubr.f32.gmra.mrb[196].mxu1 %v12858_v28  ;;  %2483 = vmatprep.mubr.f32.mxu0 %v15648_v60  ;;  %v15827_v28 = vld [vmem:[#allocation17_spill] sm:$0xff] }
 0x36f   : > { %3136 = vmatprep.mubr.f32.mxu1 %v15648_v60 }
 0x375   : > { %2484 = vmatmul.mubr.f32.gmra.mrb[196].mxu0 %v12870_v55 }
 0x376   : > { %3137 = vmatmul.mubr.f32.gmra.mrb[196].mxu1 %v12870_v55  ;;  %2489 = vmatprep.mubr.f32.mxu0 %v15648_v60  ;;  %v15853_v55 = vld [vmem:[#allocation57_spill] sm:$0xff] }
 0x377   : > { %3142 = vmatprep.mubr.f32.mxu1 %v15648_v60 }
 0x37d   : > { %2490 = vmatmul.mubr.f32.gmra.mrb[196].mxu0 %v12878_v18 }
 0x37e   : > { %3143 = vmatmul.mubr.f32.gmra.mrb[196].mxu1 %v12878_v18  ;;  %2495 = vmatprep.mubr.f32.mxu0 %v15648_v60  ;;  %v15841_v18 = vld [vmem:[#allocation45_spill] sm:$0xff] }
 0x37f   : > { %3148 = vmatprep.mubr.f32.mxu1 %v15648_v60 }
 0x385   : > { %2496 = vmatmul.mubr.f32.gmra.mrb[196].mxu0 %v12890_v8 }
 0x386   : > { %3149 = vmatmul.mubr.f32.gmra.mrb[196].mxu1 %v12890_v8  ;;  %2501 = vmatprep.mubr.f32.mxu0 %v15648_v60  ;;  %v15854_v8 = vld [vmem:[#allocation60_spill] sm:$0xff] }
 0x387   : > { %3154 = vmatprep.mubr.f32.mxu1 %v15648_v60 }
 0x38d   : > { %2502 = vmatmul.mubr.f32.gmra.mrb[196].mxu0 %v12898_v29 }
 0x38e   : > { %3155 = vmatmul.mubr.f32.gmra.mrb[196].mxu1 %v12898_v29  ;;  %2507 = vmatprep.mubr.f32.mxu0 %v15648_v60  ;;  %v15842_v29 = vld [vmem:[#allocation28_spill] sm:$0xff] }
 0x38f   : > { %3160 = vmatprep.mubr.f32.mxu1 %v15648_v60 }
 0x395   : > { %2508 = vmatmul.mubr.f32.gmra.mrb[196].mxu0 %v12910_v23 }
 0x396   : > { %3161 = vmatmul.mubr.f32.gmra.mrb[196].mxu1 %v12910_v23  ;;  %2513 = vmatprep.mubr.f32.mxu0 %v15648_v60  ;;  %v15855_v23 = vld [vmem:[#allocation63_spill] sm:$0xff] }
 0x397   : > { %3166 = vmatprep.mubr.f32.mxu1 %v15648_v60 }
 0x39d   : > { %2514 = vmatmul.mubr.f32.gmra.mrb[196].mxu0 %v12918_v9 }
 0x39e   : > { %3167 = vmatmul.mubr.f32.gmra.mrb[196].mxu1 %v12918_v9  ;;  %2519 = vmatprep.mubr.f32.mxu0 %v15648_v60  ;;  %v15839_v9 = vld [vmem:[#allocation27_spill] sm:$0xff] }
 0x39f   : > { %3172 = vmatprep.mubr.f32.mxu1 %v15648_v60 }
 0x3a5   : > { %2520 = vmatmul.mubr.f32.gmra.mrb[196].mxu0 %v12930_v7 }
 0x3a6   : > { %3173 = vmatmul.mubr.f32.gmra.mrb[196].mxu1 %v12930_v7  ;;  %2525 = vmatprep.mubr.f32.mxu0 %v15648_v60  ;;  %v15856_v7 = vld [vmem:[#allocation66_spill] sm:$0xff] }
 0x3a7   : > { %3178 = vmatprep.mubr.f32.mxu1 %v15648_v60 }
 0x3ad   : > { %2526 = vmatmul.mubr.f32.gmra.mrb[196].mxu0 %v12938_v43 }
 0x3ae   : > { %3179 = vmatmul.mubr.f32.gmra.mrb[196].mxu1 %v12938_v43  ;;  %2531 = vmatprep.mubr.f32.mxu0 %v15648_v60  ;;  %v15837_v43 = vld [vmem:[#allocation24_spill] sm:$0xff] }
 0x3af   : > { %3184 = vmatprep.mubr.f32.mxu1 %v15648_v60 }
 0x3b5   : > { %2532 = vmatmul.mubr.f32.gmra.mrb[196].mxu0 %v12950_v45 }
 0x3b6   : > { %3185 = vmatmul.mubr.f32.gmra.mrb[196].mxu1 %v12950_v45  ;;  %2537 = vmatprep.mubr.f32.mxu0 %v15648_v60  ;;  %v15857_v45 = vld [vmem:[#allocation69_spill] sm:$0xff] }
 0x3b7   : > { %3190 = vmatprep.mubr.f32.mxu1 %v15648_v60 }
 0x3bd   : > { %2538 = vmatmul.mubr.f32.gmra.mrb[196].mxu0 %v12958_v38 }
 0x3be   : > { %3191 = vmatmul.mubr.f32.gmra.mrb[196].mxu1 %v12958_v38  ;;  %2543 = vmatprep.mubr.f32.mxu0 %v15648_v60  ;;  %v15836_v38 = vld [vmem:[#allocation25_spill] sm:$0xff] }
 0x3bf   : > { %3196 = vmatprep.mubr.f32.mxu1 %v15648_v60 }
 0x3c5   : > { %2544 = vmatmul.mubr.f32.gmra.mrb[196].mxu0 %v12970_v52 }
 0x3c6   : > { %3197 = vmatmul.mubr.f32.gmra.mrb[196].mxu1 %v12970_v52  ;;  %2549 = vmatprep.mubr.f32.mxu0 %v15648_v60  ;;  %v15858_v52 = vld [vmem:[#allocation72_spill] sm:$0xff] }
 0x3c7   : > { %3202 = vmatprep.mubr.f32.mxu1 %v15648_v60 }
 0x3cd   : > { %2550 = vmatmul.mubr.f32.gmra.mrb[196].mxu0 %v12978_v27 }
 0x3ce   : > { %3203 = vmatmul.mubr.f32.gmra.mrb[196].mxu1 %v12978_v27  ;;  %2555 = vmatprep.mubr.f32.mxu0 %v15648_v60  ;;  %v15834_v27 = vld [vmem:[#allocation22_spill] sm:$0xff] }
 0x3cf   : > { %3208 = vmatprep.mubr.f32.mxu1 %v15648_v60 }
 0x3d5   : > { %2556 = vmatmul.mubr.f32.gmra.mrb[196].mxu0 %v12990_v3 }
 0x3d6   : > { %3209 = vmatmul.mubr.f32.gmra.mrb[196].mxu1 %v12990_v3  ;;  %2561 = vmatprep.mubr.f32.mxu0 %v15648_v60  ;;  %v15859_v3 = vld [vmem:[#allocation75_spill] sm:$0xff] }
 0x3d7   : > { %3214 = vmatprep.mubr.f32.mxu1 %v15648_v60 }
 0x3dd   : > { %2562 = vmatmul.mubr.f32.gmra.mrb[196].mxu0 %v12998_v5 }
 0x3de   : > { %3215 = vmatmul.mubr.f32.gmra.mrb[196].mxu1 %v12998_v5  ;;  %2567 = vmatprep.mubr.f32.mxu0 %v15648_v60  ;;  %v15833_v5 = vld [vmem:[#allocation20_spill] sm:$0xff] }
 0x3df   : > { %3220 = vmatprep.mubr.f32.mxu1 %v15648_v60 }
 0x3e5   : > { %2568 = vmatmul.mubr.f32.gmra.mrb[196].mxu0 %v13010_v24 }
 0x3e6   : > { %3221 = vmatmul.mubr.f32.gmra.mrb[196].mxu1 %v13010_v24  ;;  %2573 = vmatprep.mubr.f32.mxu0 %v15648_v60  ;;  %v15860_v24 = vld [vmem:[#allocation78_spill] sm:$0xff] }
 0x3e7   : > { %3226 = vmatprep.mubr.f32.mxu1 %v15648_v60 }
 0x3ed   : > { %2574 = vmatmul.mubr.f32.gmra.mrb[196].mxu0 %v13018_v63 }
 0x3ee   : > { %3227 = vmatmul.mubr.f32.gmra.mrb[196].mxu1 %v13018_v63  ;;  %2579 = vmatprep.mubr.f32.mxu0 %v15648_v60  ;;  %v15831_v63 = vld [vmem:[#allocation21_spill] sm:$0xff] }
 0x3ef   : > { %3232 = vmatprep.mubr.f32.mxu1 %v15648_v60 }
 0x3f5   : > { %2580 = vmatmul.mubr.f32.gmra.mrb[196].mxu0 %v13030_v56 }
 0x3f6   : > { %3233 = vmatmul.mubr.f32.gmra.mrb[196].mxu1 %v13030_v56  ;;  %2585 = vmatprep.mubr.f32.mxu0 %v15648_v60  ;;  %v15861_v56 = vld [vmem:[#allocation81_spill] sm:$0xff] }
 0x3f7   : > { %3238 = vmatprep.mubr.f32.mxu1 %v15648_v60 }
 0x3fd   : > { %2586 = vmatmul.mubr.f32.gmra.mrb[196].mxu0 %v13038_v0 }
 0x3fe   : > { %3239 = vmatmul.mubr.f32.gmra.mrb[196].mxu1 %v13038_v0  ;;  %2591 = vmatprep.mubr.f32.mxu0 %v15648_v60  ;;  %v15832_v0 = vld [vmem:[#allocation42_spill] sm:$0xff] }
 0x3ff   : > { %3244 = vmatprep.mubr.f32.mxu1 %v15648_v60 }
 0x405   : > { %2592 = vmatmul.mubr.f32.gmra.mrb[196].mxu0 %v13050_v41 }
 0x406   : > { %3245 = vmatmul.mubr.f32.gmra.mrb[196].mxu1 %v13050_v41  ;;  %2597 = vmatprep.mubr.f32.mxu0 %v15648_v60  ;;  %v15862_v41 = vld [vmem:[#allocation84_spill] sm:$0xff] }
 0x407   : > { %3250 = vmatprep.mubr.f32.mxu1 %v15648_v60 }
 0x40d   : > { %2598 = vmatmul.mubr.f32.gmra.mrb[196].mxu0 %v13058_v57 }
 0x40e   : > { %3251 = vmatmul.mubr.f32.gmra.mrb[196].mxu1 %v13058_v57  ;;  %2603 = vmatprep.mubr.f32.mxu0 %v15648_v60  ;;  %v15830_v57 = vld [vmem:[#allocation19_spill] sm:$0xff] }
 0x40f   : > { %3256 = vmatprep.mubr.f32.mxu1 %v15648_v60 }
 0x415   : > { %2604 = vmatmul.mubr.f32.gmra.mrb[196].mxu0 %v13070_v62 }
 0x416   : > { %3257 = vmatmul.mubr.f32.gmra.mrb[196].mxu1 %v13070_v62  ;;  %2609 = vmatprep.mubr.f32.mxu0 %v15648_v60  ;;  %v15863_v62 = vld [vmem:[#allocation87_spill] sm:$0xff] }
 0x417   : > { %3262 = vmatprep.mubr.f32.mxu1 %v15648_v60 }
 0x41d   : > { %2610 = vmatmul.mubr.f32.gmra.mrb[196].mxu0 %v13078_v35 }
 0x41e   : > { %3263 = vmatmul.mubr.f32.gmra.mrb[196].mxu1 %v13078_v35  ;;  %2615 = vmatprep.mubr.f32.mxu0 %v15648_v60  ;;  %v15829_v35 = vld [vmem:[#allocation18_spill] sm:$0xff] }
 0x41f   : > { %3268 = vmatprep.mubr.f32.mxu1 %v15648_v60 }
 0x425   : > { %2616 = vmatmul.mubr.f32.gmra.mrb[196].mxu0 %v13090_v48 }
 0x426   : > { %3269 = vmatmul.mubr.f32.gmra.mrb[196].mxu1 %v13090_v48  ;;  %2621 = vmatprep.mubr.f32.mxu0 %v15648_v60  ;;  %v15864_v48 = vld [vmem:[#allocation90_spill] sm:$0xff] }
 0x427   : > { %3274 = vmatprep.mubr.f32.mxu1 %v15648_v60 }
 0x42d   : > { %2622 = vmatmul.mubr.f32.gmra.mrb[196].mxu0 %v13098_v33 }
 0x42e   : > { %3275 = vmatmul.mubr.f32.gmra.mrb[196].mxu1 %v13098_v33  ;;  %2627 = vmatprep.mubr.f32.mxu0 %v15648_v60  ;;  %v15828_v33 = vld [vmem:[#allocation16_spill] sm:$0xff] }
 0x42f   : > { %3280 = vmatprep.mubr.f32.mxu1 %v15648_v60 }
 0x435   : > { %2628 = vmatmul.mubr.f32.gmra.mrb[196].mxu0 %v13110_v12 }
 0x436   : > { %3281 = vmatmul.mubr.f32.gmra.mrb[196].mxu1 %v13110_v12  ;;  %2633 = vmatprep.mubr.f32.mxu0 %v15648_v60  ;;  %v15865_v12 = vld [vmem:[#allocation93_spill] sm:$0xff] }
 0x437   : > { %3286 = vmatprep.mubr.f32.mxu1 %v15648_v60 }
 0x43d   : > { %2634 = vmatmul.mubr.f32.gmra.mrb[196].mxu0 %v13118_v20 }
 0x43e   : > { %3287 = vmatmul.mubr.f32.gmra.mrb[196].mxu1 %v13118_v20  ;;  %2639 = vmatprep.mubr.f32.mxu0 %v15648_v60  ;;  %v15826_v20 = vld [vmem:[#allocation15_spill] sm:$0xff] }
 0x43f   : > { %3292 = vmatprep.mubr.f32.mxu1 %v15648_v60 }
 0x445   : > { %2640 = vmatmul.mubr.f32.gmra.mrb[196].mxu0 %v13130_v13 }
 0x446   : > { %3293 = vmatmul.mubr.f32.gmra.mrb[196].mxu1 %v13130_v13  ;;  %2645 = vmatprep.mubr.f32.mxu0 %v15648_v60  ;;  %v15866_v13 = vld [vmem:[#allocation96_spill] sm:$0xff] }
 0x447   : > { %3298 = vmatprep.mubr.f32.mxu1 %v15648_v60 }
 0x44d   : > { %2646 = vmatmul.mubr.f32.gmra.mrb[196].mxu0 %v13138_v4 }
 0x44e   : > { %3299 = vmatmul.mubr.f32.gmra.mrb[196].mxu1 %v13138_v4  ;;  %2651 = vmatprep.mubr.f32.mxu0 %v15648_v60  ;;  %v15825_v4 = vld [vmem:[#allocation14_spill] sm:$0xff] }
 0x44f   : > { %3304 = vmatprep.mubr.f32.mxu1 %v15648_v60 }
 0x455   : > { %2652 = vmatmul.mubr.f32.gmra.mrb[196].mxu0 %v13150_v19 }
 0x456   : > { %3305 = vmatmul.mubr.f32.gmra.mrb[196].mxu1 %v13150_v19  ;;  %2657 = vmatprep.mubr.f32.mxu0 %v15648_v60  ;;  %v15867_v19 = vld [vmem:[#allocation99_spill] sm:$0xff] }
 0x457   : > { %3310 = vmatprep.mubr.f32.mxu1 %v15648_v60 }
 0x45d   : > { %2658 = vmatmul.mubr.f32.gmra.mrb[196].mxu0 %v13158_v61 }
 0x45e   : > { %3311 = vmatmul.mubr.f32.gmra.mrb[196].mxu1 %v13158_v61  ;;  %2663 = vmatprep.mubr.f32.mxu0 %v15648_v60  ;;  %v15823_v61 = vld [vmem:[#allocation36_spill] sm:$0xff] }
 0x45f   : > { %3316 = vmatprep.mubr.f32.mxu1 %v15648_v60 }
 0x465   : > { %2664 = vmatmul.mubr.f32.gmra.mrb[196].mxu0 %v13170_v44 }
 0x466   : > { %3317 = vmatmul.mubr.f32.gmra.mrb[196].mxu1 %v13170_v44  ;;  %2669 = vmatprep.mubr.f32.mxu0 %v15648_v60  ;;  %v15868_v44 = vld [vmem:[#allocation102_spill] sm:$0xff] }
 0x467   : > { %3322 = vmatprep.mubr.f32.mxu1 %v15648_v60 }
 0x46d   : > { %2670 = vmatmul.mubr.f32.gmra.mrb[196].mxu0 %v13178_v2 }
 0x46e   : > { %3323 = vmatmul.mubr.f32.gmra.mrb[196].mxu1 %v13178_v2  ;;  %2675 = vmatprep.mubr.f32.mxu0 %v15648_v60  ;;  %v15824_v2 = vld [vmem:[#allocation12_spill] sm:$0xff] }
 0x46f   : > { %3328 = vmatprep.mubr.f32.mxu1 %v15648_v60 }
 0x475   : > { %2676 = vmatmul.mubr.f32.gmra.mrb[196].mxu0 %v13190_v16 }
 0x476   : > { %3329 = vmatmul.mubr.f32.gmra.mrb[196].mxu1 %v13190_v16  ;;  %2681 = vmatprep.mubr.f32.mxu0 %v15648_v60  ;;  %v15869_v16 = vld [vmem:[#allocation106_spill] sm:$0xff] }
 0x477   : > { %3334 = vmatprep.mubr.f32.mxu1 %v15648_v60 }
 0x47d   : > { %2682 = vmatmul.mubr.f32.gmra.mrb[196].mxu0 %v13198_v58 }
 0x47e   : > { %3335 = vmatmul.mubr.f32.gmra.mrb[196].mxu1 %v13198_v58  ;;  %2687 = vmatprep.mubr.f32.mxu0 %v15648_v60  ;;  %v15822_v58 = vld [vmem:[#allocation13_spill] sm:$0xff] }
 0x47f   : > { %3340 = vmatprep.mubr.f32.mxu1 %v15648_v60 }
 0x485   : > { %2688 = vmatmul.mubr.f32.gmra.mrb[196].mxu0 %v13210_v36 }
 0x486   : > { %3341 = vmatmul.mubr.f32.gmra.mrb[196].mxu1 %v13210_v36  ;;  %2693 = vmatprep.mubr.f32.mxu0 %v15648_v60  ;;  %v15843_v36 = vld [vmem:[#allocation30_spill] sm:$0xff] }
 0x487   : > { %3346 = vmatprep.mubr.f32.mxu1 %v15648_v60 }
 0x48d   : > { %2694 = vmatmul.mubr.f32.gmra.mrb[196].mxu0 %v13218_v53 }
 0x48e   : > { %3347 = vmatmul.mubr.f32.gmra.mrb[196].mxu1 %v13218_v53  ;;  %2699 = vmatprep.mubr.f32.mxu0 %v15648_v60  ;;  %v15821_v53 = vld [vmem:[#allocation11_spill] sm:$0xff] }
 0x48f   : > { %3352 = vmatprep.mubr.f32.mxu1 %v15648_v60 }
 0x495   : > { %2700 = vmatmul.mubr.f32.gmra.mrb[196].mxu0 %v13230_v30 }
 0x496   : > { %3353 = vmatmul.mubr.f32.gmra.mrb[196].mxu1 %v13230_v30  ;;  %2705 = vmatprep.mubr.f32.mxu0 %v15648_v60  ;;  %v15835_v30 = vld [vmem:[#allocation23_spill] sm:$0xff] }
 0x497   : > { %3358 = vmatprep.mubr.f32.mxu1 %v15648_v60 }
 0x49d   : > { %2706 = vmatmul.mubr.f32.gmra.mrb[196].mxu0 %v13238_v49 }
 0x49e   : > { %3359 = vmatmul.mubr.f32.gmra.mrb[196].mxu1 %v13238_v49  ;;  %2711 = vmatprep.mubr.f32.mxu0 %v15648_v60  ;;  %v15820_v49 = vld [vmem:[#allocation10_spill] sm:$0xff] }
 0x49f   : > { %3364 = vmatprep.mubr.f32.mxu1 %v15648_v60 }
 0x4a5   : > { %2712 = vmatmul.mubr.f32.gmra.mrb[196].mxu0 %v13250_v17 }
 0x4a6   : > { %3365 = vmatmul.mubr.f32.gmra.mrb[196].mxu1 %v13250_v17  ;;  %2717 = vmatprep.mubr.f32.mxu0 %v15648_v60  ;;  %v15817_v17 = vld [vmem:[#allocation7_spill] sm:$0xff] }
 0x4a7   : > { %3370 = vmatprep.mubr.f32.mxu1 %v15648_v60 }
 0x4ad   : > { %2718 = vmatmul.mubr.f32.gmra.mrb[196].mxu0 %v13258_v46 }
 0x4ae   : > { %3371 = vmatmul.mubr.f32.gmra.mrb[196].mxu1 %v13258_v46  ;;  %3857 = vmatprep.mubr.f32.mxu0 %v15648_v60  ;;  %v15819_v46 = vld [vmem:[#allocation9_spill] sm:$0xff] }
 0x4af   : > { %4510 = vmatprep.mubr.f32.mxu1 %v15648_v60 }
 0x4b1   : > { %3858 = vmatmul.mubr.f32.vlgmr.msra.gmra.mrb[198].mxu0 %v15816_v11 }
 0x4b2   : > { %4511 = vmatmul.mubr.f32.vlgmr.msra.gmra.mrb[198].mxu1 %v15816_v11  ;;  %9593 = vmatpush1.bf16.msra.mxu0 %v11593_v25 }
 0x4b3   : > { %9625 = vmatpush1.bf16.msra.mxu1 %v11595_v26  ;;  %3863 = vmatprep.mubr.f32.mxu0 %v15648_v60 }
 0x4b4   : > { %4516 = vmatprep.mubr.f32.mxu1 %v15648_v60  ;;  %9595 = vmatprep.subr.bf16.mxu0 %v15817_v17 }
 0x4b5   : > { %9627 = vmatprep.subr.bf16.mxu1 %v15818_v21 }
 0x4b6   : > { %9597 = vmatpush1.bf16.msra.mxu0 %v15819_v46 }
 0x4b7   : > { %9629 = vmatpush1.bf16.msra.mxu1 %v15820_v49  ;;  %9599 = vmatprep.subr.bf16.mxu0 %v15821_v53 }
 0x4b8   : > { %9631 = vmatprep.subr.bf16.mxu1 %v15822_v58 }
 0x4b9   : > { %3864 = vmatmul.mubr.f32.gmra.mrb[198].mxu0 %v15823_v61 }
 0x4ba   : > { %4517 = vmatmul.mubr.f32.gmra.mrb[198].mxu1 %v15823_v61  ;;  %3869 = vmatprep.mubr.f32.mxu0 %v15648_v60 }
 0x4bb   : > { %4522 = vmatprep.mubr.f32.mxu1 %v15648_v60  ;;  %9601 = vmatpush1.bf16.msra.mxu0 %v15824_v2 }
 0x4bc   : > { %9633 = vmatpush1.bf16.msra.mxu1 %v15825_v4  ;;  %9603 = vmatprep.subr.bf16.mxu0 %v15826_v20 }
 0x4bd   : > { %9635 = vmatprep.subr.bf16.mxu1 %v15827_v28 }
 0x4bf   : > { %9605 = vmatpush1.bf16.msra.mxu0 %v15828_v33 }
 0x4c0   : > { %9637 = vmatpush1.bf16.msra.mxu1 %v15829_v35  ;;  %9607 = vmatprep.subr.bf16.mxu0 %v15830_v57 }
 0x4c1   : > { %9639 = vmatprep.subr.bf16.mxu1 %v15831_v63  ;;  %3870 = vmatmul.mubr.f32.gmra.mrb[198].mxu0 %v15832_v0 }
 0x4c2   : > { %4523 = vmatmul.mubr.f32.gmra.mrb[198].mxu1 %v15832_v0  ;;  %3875 = vmatprep.mubr.f32.mxu0 %v15648_v60 }
 0x4c3   : > { %4528 = vmatprep.mubr.f32.mxu1 %v15648_v60  ;;  %9609 = vmatpush1.bf16.msra.mxu0 %v15833_v5 }
 0x4c4   : > { %9641 = vmatpush1.bf16.msra.mxu1 %v15834_v27  ;;  %9611 = vmatprep.subr.bf16.mxu0 %v15835_v30 }
 0x4c5   : > { %9643 = vmatprep.subr.bf16.mxu1 %v15836_v38 }
 0x4c7   : > { %9613 = vmatpush1.bf16.msra.mxu0 %v15837_v43 }
 0x4c8   : > { %9645 = vmatpush1.bf16.msra.mxu1 %v15838_v1  ;;  %9615 = vmatprep.subr.bf16.mxu0 %v15839_v9 }
 0x4c9   : > { %9647 = vmatprep.subr.bf16.mxu1 %v15840_v15  ;;  %3876 = vmatmul.mubr.f32.gmra.mrb[198].mxu0 %v15841_v18 }
 0x4ca   : > { %4529 = vmatmul.mubr.f32.gmra.mrb[198].mxu1 %v15841_v18  ;;  %3881 = vmatprep.mubr.f32.mxu0 %v15648_v60  ;;  %v15872_v18 = vld [vmem:[#allocation118_spill] sm:$0xff] }
 0x4cb   : > { %4534 = vmatprep.mubr.f32.mxu1 %v15648_v60  ;;  %9617 = vmatpush1.bf16.msra.mxu0 %v15842_v29 }
 0x4cc   : > { %9649 = vmatpush1.bf16.msra.mxu1 %v15843_v36  ;;  %9619 = vmatprep.subr.bf16.mxu0 %v15844_v42 }
 0x4cd   : > { %9651 = vmatprep.subr.bf16.mxu1 %v15845_v51 }
 0x4cf   : > { %9621 = vmatpush1.bf16.msra.mxu0 %v15846_v59 }
 0x4d0   : > { %9653 = vmatpush1.bf16.msra.mxu1 %v15847_v14  ;;  %9655 = vmatprep.subr.bf16.mxu0 %v15848_v54  ;;  %v15873_v54 = vld [vmem:[#allocation122_spill] sm:$0xff] }
 0x4d1   : > { %9687 = vmatprep.subr.bf16.mxu1 %v15849_v22  ;;  %3882 = vmatmul.mubr.f32.gmra.mrb[198].mxu0 %v15850_v10  ;;  %v15874_v22 = vld [vmem:[#allocation126_spill] sm:$0xff] }
 0x4d2   : > { %4535 = vmatmul.mubr.f32.gmra.mrb[198].mxu1 %v15850_v10  ;;  %3887 = vmatprep.mubr.f32.mxu0 %v15648_v60  ;;  %v15875_v10 = vld [vmem:[#allocation130_spill] sm:$0xff] }
 0x4d3   : > { %4540 = vmatprep.mubr.f32.mxu1 %v15648_v60 }
 0x4d9   : > { %3888 = vmatmul.mubr.f32.gmra.mrb[198].mxu0 %v15851_v40 }
 0x4da   : > { %4541 = vmatmul.mubr.f32.gmra.mrb[198].mxu1 %v15851_v40  ;;  %3893 = vmatprep.mubr.f32.mxu0 %v15648_v60  ;;  %v15876_v40 = vld [vmem:[#allocation134_spill] sm:$0xff] }
 0x4db   : > { %4546 = vmatprep.mubr.f32.mxu1 %v15648_v60 }
 0x4e1   : > { %3894 = vmatmul.mubr.f32.gmra.mrb[198].mxu0 %v15852_v47 }
 0x4e2   : > { %4547 = vmatmul.mubr.f32.gmra.mrb[198].mxu1 %v15852_v47  ;;  %3899 = vmatprep.mubr.f32.mxu0 %v15648_v60  ;;  %v15877_v47 = vld [vmem:[#allocation138_spill] sm:$0xff] }
 0x4e3   : > { %4552 = vmatprep.mubr.f32.mxu1 %v15648_v60 }
 0x4e9   : > { %3900 = vmatmul.mubr.f32.gmra.mrb[198].mxu0 %v15853_v55 }
 0x4ea   : > { %4553 = vmatmul.mubr.f32.gmra.mrb[198].mxu1 %v15853_v55  ;;  %3905 = vmatprep.mubr.f32.mxu0 %v15648_v60  ;;  %v15878_v55 = vld [vmem:[#allocation142_spill] sm:$0xff] }
 0x4eb   : > { %4558 = vmatprep.mubr.f32.mxu1 %v15648_v60 }
 0x4f1   : > { %3906 = vmatmul.mubr.f32.gmra.mrb[198].mxu0 %v15854_v8 }
 0x4f2   : > { %4559 = vmatmul.mubr.f32.gmra.mrb[198].mxu1 %v15854_v8  ;;  %3911 = vmatprep.mubr.f32.mxu0 %v15648_v60  ;;  %v15879_v8 = vld [vmem:[#allocation146_spill] sm:$0xff] }
 0x4f3   : > { %4564 = vmatprep.mubr.f32.mxu1 %v15648_v60 }
 0x4f9   : > { %3912 = vmatmul.mubr.f32.gmra.mrb[198].mxu0 %v15855_v23 }
 0x4fa   : > { %4565 = vmatmul.mubr.f32.gmra.mrb[198].mxu1 %v15855_v23  ;;  %3917 = vmatprep.mubr.f32.mxu0 %v15648_v60  ;;  %v15880_v23 = vld [vmem:[#allocation150_spill] sm:$0xff] }
 0x4fb   : > { %4570 = vmatprep.mubr.f32.mxu1 %v15648_v60 }
 0x501   : > { %3918 = vmatmul.mubr.f32.gmra.mrb[198].mxu0 %v15856_v7 }
 0x502   : > { %4571 = vmatmul.mubr.f32.gmra.mrb[198].mxu1 %v15856_v7  ;;  %3923 = vmatprep.mubr.f32.mxu0 %v15648_v60  ;;  %v15881_v7 = vld [vmem:[#allocation154_spill] sm:$0xff] }
 0x503   : > { %4576 = vmatprep.mubr.f32.mxu1 %v15648_v60 }
 0x509   : > { %3924 = vmatmul.mubr.f32.gmra.mrb[198].mxu0 %v15857_v45 }
 0x50a   : > { %4577 = vmatmul.mubr.f32.gmra.mrb[198].mxu1 %v15857_v45  ;;  %3929 = vmatprep.mubr.f32.mxu0 %v15648_v60  ;;  %v15882_v45 = vld [vmem:[#allocation158_spill] sm:$0xff] }
 0x50b   : > { %4582 = vmatprep.mubr.f32.mxu1 %v15648_v60 }
 0x511   : > { %3930 = vmatmul.mubr.f32.gmra.mrb[198].mxu0 %v15858_v52 }
 0x512   : > { %4583 = vmatmul.mubr.f32.gmra.mrb[198].mxu1 %v15858_v52  ;;  %3935 = vmatprep.mubr.f32.mxu0 %v15648_v60  ;;  %v15883_v52 = vld [vmem:[#allocation162_spill] sm:$0xff] }
 0x513   : > { %4588 = vmatprep.mubr.f32.mxu1 %v15648_v60 }
 0x519   : > { %3936 = vmatmul.mubr.f32.gmra.mrb[198].mxu0 %v15859_v3 }
 0x51a   : > { %4589 = vmatmul.mubr.f32.gmra.mrb[198].mxu1 %v15859_v3  ;;  %3941 = vmatprep.mubr.f32.mxu0 %v15648_v60  ;;  %v15884_v3 = vld [vmem:[#allocation166_spill] sm:$0xff] }
 0x51b   : > { %4594 = vmatprep.mubr.f32.mxu1 %v15648_v60 }
 0x521   : > { %3942 = vmatmul.mubr.f32.gmra.mrb[198].mxu0 %v15860_v24 }
 0x522   : > { %4595 = vmatmul.mubr.f32.gmra.mrb[198].mxu1 %v15860_v24  ;;  %3947 = vmatprep.mubr.f32.mxu0 %v15648_v60  ;;  %v15885_v24 = vld [vmem:[#allocation170_spill] sm:$0xff] }
 0x523   : > { %4600 = vmatprep.mubr.f32.mxu1 %v15648_v60 }
 0x529   : > { %3948 = vmatmul.mubr.f32.gmra.mrb[198].mxu0 %v15861_v56 }
 0x52a   : > { %4601 = vmatmul.mubr.f32.gmra.mrb[198].mxu1 %v15861_v56  ;;  %3953 = vmatprep.mubr.f32.mxu0 %v15648_v60  ;;  %v15886_v56 = vld [vmem:[#allocation174_spill] sm:$0xff] }
 0x52b   : > { %4606 = vmatprep.mubr.f32.mxu1 %v15648_v60 }
 0x531   : > { %3954 = vmatmul.mubr.f32.gmra.mrb[198].mxu0 %v15862_v41 }
 0x532   : > { %4607 = vmatmul.mubr.f32.gmra.mrb[198].mxu1 %v15862_v41  ;;  %3959 = vmatprep.mubr.f32.mxu0 %v15648_v60  ;;  %v15887_v41 = vld [vmem:[#allocation178_spill] sm:$0xff] }
 0x533   : > { %4612 = vmatprep.mubr.f32.mxu1 %v15648_v60 }
 0x539   : > { %3960 = vmatmul.mubr.f32.gmra.mrb[198].mxu0 %v15863_v62 }
 0x53a   : > { %4613 = vmatmul.mubr.f32.gmra.mrb[198].mxu1 %v15863_v62  ;;  %3965 = vmatprep.mubr.f32.mxu0 %v15648_v60  ;;  %v15888_v62 = vld [vmem:[#allocation182_spill] sm:$0xff] }
 0x53b   : > { %4618 = vmatprep.mubr.f32.mxu1 %v15648_v60 }
 0x541   : > { %3966 = vmatmul.mubr.f32.gmra.mrb[198].mxu0 %v15864_v48 }
 0x542   : > { %4619 = vmatmul.mubr.f32.gmra.mrb[198].mxu1 %v15864_v48  ;;  %3971 = vmatprep.mubr.f32.mxu0 %v15648_v60  ;;  %v15889_v48 = vld [vmem:[#allocation186_spill] sm:$0xff] }
 0x543   : > { %4624 = vmatprep.mubr.f32.mxu1 %v15648_v60 }
 0x549   : > { %3972 = vmatmul.mubr.f32.gmra.mrb[198].mxu0 %v15865_v12 }
 0x54a   : > { %4625 = vmatmul.mubr.f32.gmra.mrb[198].mxu1 %v15865_v12  ;;  %3977 = vmatprep.mubr.f32.mxu0 %v15648_v60  ;;  %v15890_v12 = vld [vmem:[#allocation189_spill] sm:$0xff] }
 0x54b   : > { %4630 = vmatprep.mubr.f32.mxu1 %v15648_v60 }
 0x551   : > { %3978 = vmatmul.mubr.f32.gmra.mrb[198].mxu0 %v15866_v13 }
 0x552   : > { %4631 = vmatmul.mubr.f32.gmra.mrb[198].mxu1 %v15866_v13  ;;  %3983 = vmatprep.mubr.f32.mxu0 %v15648_v60  ;;  %v15891_v13 = vld [vmem:[#allocation192_spill] sm:$0xff] }
 0x553   : > { %4636 = vmatprep.mubr.f32.mxu1 %v15648_v60 }
 0x559   : > { %3984 = vmatmul.mubr.f32.gmra.mrb[198].mxu0 %v15867_v19 }
 0x55a   : > { %4637 = vmatmul.mubr.f32.gmra.mrb[198].mxu1 %v15867_v19  ;;  %3989 = vmatprep.mubr.f32.mxu0 %v15648_v60  ;;  %v15892_v19 = vld [vmem:[#allocation195_spill] sm:$0xff] }
 0x55b   : > { %4642 = vmatprep.mubr.f32.mxu1 %v15648_v60 }
 0x561   : > { %3990 = vmatmul.mubr.f32.gmra.mrb[198].mxu0 %v15868_v44 }
 0x562   : > { %4643 = vmatmul.mubr.f32.gmra.mrb[198].mxu1 %v15868_v44  ;;  %3995 = vmatprep.mubr.f32.mxu0 %v15648_v60  ;;  %v15893_v44 = vld [vmem:[#allocation198_spill] sm:$0xff] }
 0x563   : > { %4648 = vmatprep.mubr.f32.mxu1 %v15648_v60 }
 0x569   : > { %3996 = vmatmul.mubr.f32.gmra.mrb[198].mxu0 %v15869_v16 }
 0x56a   : > { %4649 = vmatmul.mubr.f32.gmra.mrb[198].mxu1 %v15869_v16  ;;  %4001 = vmatprep.mubr.f32.mxu0 %v15648_v60  ;;  %v15894_v16 = vld [vmem:[#allocation201_spill] sm:$0xff] }
 0x56b   : > { %4654 = vmatprep.mubr.f32.mxu1 %v15648_v60 }
 0x571   : > { %4002 = vmatmul.mubr.f32.gmra.mrb[198].mxu0 %v15870_v32 }
 0x572   : > { %4655 = vmatmul.mubr.f32.gmra.mrb[198].mxu1 %v15870_v32  ;;  %4007 = vmatprep.mubr.f32.mxu0 %v15648_v60  ;;  %v15895_v32 = vld [vmem:[#allocation204_spill] sm:$0xff] }
 0x573   : > { %4660 = vmatprep.mubr.f32.mxu1 %v15648_v60 }
 0x579   : > { %4008 = vmatmul.mubr.f32.gmra.mrb[198].mxu0 %v15871_v50 }
 0x57a   : > { %4661 = vmatmul.mubr.f32.gmra.mrb[198].mxu1 %v15871_v50  ;;  %4013 = vmatprep.mubr.f32.mxu0 %v15648_v60  ;;  %v15896_v50 = vld [vmem:[#allocation207_spill] sm:$0xff] }
 0x57b   : > { %4666 = vmatprep.mubr.f32.mxu1 %v15648_v60 }
 0x580   : > { %v13690_v34 = vpop.f32.mrb[196].mxu0 }
 0x581   : > { %v13692_v11 = vpop.f32.mrb[196].mxu1  ;;  %v13694_v61 = vpop.f32.mrb[197].mxu0  ;;  %4014 = vmatmul.mubr.f32.gmra.mrb[198].mxu0 %v15872_v18 }
 0x582   : > { %v13696_v0 = vpop.f32.mrb[197].mxu1  ;;  %4667 = vmatmul.mubr.f32.gmra.mrb[198].mxu1 %v15872_v18  ;;  %4019 = vmatprep.mubr.f32.mxu0 %v15648_v60  ;;  %v15897_v18 = vld [vmem:[#allocation210_spill] sm:$0xff] }
 0x583   : > { %4672 = vmatprep.mubr.f32.mxu1 %v15648_v60 }
 0x589   : > { %4020 = vmatmul.mubr.f32.gmra.mrb[198].mxu0 %v15873_v54 }
 0x58a   : > { %4673 = vmatmul.mubr.f32.gmra.mrb[198].mxu1 %v15873_v54  ;;  %4025 = vmatprep.mubr.f32.mxu0 %v15648_v60  ;;  %v15898_v54 = vld [vmem:[#allocation213_spill] sm:$0xff] }
 0x58b   : > { %4678 = vmatprep.mubr.f32.mxu1 %v15648_v60 }
 0x591   : > { %4026 = vmatmul.mubr.f32.gmra.mrb[198].mxu0 %v15874_v22 }
 0x592   : > { %4679 = vmatmul.mubr.f32.gmra.mrb[198].mxu1 %v15874_v22  ;;  %4031 = vmatprep.mubr.f32.mxu0 %v15648_v60  ;;  %v15899_v22 = vld [vmem:[#allocation216_spill] sm:$0xff] }
 0x593   : > { %4684 = vmatprep.mubr.f32.mxu1 %v15648_v60 }
 0x599   : > { %4032 = vmatmul.mubr.f32.gmra.mrb[198].mxu0 %v15875_v10 }
 0x59a   : > { %4685 = vmatmul.mubr.f32.gmra.mrb[198].mxu1 %v15875_v10  ;;  %4037 = vmatprep.mubr.f32.mxu0 %v15648_v60  ;;  %v15900_v10 = vld [vmem:[#allocation219_spill] sm:$0xff] }
 0x59b   : > { %4690 = vmatprep.mubr.f32.mxu1 %v15648_v60 }
 0x5a1   : > { %4038 = vmatmul.mubr.f32.gmra.mrb[198].mxu0 %v15876_v40 }
 0x5a2   : > { %4691 = vmatmul.mubr.f32.gmra.mrb[198].mxu1 %v15876_v40  ;;  %4043 = vmatprep.mubr.f32.mxu0 %v15648_v60  ;;  %v15901_v40 = vld [vmem:[#allocation222_spill] sm:$0xff] }
 0x5a3   : > { %4696 = vmatprep.mubr.f32.mxu1 %v15648_v60 }
 0x5a9   : > { %4044 = vmatmul.mubr.f32.gmra.mrb[198].mxu0 %v15877_v47 }
 0x5aa   : > { %4697 = vmatmul.mubr.f32.gmra.mrb[198].mxu1 %v15877_v47  ;;  %4049 = vmatprep.mubr.f32.mxu0 %v15648_v60  ;;  %v15902_v47 = vld [vmem:[#allocation225_spill] sm:$0xff] }
 0x5ab   : > { %4702 = vmatprep.mubr.f32.mxu1 %v15648_v60 }
 0x5b1   : > { %4050 = vmatmul.mubr.f32.gmra.mrb[198].mxu0 %v15878_v55 }
 0x5b2   : > { %4703 = vmatmul.mubr.f32.gmra.mrb[198].mxu1 %v15878_v55  ;;  %4055 = vmatprep.mubr.f32.mxu0 %v15648_v60  ;;  %v15903_v55 = vld [vmem:[#allocation228_spill] sm:$0xff] }
 0x5b3   : > { %4708 = vmatprep.mubr.f32.mxu1 %v15648_v60 }
 0x5b9   : > { %4056 = vmatmul.mubr.f32.gmra.mrb[198].mxu0 %v15879_v8 }
 0x5ba   : > { %4709 = vmatmul.mubr.f32.gmra.mrb[198].mxu1 %v15879_v8  ;;  %4061 = vmatprep.mubr.f32.mxu0 %v15648_v60  ;;  %v15904_v8 = vld [vmem:[#allocation231_spill] sm:$0xff] }
 0x5bb   : > { %4714 = vmatprep.mubr.f32.mxu1 %v15648_v60 }
 0x5c1   : > { %4062 = vmatmul.mubr.f32.gmra.mrb[198].mxu0 %v15880_v23 }
 0x5c2   : > { %4715 = vmatmul.mubr.f32.gmra.mrb[198].mxu1 %v15880_v23  ;;  %4067 = vmatprep.mubr.f32.mxu0 %v15648_v60  ;;  %v15905_v23 = vld [vmem:[#allocation234_spill] sm:$0xff] }
 0x5c3   : > { %4720 = vmatprep.mubr.f32.mxu1 %v15648_v60 }
 0x5c9   : > { %4068 = vmatmul.mubr.f32.gmra.mrb[198].mxu0 %v15881_v7 }
 0x5ca   : > { %4721 = vmatmul.mubr.f32.gmra.mrb[198].mxu1 %v15881_v7  ;;  %4073 = vmatprep.mubr.f32.mxu0 %v15648_v60  ;;  %v15906_v7 = vld [vmem:[#allocation237_spill] sm:$0xff] }
 0x5cb   : > { %4726 = vmatprep.mubr.f32.mxu1 %v15648_v60 }
 0x5d1   : > { %4074 = vmatmul.mubr.f32.gmra.mrb[198].mxu0 %v15882_v45 }
 0x5d2   : > { %4727 = vmatmul.mubr.f32.gmra.mrb[198].mxu1 %v15882_v45  ;;  %4079 = vmatprep.mubr.f32.mxu0 %v15648_v60  ;;  %v15907_v45 = vld [vmem:[#allocation240_spill] sm:$0xff] }
 0x5d3   : > { %4732 = vmatprep.mubr.f32.mxu1 %v15648_v60 }
 0x5d9   : > { %4080 = vmatmul.mubr.f32.gmra.mrb[198].mxu0 %v15883_v52 }
 0x5da   : > { %4733 = vmatmul.mubr.f32.gmra.mrb[198].mxu1 %v15883_v52  ;;  %4085 = vmatprep.mubr.f32.mxu0 %v15648_v60  ;;  %v15908_v52 = vld [vmem:[#allocation243_spill] sm:$0xff] }
 0x5db   : > { %4738 = vmatprep.mubr.f32.mxu1 %v15648_v60 }
 0x5e1   : > { %4086 = vmatmul.mubr.f32.gmra.mrb[198].mxu0 %v15884_v3 }
 0x5e2   : > { %4739 = vmatmul.mubr.f32.gmra.mrb[198].mxu1 %v15884_v3  ;;  %4091 = vmatprep.mubr.f32.mxu0 %v15648_v60  ;;  %v15909_v3 = vld [vmem:[#allocation246_spill] sm:$0xff] }
 0x5e3   : > { %4744 = vmatprep.mubr.f32.mxu1 %v15648_v60 }
 0x5e9   : > { %4092 = vmatmul.mubr.f32.gmra.mrb[198].mxu0 %v15885_v24 }
 0x5ea   : > { %4745 = vmatmul.mubr.f32.gmra.mrb[198].mxu1 %v15885_v24  ;;  %4097 = vmatprep.mubr.f32.mxu0 %v15648_v60  ;;  %v15910_v24 = vld [vmem:[#allocation249_spill] sm:$0xff] }
 0x5eb   : > { %4750 = vmatprep.mubr.f32.mxu1 %v15648_v60 }
 0x5f1   : > { %4098 = vmatmul.mubr.f32.gmra.mrb[198].mxu0 %v15886_v56 }
 0x5f2   : > { %4751 = vmatmul.mubr.f32.gmra.mrb[198].mxu1 %v15886_v56  ;;  %4103 = vmatprep.mubr.f32.mxu0 %v15648_v60  ;;  %v15911_v56 = vld [vmem:[#allocation252_spill] sm:$0xff] }
 0x5f3   : > { %4756 = vmatprep.mubr.f32.mxu1 %v15648_v60 }
 0x5f9   : > { %4104 = vmatmul.mubr.f32.gmra.mrb[198].mxu0 %v15887_v41 }
 0x5fa   : > { %4757 = vmatmul.mubr.f32.gmra.mrb[198].mxu1 %v15887_v41  ;;  %4109 = vmatprep.mubr.f32.mxu0 %v15648_v60  ;;  %v15912_v41 = vld [vmem:[#allocation255_spill] sm:$0xff] }
 0x5fb   : > { %4762 = vmatprep.mubr.f32.mxu1 %v15648_v60 }
 0x601   : > { %4110 = vmatmul.mubr.f32.gmra.mrb[198].mxu0 %v15888_v62 }
 0x602   : > { %4763 = vmatmul.mubr.f32.gmra.mrb[198].mxu1 %v15888_v62  ;;  %4115 = vmatprep.mubr.f32.mxu0 %v15648_v60  ;;  %v15913_v62 = vld [vmem:[#allocation258_spill] sm:$0xff] }
 0x603   : > { %4768 = vmatprep.mubr.f32.mxu1 %v15648_v60 }
 0x609   : > { %4116 = vmatmul.mubr.f32.gmra.mrb[198].mxu0 %v15889_v48 }
 0x60a   : > { %4769 = vmatmul.mubr.f32.gmra.mrb[198].mxu1 %v15889_v48  ;;  %4121 = vmatprep.mubr.f32.mxu0 %v15648_v60  ;;  %v15914_v48 = vld [vmem:[#allocation261_spill] sm:$0xff] }
 0x60b   : > { %4774 = vmatprep.mubr.f32.mxu1 %v15648_v60 }
 0x611   : > { %4122 = vmatmul.mubr.f32.gmra.mrb[198].mxu0 %v15890_v12 }
 0x612   : > { %4775 = vmatmul.mubr.f32.gmra.mrb[198].mxu1 %v15890_v12  ;;  %4127 = vmatprep.mubr.f32.mxu0 %v15648_v60  ;;  %v15915_v12 = vld [vmem:[#allocation264_spill] sm:$0xff] }
 0x613   : > { %4780 = vmatprep.mubr.f32.mxu1 %v15648_v60 }
 0x619   : > { %4128 = vmatmul.mubr.f32.gmra.mrb[198].mxu0 %v15891_v13 }
 0x61a   : > { %4781 = vmatmul.mubr.f32.gmra.mrb[198].mxu1 %v15891_v13  ;;  %4133 = vmatprep.mubr.f32.mxu0 %v15648_v60  ;;  %v15916_v13 = vld [vmem:[#allocation267_spill] sm:$0xff] }
 0x61b   : > { %4786 = vmatprep.mubr.f32.mxu1 %v15648_v60 }
 0x621   : > { %4134 = vmatmul.mubr.f32.gmra.mrb[198].mxu0 %v15892_v19 }
 0x622   : > { %4787 = vmatmul.mubr.f32.gmra.mrb[198].mxu1 %v15892_v19  ;;  %4139 = vmatprep.mubr.f32.mxu0 %v15648_v60  ;;  %v15917_v19 = vld [vmem:[#allocation270_spill] sm:$0xff] }
 0x623   : > { %4792 = vmatprep.mubr.f32.mxu1 %v15648_v60 }
 0x629   : > { %4140 = vmatmul.mubr.f32.gmra.mrb[198].mxu0 %v15893_v44 }
 0x62a   : > { %4793 = vmatmul.mubr.f32.gmra.mrb[198].mxu1 %v15893_v44  ;;  %4145 = vmatprep.mubr.f32.mxu0 %v15648_v60  ;;  %v15918_v44 = vld [vmem:[#allocation273_spill] sm:$0xff] }
 0x62b   : > { %4798 = vmatprep.mubr.f32.mxu1 %v15648_v60 }
 0x631   : > { %4146 = vmatmul.mubr.f32.gmra.mrb[198].mxu0 %v15894_v16 }
 0x632   : > { %4799 = vmatmul.mubr.f32.gmra.mrb[198].mxu1 %v15894_v16  ;;  %4151 = vmatprep.mubr.f32.mxu0 %v15648_v60  ;;  %v15919_v16 = vld [vmem:[#allocation276_spill] sm:$0xff] }
 0x633   : > { %4804 = vmatprep.mubr.f32.mxu1 %v15648_v60 }
 0x639   : > { %4152 = vmatmul.mubr.f32.gmra.mrb[198].mxu0 %v15895_v32 }
 0x63a   : > { %4805 = vmatmul.mubr.f32.gmra.mrb[198].mxu1 %v15895_v32  ;;  %4157 = vmatprep.mubr.f32.mxu0 %v15648_v60  ;;  %v15920_v32 = vld [vmem:[#allocation279_spill] sm:$0xff] }
 0x63b   : > { %4810 = vmatprep.mubr.f32.mxu1 %v15648_v60 }
 0x641   : > { %4158 = vmatmul.mubr.f32.gmra.mrb[198].mxu0 %v15896_v50 }
 0x642   : > { %4811 = vmatmul.mubr.f32.gmra.mrb[198].mxu1 %v15896_v50  ;;  %4163 = vmatprep.mubr.f32.mxu0 %v15648_v60  ;;  %v15921_v50 = vld [vmem:[#allocation282_spill] sm:$0xff] }
 0x643   : > { %4816 = vmatprep.mubr.f32.mxu1 %v15648_v60 }
 0x649   : > { %4164 = vmatmul.mubr.f32.gmra.mrb[198].mxu0 %v15897_v18 }
 0x64a   : > { %4817 = vmatmul.mubr.f32.gmra.mrb[198].mxu1 %v15897_v18  ;;  %4169 = vmatprep.mubr.f32.mxu0 %v15648_v60  ;;  %v15922_v18 = vld [vmem:[#allocation285_spill] sm:$0xff] }
 0x64b   : > { %4822 = vmatprep.mubr.f32.mxu1 %v15648_v60 }
 0x651   : > { %4170 = vmatmul.mubr.f32.gmra.mrb[198].mxu0 %v15898_v54 }
 0x652   : > { %4823 = vmatmul.mubr.f32.gmra.mrb[198].mxu1 %v15898_v54  ;;  %4175 = vmatprep.mubr.f32.mxu0 %v15648_v60  ;;  %v15923_v54 = vld [vmem:[#allocation288_spill] sm:$0xff] }
 0x653   : > { %4828 = vmatprep.mubr.f32.mxu1 %v15648_v60 }
 0x659   : > { %4176 = vmatmul.mubr.f32.gmra.mrb[198].mxu0 %v15899_v22 }
 0x65a   : > { %4829 = vmatmul.mubr.f32.gmra.mrb[198].mxu1 %v15899_v22  ;;  %4181 = vmatprep.mubr.f32.mxu0 %v15648_v60  ;;  %v15924_v22 = vld [vmem:[#allocation291_spill] sm:$0xff] }
 0x65b   : > { %4834 = vmatprep.mubr.f32.mxu1 %v15648_v60 }
 0x661   : > { %4182 = vmatmul.mubr.f32.gmra.mrb[198].mxu0 %v15900_v10 }
 0x662   : > { %4835 = vmatmul.mubr.f32.gmra.mrb[198].mxu1 %v15900_v10  ;;  %4187 = vmatprep.mubr.f32.mxu0 %v15648_v60  ;;  %v15925_v10 = vld [vmem:[#allocation294_spill] sm:$0xff] }
 0x663   : > { %4840 = vmatprep.mubr.f32.mxu1 %v15648_v60 }
 0x669   : > { %4188 = vmatmul.mubr.f32.gmra.mrb[198].mxu0 %v15901_v40 }
 0x66a   : > { %4841 = vmatmul.mubr.f32.gmra.mrb[198].mxu1 %v15901_v40  ;;  %4193 = vmatprep.mubr.f32.mxu0 %v15648_v60  ;;  %v15926_v40 = vld [vmem:[#allocation297_spill] sm:$0xff] }
 0x66b   : > { %4846 = vmatprep.mubr.f32.mxu1 %v15648_v60 }
 0x671   : > { %4194 = vmatmul.mubr.f32.gmra.mrb[198].mxu0 %v15902_v47 }
 0x672   : > { %4847 = vmatmul.mubr.f32.gmra.mrb[198].mxu1 %v15902_v47  ;;  %4199 = vmatprep.mubr.f32.mxu0 %v15648_v60  ;;  %v15927_v47 = vld [vmem:[#allocation300_spill] sm:$0xff] }
 0x673   : > { %4852 = vmatprep.mubr.f32.mxu1 %v15648_v60 }
 0x679   : > { %4200 = vmatmul.mubr.f32.gmra.mrb[198].mxu0 %v15903_v55 }
 0x67a   : > { %4853 = vmatmul.mubr.f32.gmra.mrb[198].mxu1 %v15903_v55  ;;  %4205 = vmatprep.mubr.f32.mxu0 %v15648_v60  ;;  %v15928_v55 = vld [vmem:[#allocation303_spill] sm:$0xff] }
 0x67b   : > { %4858 = vmatprep.mubr.f32.mxu1 %v15648_v60 }
 0x681   : > { %4206 = vmatmul.mubr.f32.gmra.mrb[198].mxu0 %v15904_v8 }
 0x682   : > { %4859 = vmatmul.mubr.f32.gmra.mrb[198].mxu1 %v15904_v8  ;;  %4211 = vmatprep.mubr.f32.mxu0 %v15648_v60  ;;  %v15929_v8 = vld [vmem:[#allocation306_spill] sm:$0xff] }
 0x683   : > { %4864 = vmatprep.mubr.f32.mxu1 %v15648_v60 }
 0x689   : > { %4212 = vmatmul.mubr.f32.gmra.mrb[198].mxu0 %v15905_v23 }
 0x68a   : > { %4865 = vmatmul.mubr.f32.gmra.mrb[198].mxu1 %v15905_v23  ;;  %4217 = vmatprep.mubr.f32.mxu0 %v15648_v60  ;;  %v15930_v23 = vld [vmem:[#allocation309_spill] sm:$0xff] }
 0x68b   : > { %4870 = vmatprep.mubr.f32.mxu1 %v15648_v60 }
 0x691   : > { %4218 = vmatmul.mubr.f32.gmra.mrb[198].mxu0 %v15906_v7 }
 0x692   : > { %4871 = vmatmul.mubr.f32.gmra.mrb[198].mxu1 %v15906_v7  ;;  %4223 = vmatprep.mubr.f32.mxu0 %v15648_v60  ;;  %v15931_v7 = vld [vmem:[#allocation312_spill] sm:$0xff] }
 0x693   : > { %4876 = vmatprep.mubr.f32.mxu1 %v15648_v60 }
 0x699   : > { %4224 = vmatmul.mubr.f32.gmra.mrb[198].mxu0 %v15907_v45 }
 0x69a   : > { %4877 = vmatmul.mubr.f32.gmra.mrb[198].mxu1 %v15907_v45  ;;  %4229 = vmatprep.mubr.f32.mxu0 %v15648_v60  ;;  %v15932_v45 = vld [vmem:[#allocation315_spill] sm:$0xff] }
 0x69b   : > { %4882 = vmatprep.mubr.f32.mxu1 %v15648_v60 }
 0x6a1   : > { %4230 = vmatmul.mubr.f32.gmra.mrb[198].mxu0 %v15908_v52 }
 0x6a2   : > { %4883 = vmatmul.mubr.f32.gmra.mrb[198].mxu1 %v15908_v52  ;;  %4235 = vmatprep.mubr.f32.mxu0 %v15648_v60  ;;  %v15933_v52 = vld [vmem:[#allocation318_spill] sm:$0xff] }
 0x6a3   : > { %4888 = vmatprep.mubr.f32.mxu1 %v15648_v60 }
 0x6a9   : > { %4236 = vmatmul.mubr.f32.gmra.mrb[198].mxu0 %v15909_v3 }
 0x6aa   : > { %4889 = vmatmul.mubr.f32.gmra.mrb[198].mxu1 %v15909_v3  ;;  %4241 = vmatprep.mubr.f32.mxu0 %v15648_v60  ;;  %v15934_v3 = vld [vmem:[#allocation321_spill] sm:$0xff] }
 0x6ab   : > { %4894 = vmatprep.mubr.f32.mxu1 %v15648_v60 }
 0x6b1   : > { %4242 = vmatmul.mubr.f32.gmra.mrb[198].mxu0 %v15910_v24 }
 0x6b2   : > { %4895 = vmatmul.mubr.f32.gmra.mrb[198].mxu1 %v15910_v24  ;;  %4247 = vmatprep.mubr.f32.mxu0 %v15648_v60  ;;  %v15935_v24 = vld [vmem:[#allocation324_spill] sm:$0xff] }
 0x6b3   : > { %4900 = vmatprep.mubr.f32.mxu1 %v15648_v60 }
 0x6b9   : > { %4248 = vmatmul.mubr.f32.gmra.mrb[198].mxu0 %v15911_v56 }
 0x6ba   : > { %4901 = vmatmul.mubr.f32.gmra.mrb[198].mxu1 %v15911_v56  ;;  %4253 = vmatprep.mubr.f32.mxu0 %v15648_v60  ;;  %v15936_v56 = vld [vmem:[#allocation327_spill] sm:$0xff] }
 0x6bb   : > { %4906 = vmatprep.mubr.f32.mxu1 %v15648_v60 }
 0x6c1   : > { %4254 = vmatmul.mubr.f32.gmra.mrb[198].mxu0 %v15912_v41 }
 0x6c2   : > { %4907 = vmatmul.mubr.f32.gmra.mrb[198].mxu1 %v15912_v41  ;;  %4259 = vmatprep.mubr.f32.mxu0 %v15648_v60  ;;  %v15937_v41 = vld [vmem:[#allocation330_spill] sm:$0xff] }
 0x6c3   : > { %4912 = vmatprep.mubr.f32.mxu1 %v15648_v60 }
 0x6c9   : > { %4260 = vmatmul.mubr.f32.gmra.mrb[198].mxu0 %v15913_v62 }
 0x6ca   : > { %4913 = vmatmul.mubr.f32.gmra.mrb[198].mxu1 %v15913_v62  ;;  %4265 = vmatprep.mubr.f32.mxu0 %v15648_v60  ;;  %v15938_v62 = vld [vmem:[#allocation332_spill] sm:$0xff] }
 0x6cb   : > { %4918 = vmatprep.mubr.f32.mxu1 %v15648_v60 }
 0x6d1   : > { %4266 = vmatmul.mubr.f32.gmra.mrb[198].mxu0 %v15914_v48 }
 0x6d2   : > { %4919 = vmatmul.mubr.f32.gmra.mrb[198].mxu1 %v15914_v48  ;;  %4271 = vmatprep.mubr.f32.mxu0 %v15648_v60  ;;  %v15939_v48 = vld [vmem:[#allocation335_spill] sm:$0xff] }
 0x6d3   : > { %4924 = vmatprep.mubr.f32.mxu1 %v15648_v60 }
 0x6d9   : > { %4272 = vmatmul.mubr.f32.gmra.mrb[198].mxu0 %v15915_v12 }
 0x6da   : > { %4925 = vmatmul.mubr.f32.gmra.mrb[198].mxu1 %v15915_v12  ;;  %4277 = vmatprep.mubr.f32.mxu0 %v15648_v60  ;;  %v15940_v12 = vld [vmem:[#allocation337_spill] sm:$0xff] }
 0x6db   : > { %4930 = vmatprep.mubr.f32.mxu1 %v15648_v60 }
 0x6e1   : > { %4278 = vmatmul.mubr.f32.gmra.mrb[198].mxu0 %v15916_v13 }
 0x6e2   : > { %4931 = vmatmul.mubr.f32.gmra.mrb[198].mxu1 %v15916_v13  ;;  %4283 = vmatprep.mubr.f32.mxu0 %v15648_v60  ;;  %v15941_v13 = vld [vmem:[#allocation340_spill] sm:$0xff] }
 0x6e3   : > { %4936 = vmatprep.mubr.f32.mxu1 %v15648_v60 }
 0x6e9   : > { %4284 = vmatmul.mubr.f32.gmra.mrb[198].mxu0 %v15917_v19 }
 0x6ea   : > { %4937 = vmatmul.mubr.f32.gmra.mrb[198].mxu1 %v15917_v19  ;;  %4289 = vmatprep.mubr.f32.mxu0 %v15648_v60  ;;  %v15942_v19 = vld [vmem:[#allocation31_spill] sm:$0xff] }
 0x6eb   : > { %4942 = vmatprep.mubr.f32.mxu1 %v15648_v60 }
 0x6f1   : > { %4290 = vmatmul.mubr.f32.gmra.mrb[198].mxu0 %v15918_v44 }
 0x6f2   : > { %4943 = vmatmul.mubr.f32.gmra.mrb[198].mxu1 %v15918_v44  ;;  %4295 = vmatprep.mubr.f32.mxu0 %v15648_v60 }
 0x6f3   : > { %4948 = vmatprep.mubr.f32.mxu1 %v15648_v60 }
 0x6f9   : > { %4296 = vmatmul.mubr.f32.gmra.mrb[198].mxu0 %v15919_v16 }
 0x6fa   : > { %4949 = vmatmul.mubr.f32.gmra.mrb[198].mxu1 %v15919_v16  ;;  %4301 = vmatprep.mubr.f32.mxu0 %v15648_v60 }
 0x6fb   : > { %4954 = vmatprep.mubr.f32.mxu1 %v15648_v60 }
 0x701   : > { %4302 = vmatmul.mubr.f32.gmra.mrb[198].mxu0 %v15920_v32 }
 0x702   : > { %4955 = vmatmul.mubr.f32.gmra.mrb[198].mxu1 %v15920_v32  ;;  %4307 = vmatprep.mubr.f32.mxu0 %v15648_v60 }
 0x703   : > { %4960 = vmatprep.mubr.f32.mxu1 %v15648_v60 }
 0x709   : > { %4308 = vmatmul.mubr.f32.gmra.mrb[198].mxu0 %v15921_v50 }
 0x70a   : > { %4961 = vmatmul.mubr.f32.gmra.mrb[198].mxu1 %v15921_v50  ;;  %4313 = vmatprep.mubr.f32.mxu0 %v15648_v60 }
 0x70b   : > { %4966 = vmatprep.mubr.f32.mxu1 %v15648_v60 }
 0x711   : > { %4314 = vmatmul.mubr.f32.gmra.mrb[198].mxu0 %v15922_v18 }
 0x712   : > { %4967 = vmatmul.mubr.f32.gmra.mrb[198].mxu1 %v15922_v18  ;;  %4319 = vmatprep.mubr.f32.mxu0 %v15648_v60 }
 0x713   : > { %4972 = vmatprep.mubr.f32.mxu1 %v15648_v60 }
 0x719   : > { %4320 = vmatmul.mubr.f32.gmra.mrb[198].mxu0 %v15923_v54 }
 0x71a   : > { %4973 = vmatmul.mubr.f32.gmra.mrb[198].mxu1 %v15923_v54  ;;  %4325 = vmatprep.mubr.f32.mxu0 %v15648_v60 }
 0x71b   : > { %4978 = vmatprep.mubr.f32.mxu1 %v15648_v60 }
 0x721   : > { %4326 = vmatmul.mubr.f32.gmra.mrb[198].mxu0 %v15924_v22 }
 0x722   : > { %4979 = vmatmul.mubr.f32.gmra.mrb[198].mxu1 %v15924_v22  ;;  %4331 = vmatprep.mubr.f32.mxu0 %v15648_v60 }
 0x723   : > { %4984 = vmatprep.mubr.f32.mxu1 %v15648_v60 }
 0x729   : > { %4332 = vmatmul.mubr.f32.gmra.mrb[198].mxu0 %v15925_v10 }
 0x72a   : > { %4985 = vmatmul.mubr.f32.gmra.mrb[198].mxu1 %v15925_v10  ;;  %4337 = vmatprep.mubr.f32.mxu0 %v15648_v60 }
 0x72b   : > { %4990 = vmatprep.mubr.f32.mxu1 %v15648_v60 }
 0x731   : > { %4338 = vmatmul.mubr.f32.gmra.mrb[198].mxu0 %v15926_v40 }
 0x732   : > { %4991 = vmatmul.mubr.f32.gmra.mrb[198].mxu1 %v15926_v40  ;;  %4343 = vmatprep.mubr.f32.mxu0 %v15648_v60 }
 0x733   : > { %4996 = vmatprep.mubr.f32.mxu1 %v15648_v60 }
 0x739   : > { %4344 = vmatmul.mubr.f32.gmra.mrb[198].mxu0 %v15927_v47 }
 0x73a   : > { %4997 = vmatmul.mubr.f32.gmra.mrb[198].mxu1 %v15927_v47  ;;  %4349 = vmatprep.mubr.f32.mxu0 %v15648_v60 }
 0x73b   : > { %5002 = vmatprep.mubr.f32.mxu1 %v15648_v60 }
 0x741   : > { %4350 = vmatmul.mubr.f32.gmra.mrb[198].mxu0 %v15928_v55 }
 0x742   : > { %5003 = vmatmul.mubr.f32.gmra.mrb[198].mxu1 %v15928_v55  ;;  %4355 = vmatprep.mubr.f32.mxu0 %v15648_v60 }
 0x743   : > { %5008 = vmatprep.mubr.f32.mxu1 %v15648_v60 }
 0x749   : > { %4356 = vmatmul.mubr.f32.gmra.mrb[198].mxu0 %v15929_v8 }
 0x74a   : > { %5009 = vmatmul.mubr.f32.gmra.mrb[198].mxu1 %v15929_v8  ;;  %4361 = vmatprep.mubr.f32.mxu0 %v15648_v60  ;;  %v15968_v8 = vld [vmem:[#allocation117_spill] sm:$0xff] }
 0x74b   : > { %5014 = vmatprep.mubr.f32.mxu1 %v15648_v60 }
 0x751   : > { %4362 = vmatmul.mubr.f32.gmra.mrb[198].mxu0 %v15930_v23 }
 0x752   : > { %5015 = vmatmul.mubr.f32.gmra.mrb[198].mxu1 %v15930_v23  ;;  %4367 = vmatprep.mubr.f32.mxu0 %v15648_v60 }
 0x753   : > { %5020 = vmatprep.mubr.f32.mxu1 %v15648_v60 }
 0x759   : > { %4368 = vmatmul.mubr.f32.gmra.mrb[198].mxu0 %v15931_v7 }
 0x75a   : > { %5021 = vmatmul.mubr.f32.gmra.mrb[198].mxu1 %v15931_v7  ;;  %4373 = vmatprep.mubr.f32.mxu0 %v15648_v60 }
 0x75b   : > { %5026 = vmatprep.mubr.f32.mxu1 %v15648_v60 }
 0x761   : > { %4374 = vmatmul.mubr.f32.gmra.mrb[198].mxu0 %v15932_v45 }
 0x762   : > { %5027 = vmatmul.mubr.f32.gmra.mrb[198].mxu1 %v15932_v45  ;;  %4379 = vmatprep.mubr.f32.mxu0 %v15648_v60 }
 0x763   : > { %5032 = vmatprep.mubr.f32.mxu1 %v15648_v60 }
 0x769   : > { %4380 = vmatmul.mubr.f32.gmra.mrb[198].mxu0 %v15933_v52 }
 0x76a   : > { %5033 = vmatmul.mubr.f32.gmra.mrb[198].mxu1 %v15933_v52  ;;  %4385 = vmatprep.mubr.f32.mxu0 %v15648_v60 }
 0x76b   : > { %5038 = vmatprep.mubr.f32.mxu1 %v15648_v60 }
 0x771   : > { %4386 = vmatmul.mubr.f32.gmra.mrb[198].mxu0 %v15934_v3 }
 0x772   : > { %5039 = vmatmul.mubr.f32.gmra.mrb[198].mxu1 %v15934_v3  ;;  %4391 = vmatprep.mubr.f32.mxu0 %v15648_v60 }
 0x773   : > { %5044 = vmatprep.mubr.f32.mxu1 %v15648_v60 }
 0x779   : > { %4392 = vmatmul.mubr.f32.gmra.mrb[198].mxu0 %v15935_v24 }
 0x77a   : > { %5045 = vmatmul.mubr.f32.gmra.mrb[198].mxu1 %v15935_v24  ;;  %4397 = vmatprep.mubr.f32.mxu0 %v15648_v60 }
 0x77b   : > { %5050 = vmatprep.mubr.f32.mxu1 %v15648_v60 }
 0x781   : > { %4398 = vmatmul.mubr.f32.gmra.mrb[198].mxu0 %v15936_v56 }
 0x782   : > { %5051 = vmatmul.mubr.f32.gmra.mrb[198].mxu1 %v15936_v56  ;;  %4403 = vmatprep.mubr.f32.mxu0 %v15648_v60 }
 0x783   : > { %5056 = vmatprep.mubr.f32.mxu1 %v15648_v60 }
 0x789   : > { %4404 = vmatmul.mubr.f32.gmra.mrb[198].mxu0 %v15937_v41 }
 0x78a   : > { %5057 = vmatmul.mubr.f32.gmra.mrb[198].mxu1 %v15937_v41  ;;  %4409 = vmatprep.mubr.f32.mxu0 %v15648_v60 }
 0x78b   : > { %5062 = vmatprep.mubr.f32.mxu1 %v15648_v60 }
 0x791   : > { %4410 = vmatmul.mubr.f32.gmra.mrb[198].mxu0 %v15938_v62 }
 0x792   : > { %5063 = vmatmul.mubr.f32.gmra.mrb[198].mxu1 %v15938_v62  ;;  %4415 = vmatprep.mubr.f32.mxu0 %v15648_v60 }
 0x793   : > { %5068 = vmatprep.mubr.f32.mxu1 %v15648_v60 }
 0x799   : > { %4416 = vmatmul.mubr.f32.gmra.mrb[198].mxu0 %v15939_v48 }
 0x79a   : > { %5069 = vmatmul.mubr.f32.gmra.mrb[198].mxu1 %v15939_v48  ;;  %4421 = vmatprep.mubr.f32.mxu0 %v15648_v60 }
 0x79b   : > { %5074 = vmatprep.mubr.f32.mxu1 %v15648_v60 }
 0x7a1   : > { %4422 = vmatmul.mubr.f32.gmra.mrb[198].mxu0 %v15940_v12 }
 0x7a2   : > { %5075 = vmatmul.mubr.f32.gmra.mrb[198].mxu1 %v15940_v12  ;;  %4427 = vmatprep.mubr.f32.mxu0 %v15648_v60 }
 0x7a3   : > { %5080 = vmatprep.mubr.f32.mxu1 %v15648_v60 }
 0x7a9   : > { %4428 = vmatmul.mubr.f32.gmra.mrb[198].mxu0 %v15941_v13 }
 0x7aa   : > { %5081 = vmatmul.mubr.f32.gmra.mrb[198].mxu1 %v15941_v13  ;;  %4433 = vmatprep.mubr.f32.mxu0 %v15648_v60 }
 0x7ab   : > { %5086 = vmatprep.mubr.f32.mxu1 %v15648_v60 }
 0x7b1   : > { %4434 = vmatmul.mubr.f32.gmra.mrb[198].mxu0 %v13254_v39 }
 0x7b2   : > { %5087 = vmatmul.mubr.f32.gmra.mrb[198].mxu1 %v13254_v39  ;;  %4439 = vmatprep.mubr.f32.mxu0 %v15648_v60  ;;  %v15946_v39 = vld [vmem:[#allocation47_spill] sm:$0xff] }
 0x7b3   : > { %5092 = vmatprep.mubr.f32.mxu1 %v15648_v60 }
 0x7b9   : > { %4440 = vmatmul.mubr.f32.gmra.mrb[198].mxu0 %v13262_v31 }
 0x7ba   : > { %5093 = vmatmul.mubr.f32.gmra.mrb[198].mxu1 %v13262_v31  ;;  %5579 = vmatprep.mubr.f32.mxu0 %v15648_v60  ;;  %v15943_v31 = vld [vmem:[#allocation35_spill] sm:$0xff] }
 0x7bb   : > { %6232 = vmatprep.mubr.f32.mxu1 %v15648_v60 }
 0x7bd   : > { %5580 = vmatmul.mubr.f32.vlgmr.msra.gmra.mrb[200].mxu0 %v15942_v19 }
 0x7be   : > { %6233 = vmatmul.mubr.f32.vlgmr.msra.gmra.mrb[200].mxu1 %v15942_v19  ;;  %9657 = vmatpush1.bf16.msra.mxu0 %v11593_v25  ;;  %v15944_v25 = vld [vmem:[#allocation41_spill] sm:$0xff] }
 0x7bf   : > { %9689 = vmatpush1.bf16.msra.mxu1 %v11595_v26  ;;  %5585 = vmatprep.mubr.f32.mxu0 %v15648_v60  ;;  %v15945_v26 = vld [vmem:[#allocation44_spill] sm:$0xff] }
 0x7c0   : > { %6238 = vmatprep.mubr.f32.mxu1 %v15648_v60  ;;  %9659 = vmatprep.subr.bf16.mxu0 %v15817_v17  ;;  %v15947_v17 = vld [vmem:[#allocation50_spill] sm:$0xff] }
 0x7c1   : > { %9691 = vmatprep.subr.bf16.mxu1 %v15818_v21  ;;  %v15948_v21 = vld [vmem:[#allocation53_spill] sm:$0xff] }
 0x7c2   : > { %9661 = vmatpush1.bf16.msra.mxu0 %v15819_v46  ;;  %v15949_v46 = vld [vmem:[#allocation56_spill] sm:$0xff] }
 0x7c3   : > { %9693 = vmatpush1.bf16.msra.mxu1 %v15820_v49  ;;  %9663 = vmatprep.subr.bf16.mxu0 %v15821_v53  ;;  %v15950_v49 = vld [vmem:[#allocation59_spill] sm:$0xff]  ;;  %v15951_v53 = vld [vmem:[#allocation62_spill] sm:$0xff] }
 0x7c4   : > { %9695 = vmatprep.subr.bf16.mxu1 %v15822_v58  ;;  %v15952_v58 = vld [vmem:[#allocation65_spill] sm:$0xff] }
 0x7c5   : > { %5586 = vmatmul.mubr.f32.gmra.mrb[200].mxu0 %v15943_v31 }
 0x7c6   : > { %6239 = vmatmul.mubr.f32.gmra.mrb[200].mxu1 %v15943_v31  ;;  %5591 = vmatprep.mubr.f32.mxu0 %v15648_v60 }
 0x7c7   : > { %6244 = vmatprep.mubr.f32.mxu1 %v15648_v60  ;;  %9665 = vmatpush1.bf16.msra.mxu0 %v15824_v2  ;;  %v15953_v2 = vld [vmem:[#allocation68_spill] sm:$0xff] }
 0x7c8   : > { %9697 = vmatpush1.bf16.msra.mxu1 %v15825_v4  ;;  %9667 = vmatprep.subr.bf16.mxu0 %v15826_v20  ;;  %v15954_v4 = vld [vmem:[#allocation71_spill] sm:$0xff]  ;;  %v15955_v20 = vld [vmem:[#allocation74_spill] sm:$0xff] }
 0x7c9   : > { %9699 = vmatprep.subr.bf16.mxu1 %v15827_v28  ;;  %v15956_v28 = vld [vmem:[#allocation77_spill] sm:$0xff] }
 0x7cb   : > { %9669 = vmatpush1.bf16.msra.mxu0 %v15828_v33  ;;  %v15957_v33 = vld [vmem:[#allocation80_spill] sm:$0xff] }
 0x7cc   : > { %9701 = vmatpush1.bf16.msra.mxu1 %v15829_v35  ;;  %9671 = vmatprep.subr.bf16.mxu0 %v15830_v57  ;;  %v15958_v35 = vld [vmem:[#allocation83_spill] sm:$0xff]  ;;  %v15959_v57 = vld [vmem:[#allocation86_spill] sm:$0xff] }
 0x7cd   : > { %9703 = vmatprep.subr.bf16.mxu1 %v15831_v63  ;;  %5592 = vmatmul.mubr.f32.gmra.mrb[200].mxu0 %v15944_v25  ;;  %v15960_v63 = vld [vmem:[#allocation89_spill] sm:$0xff] }
 0x7ce   : > { %6245 = vmatmul.mubr.f32.gmra.mrb[200].mxu1 %v15944_v25  ;;  %5597 = vmatprep.mubr.f32.mxu0 %v15648_v60 }
 0x7cf   : > { %6250 = vmatprep.mubr.f32.mxu1 %v15648_v60  ;;  %9673 = vmatpush1.bf16.msra.mxu0 %v15833_v5  ;;  %v15961_v5 = vld [vmem:[#allocation92_spill] sm:$0xff] }
 0x7d0   : > { %9705 = vmatpush1.bf16.msra.mxu1 %v15834_v27  ;;  %9675 = vmatprep.subr.bf16.mxu0 %v15835_v30  ;;  %v15962_v27 = vld [vmem:[#allocation95_spill] sm:$0xff]  ;;  %v15963_v30 = vld [vmem:[#allocation98_spill] sm:$0xff] }
 0x7d1   : > { %9707 = vmatprep.subr.bf16.mxu1 %v15836_v38  ;;  %v15964_v38 = vld [vmem:[#allocation101_spill] sm:$0xff] }
 0x7d3   : > { %9677 = vmatpush1.bf16.msra.mxu0 %v15837_v43  ;;  %v15965_v43 = vld [vmem:[#allocation105_spill] sm:$0xff] }
 0x7d4   : > { %9709 = vmatpush1.bf16.msra.mxu1 %v15838_v1  ;;  %9679 = vmatprep.subr.bf16.mxu0 %v15839_v9  ;;  %v15966_v1 = vld [vmem:[#allocation109_spill] sm:$0xff]  ;;  %v3474_v9 = vrot.slane %v13690_v34, 4 }
 0x7d5   : > { %9711 = vmatprep.subr.bf16.mxu1 %v15840_v15  ;;  %5598 = vmatmul.mubr.f32.gmra.mrb[200].mxu0 %v15945_v26  ;;  %v3680_v15 = vrot.slane %v13692_v11, 4 }
 0x7d6   : > { %6251 = vmatmul.mubr.f32.gmra.mrb[200].mxu1 %v15945_v26  ;;  %5603 = vmatprep.mubr.f32.mxu0 %v15648_v60 }
 0x7d7   : > { %6256 = vmatprep.mubr.f32.mxu1 %v15648_v60  ;;  %9681 = vmatpush1.bf16.msra.mxu0 %v15842_v29  ;;  %v3577_v29 = vrot.slane %v13694_v61, 4 }
 0x7d8   : > { %9713 = vmatpush1.bf16.msra.mxu1 %v15843_v36  ;;  %9683 = vmatprep.subr.bf16.mxu0 %v15844_v42  ;;  %v3783_v36 = vrot.slane %v13696_v0, 4  ;;  %v15967_v42 = vld [vmem:[#allocation113_spill] sm:$0xff] }
 0x7d9   : > { %9715 = vmatprep.subr.bf16.mxu1 %v15845_v51  ;;  %v3475_v51 = vadd.f32 %v3474_v9, %v13690_v34  ;;  %v15972_v9 = vld [vmem:[#allocation133_spill] sm:$0xff] }
 0x7da   : > { %v3784_v44 = vadd.f32 %v3783_v36, %v13696_v0  ;;  %v15975_v36 = vld [vmem:[#allocation145_spill] sm:$0xff] }
 0x7db   : > { %9685 = vmatpush1.bf16.msra.mxu0 %v15846_v59  ;;  %v3681_v59 = vadd.f32 %v3680_v15, %v13692_v11  ;;  %v3476_v16 = vrot.slane %v3475_v51, 2  ;;  %v15973_v15 = vld [vmem:[#allocation137_spill] sm:$0xff] }
 0x7dc   : > { %9717 = vmatpush1.bf16.msra.mxu1 %v15847_v14  ;;  %v3578_v14 = vadd.f32 %v3577_v29, %v13694_v61  ;;  %v3785_v18 = vrot.slane %v3784_v44, 2  ;;  %v15974_v29 = vld [vmem:[#allocation141_spill] sm:$0xff] }
 0x7dd   : > { %5604 = vmatmul.mubr.f32.gmra.mrb[200].mxu0 %v15946_v39  ;;  %v3682_v32 = vrot.slane %v3681_v59, 2  ;;  %v3477_v61 = vadd.f32 %v3476_v16, %v3475_v51  ;;  %v15977_v51 = vld [vmem:[#allocation153_spill] sm:$0xff] }
 0x7de   : > { %6257 = vmatmul.mubr.f32.gmra.mrb[200].mxu1 %v15946_v39  ;;  %5609 = vmatprep.mubr.f32.mxu0 %v15648_v60  ;;  %v3579_v50 = vrot.slane %v3578_v14, 2  ;;  %v3786_v52 = vadd.f32 %v3785_v18, %v3784_v44  ;;  %v15980_v44 = vld [vmem:[#allocation165_spill] sm:$0xff] }
 0x7df   : > { %6262 = vmatprep.mubr.f32.mxu1 %v15648_v60  ;;  %v3683_v0 = vadd.f32 %v3682_v32, %v3681_v59  ;;  %v3478_v12 = vrot.slane %v3477_v61, 1  ;;  %v15978_v59 = vld [vmem:[#allocation157_spill] sm:$0xff] }
 0x7e0   : > { %v3580_v45 = vadd.f32 %v3579_v50, %v3578_v14  ;;  %v3787_v26 = vrot.slane %v3786_v52, 1  ;;  %v15979_v14 = vld [vmem:[#allocation161_spill] sm:$0xff] }
 0x7e1   : > { %v3684_v13 = vrot.slane %v3683_v0, 1  ;;  %v15981_v16 = vld [vmem:[#allocation169_spill] sm:$0xff] }
 0x7e2   : > { %v3581_v25 = vrot.slane %v3580_v45, 1  ;;  %v15982_v32 = vld [vmem:[#allocation173_spill] sm:$0xff] }
 0x7e3   : > { %v15983_v50 = vld [vmem:[#allocation177_spill] sm:$0xff] }
 0x7e4   : > { %v15984_v18 = vld [vmem:[#allocation181_spill] sm:$0xff] }
 0x7e5   : > { %5610 = vmatmul.mubr.f32.gmra.mrb[200].mxu0 %v15947_v17 }
 0x7e6   : > { %6263 = vmatmul.mubr.f32.gmra.mrb[200].mxu1 %v15947_v17  ;;  %5615 = vmatprep.mubr.f32.mxu0 %v15648_v60 }
 0x7e7   : > { %6268 = vmatprep.mubr.f32.mxu1 %v15648_v60 }
 0x7ed   : > { %5616 = vmatmul.mubr.f32.gmra.mrb[200].mxu0 %v15948_v21 }
 0x7ee   : > { %6269 = vmatmul.mubr.f32.gmra.mrb[200].mxu1 %v15948_v21  ;;  %5621 = vmatprep.mubr.f32.mxu0 %v15648_v60 }
 0x7ef   : > { %6274 = vmatprep.mubr.f32.mxu1 %v15648_v60 }
 0x7f5   : > { %5622 = vmatmul.mubr.f32.gmra.mrb[200].mxu0 %v15949_v46 }
 0x7f6   : > { %6275 = vmatmul.mubr.f32.gmra.mrb[200].mxu1 %v15949_v46  ;;  %5627 = vmatprep.mubr.f32.mxu0 %v15648_v60 }
 0x7f7   : > { %6280 = vmatprep.mubr.f32.mxu1 %v15648_v60 }
 0x7fd   : > { %5628 = vmatmul.mubr.f32.gmra.mrb[200].mxu0 %v15950_v49 }
 0x7fe   : > { %6281 = vmatmul.mubr.f32.gmra.mrb[200].mxu1 %v15950_v49  ;;  %5633 = vmatprep.mubr.f32.mxu0 %v15648_v60  ;;  %v15969_v49 = vld [vmem:[#allocation121_spill] sm:$0xff] }
 0x7ff   : > { %6286 = vmatprep.mubr.f32.mxu1 %v15648_v60 }
 0x805   : > { %5634 = vmatmul.mubr.f32.gmra.mrb[200].mxu0 %v15951_v53 }
 0x806   : > { %6287 = vmatmul.mubr.f32.gmra.mrb[200].mxu1 %v15951_v53  ;;  %5639 = vmatprep.mubr.f32.mxu0 %v15648_v60 }
 0x807   : > { %6292 = vmatprep.mubr.f32.mxu1 %v15648_v60 }
 0x80d   : > { %5640 = vmatmul.mubr.f32.gmra.mrb[200].mxu0 %v15952_v58 }
 0x80e   : > { %6293 = vmatmul.mubr.f32.gmra.mrb[200].mxu1 %v15952_v58  ;;  %5645 = vmatprep.mubr.f32.mxu0 %v15648_v60 }
 0x80f   : > { %6298 = vmatprep.mubr.f32.mxu1 %v15648_v60 }
 0x815   : > { %5646 = vmatmul.mubr.f32.gmra.mrb[200].mxu0 %v15953_v2 }
 0x816   : > { %6299 = vmatmul.mubr.f32.gmra.mrb[200].mxu1 %v15953_v2  ;;  %5651 = vmatprep.mubr.f32.mxu0 %v15648_v60  ;;  %v3479_v2 = vadd.f32 %v3478_v12, %v3477_v61  ;;  %v15994_v61 = vld [vmem:[#allocation212_spill] sm:$0xff] }
 0x817   : > { %6304 = vmatprep.mubr.f32.mxu1 %v15648_v60  ;;  %v16006_v12 = vld [vmem:[#allocation248_spill] sm:$0xff] }
 0x81d   : > { %5652 = vmatmul.mubr.f32.gmra.mrb[200].mxu0 %v15954_v4 }
 0x81e   : > { %6305 = vmatmul.mubr.f32.gmra.mrb[200].mxu1 %v15954_v4  ;;  %5657 = vmatprep.mubr.f32.mxu0 %v15648_v60  ;;  %v3685_v4 = vadd.f32 %v3684_v13, %v3683_v0  ;;  %v15995_v0 = vld [vmem:[#allocation215_spill] sm:$0xff] }
 0x81f   : > { %6310 = vmatprep.mubr.f32.mxu1 %v15648_v60  ;;  %v16007_v13 = vld [vmem:[#allocation251_spill] sm:$0xff] }
 0x825   : > { %5658 = vmatmul.mubr.f32.gmra.mrb[200].mxu0 %v15955_v20 }
 0x826   : > { %6311 = vmatmul.mubr.f32.gmra.mrb[200].mxu1 %v15955_v20  ;;  %5663 = vmatprep.mubr.f32.mxu0 %v15648_v60 }
 0x827   : > { %6316 = vmatprep.mubr.f32.mxu1 %v15648_v60 }
 0x82d   : > { %5664 = vmatmul.mubr.f32.gmra.mrb[200].mxu0 %v15956_v28 }
 0x82e   : > { %6317 = vmatmul.mubr.f32.gmra.mrb[200].mxu1 %v15956_v28  ;;  %5669 = vmatprep.mubr.f32.mxu0 %v15648_v60 }
 0x82f   : > { %6322 = vmatprep.mubr.f32.mxu1 %v15648_v60 }
 0x835   : > { %5670 = vmatmul.mubr.f32.gmra.mrb[200].mxu0 %v15957_v33 }
 0x836   : > { %6323 = vmatmul.mubr.f32.gmra.mrb[200].mxu1 %v15957_v33  ;;  %5675 = vmatprep.mubr.f32.mxu0 %v15648_v60  ;;  %v3582_v33 = vadd.f32 %v3581_v25, %v3580_v45  ;;  %v15998_v45 = vld [vmem:[#allocation224_spill] sm:$0xff] }
 0x837   : > { %6328 = vmatprep.mubr.f32.mxu1 %v15648_v60  ;;  %v16010_v25 = vld [vmem:[#allocation260_spill] sm:$0xff] }
 0x83d   : > { %5676 = vmatmul.mubr.f32.gmra.mrb[200].mxu0 %v15958_v35 }
 0x83e   : > { %6329 = vmatmul.mubr.f32.gmra.mrb[200].mxu1 %v15958_v35  ;;  %5681 = vmatprep.mubr.f32.mxu0 %v15648_v60  ;;  %v3788_v35 = vadd.f32 %v3787_v26, %v3786_v52  ;;  %v15999_v52 = vld [vmem:[#allocation227_spill] sm:$0xff] }
 0x83f   : > { %6334 = vmatprep.mubr.f32.mxu1 %v15648_v60  ;;  %v16011_v26 = vld [vmem:[#allocation263_spill] sm:$0xff] }
 0x845   : > { %5682 = vmatmul.mubr.f32.gmra.mrb[200].mxu0 %v15959_v57 }
 0x846   : > { %6335 = vmatmul.mubr.f32.gmra.mrb[200].mxu1 %v15959_v57  ;;  %5687 = vmatprep.mubr.f32.mxu0 %v15648_v60 }
 0x847   : > { %6340 = vmatprep.mubr.f32.mxu1 %v15648_v60 }
 0x84d   : > { %5688 = vmatmul.mubr.f32.gmra.mrb[200].mxu0 %v15960_v63 }
 0x84e   : > { %6341 = vmatmul.mubr.f32.gmra.mrb[200].mxu1 %v15960_v63  ;;  %5693 = vmatprep.mubr.f32.mxu0 %v15648_v60 }
 0x84f   : > { %6346 = vmatprep.mubr.f32.mxu1 %v15648_v60 }
 0x855   : > { %5694 = vmatmul.mubr.f32.gmra.mrb[200].mxu0 %v15961_v5 }
 0x856   : > { %6347 = vmatmul.mubr.f32.gmra.mrb[200].mxu1 %v15961_v5  ;;  %5699 = vmatprep.mubr.f32.mxu0 %v15648_v60 }
 0x857   : > { %6352 = vmatprep.mubr.f32.mxu1 %v15648_v60 }
 0x85d   : > { %5700 = vmatmul.mubr.f32.gmra.mrb[200].mxu0 %v15962_v27 }
 0x85e   : > { %6353 = vmatmul.mubr.f32.gmra.mrb[200].mxu1 %v15962_v27  ;;  %5705 = vmatprep.mubr.f32.mxu0 %v15648_v60 }
 0x85f   : > { %6358 = vmatprep.mubr.f32.mxu1 %v15648_v60 }
 0x865   : > { %5706 = vmatmul.mubr.f32.gmra.mrb[200].mxu0 %v15963_v30 }
 0x866   : > { %6359 = vmatmul.mubr.f32.gmra.mrb[200].mxu1 %v15963_v30  ;;  %5711 = vmatprep.mubr.f32.mxu0 %v15648_v60 }
 0x867   : > { %6364 = vmatprep.mubr.f32.mxu1 %v15648_v60 }
 0x86d   : > { %5712 = vmatmul.mubr.f32.gmra.mrb[200].mxu0 %v15964_v38 }
 0x86e   : > { %6365 = vmatmul.mubr.f32.gmra.mrb[200].mxu1 %v15964_v38  ;;  %5717 = vmatprep.mubr.f32.mxu0 %v15648_v60 }
 0x86f   : > { %6370 = vmatprep.mubr.f32.mxu1 %v15648_v60 }
 0x875   : > { %5718 = vmatmul.mubr.f32.gmra.mrb[200].mxu0 %v15965_v43 }
 0x876   : > { %6371 = vmatmul.mubr.f32.gmra.mrb[200].mxu1 %v15965_v43  ;;  %5723 = vmatprep.mubr.f32.mxu0 %v15648_v60  ;;  %v15970_v43 = vld [vmem:[#allocation125_spill] sm:$0xff] }
 0x877   : > { %6376 = vmatprep.mubr.f32.mxu1 %v15648_v60 }
 0x87d   : > { %5724 = vmatmul.mubr.f32.gmra.mrb[200].mxu0 %v15966_v1 }
 0x87e   : > { %6377 = vmatmul.mubr.f32.gmra.mrb[200].mxu1 %v15966_v1  ;;  %5729 = vmatprep.mubr.f32.mxu0 %v15648_v60  ;;  %v15971_v1 = vld [vmem:[#allocation129_spill] sm:$0xff] }
 0x87f   : > { %6382 = vmatprep.mubr.f32.mxu1 %v15648_v60 }
 0x885   : > { %5730 = vmatmul.mubr.f32.gmra.mrb[200].mxu0 %v15967_v42 }
 0x886   : > { %6383 = vmatmul.mubr.f32.gmra.mrb[200].mxu1 %v15967_v42  ;;  %5735 = vmatprep.mubr.f32.mxu0 %v15648_v60  ;;  %v15976_v42 = vld [vmem:[#allocation149_spill] sm:$0xff] }
 0x887   : > { %6388 = vmatprep.mubr.f32.mxu1 %v15648_v60 }
 0x88c   : > { %v4441_v54 = vpop.f32.mrb[198].mxu0 }
 0x88d   : > { %v5094_v22 = vpop.f32.mrb[198].mxu1  ;;  %v5196_v10 = vrot.slane %v4441_v54, 4  ;;  %v4443_v47 = vpop.f32.mrb[199].mxu0  ;;  %5736 = vmatmul.mubr.f32.gmra.mrb[200].mxu0 %v15968_v8 }
 0x88e   : > { %v5402_v40 = vrot.slane %v5094_v22, 4  ;;  %v5096_v55 = vpop.f32.mrb[199].mxu1  ;;  %6389 = vmatmul.mubr.f32.gmra.mrb[200].mxu1 %v15968_v8  ;;  %v5299_v34 = vrot.slane %v4443_v47, 4  ;;  %5741 = vmatprep.mubr.f32.mxu0 %v15648_v60  ;;  %v15991_v8 = vld [vmem:[#allocation203_spill] sm:$0xff] }
 0x88f   : > { %v5505_v11 = vrot.slane %v5096_v55, 4  ;;  %6394 = vmatprep.mubr.f32.mxu1 %v15648_v60  ;;  %v5197_v23 = vadd.f32 %v5196_v10, %v4441_v54  ;;  %v15985_v54 = vld [vmem:[#allocation185_spill] sm:$0xff]  ;;  %v15987_v10 = vld [vmem:[#allocation191_spill] sm:$0xff] }
 0x890   : > { %v5403_v7 = vadd.f32 %v5402_v40, %v5094_v22  ;;  %v5300_v3 = vadd.f32 %v5299_v34, %v4443_v47  ;;  %v15986_v22 = vld [vmem:[#allocation188_spill] sm:$0xff]  ;;  %v15988_v40 = vld [vmem:[#allocation194_spill] sm:$0xff]  ;;  %v15989_v47 = vld [vmem:[#allocation197_spill] sm:$0xff] }
 0x891   : > { %v5506_v24 = vadd.f32 %v5505_v11, %v5096_v55  ;;  %v5198_v56 = vrot.slane %v5197_v23, 2  ;;  %v15990_v55 = vld [vmem:[#allocation200_spill] sm:$0xff]  ;;  %v15992_v34 = vld [vmem:[#allocation206_spill] sm:$0xff]  ;;  %v15993_v11 = vld [vmem:[#allocation209_spill] sm:$0xff] }
 0x892   : > { %v5404_v41 = vrot.slane %v5403_v7, 2  ;;  %v5301_v62 = vrot.slane %v5300_v3, 2 }
 0x893   : > { %v5507_v48 = vrot.slane %v5506_v24, 2  ;;  %v5199_v19 = vadd.f32 %v5198_v56, %v5197_v23  ;;  %v15996_v23 = vld [vmem:[#allocation218_spill] sm:$0xff]  ;;  %v16002_v56 = vld [vmem:[#allocation236_spill] sm:$0xff] }
 0x894   : > { %v5405_v31 = vadd.f32 %v5404_v41, %v5403_v7  ;;  %v5302_v39 = vadd.f32 %v5301_v62, %v5300_v3  ;;  %v15997_v7 = vld [vmem:[#allocation221_spill] sm:$0xff]  ;;  %v16000_v3 = vld [vmem:[#allocation230_spill] sm:$0xff]  ;;  %v16003_v41 = vld [vmem:[#allocation239_spill] sm:$0xff] }
 0x895   : > { %v5508_v17 = vadd.f32 %v5507_v48, %v5506_v24  ;;  %v5200_v21 = vrot.slane %v5199_v19, 1  ;;  %5742 = vmatmul.mubr.f32.gmra.mrb[200].mxu0 %v15969_v49  ;;  %v16001_v24 = vld [vmem:[#allocation233_spill] sm:$0xff]  ;;  %v16004_v62 = vld [vmem:[#allocation242_spill] sm:$0xff] }
 0x896   : > { %v5406_v46 = vrot.slane %v5405_v31, 1  ;;  %6395 = vmatmul.mubr.f32.gmra.mrb[200].mxu1 %v15969_v49  ;;  %v5303_v53 = vrot.slane %v5302_v39, 1  ;;  %5747 = vmatprep.mubr.f32.mxu0 %v15648_v60  ;;  %v16005_v48 = vld [vmem:[#allocation245_spill] sm:$0xff]  ;;  %v16016_v49 = vld [vmem:[#allocation278_spill] sm:$0xff] }
 0x897   : > { %v5509_v58 = vrot.slane %v5508_v17, 1  ;;  %6400 = vmatprep.mubr.f32.mxu1 %v15648_v60  ;;  %v5201_v20 = vadd.f32 %v5200_v21, %v5199_v19  ;;  %v16008_v19 = vld [vmem:[#allocation254_spill] sm:$0xff]  ;;  %v16014_v21 = vld [vmem:[#allocation272_spill] sm:$0xff] }
 0x898   : > { %v5407_v28 = vadd.f32 %v5406_v46, %v5405_v31  ;;  %v5304_v57 = vadd.f32 %v5303_v53, %v5302_v39  ;;  %v16009_v31 = vld [vmem:[#allocation257_spill] sm:$0xff]  ;;  %v16012_v39 = vld [vmem:[#allocation266_spill] sm:$0xff]  ;;  %v16015_v46 = vld [vmem:[#allocation275_spill] sm:$0xff] }
 0x899   : > { %v5510_v63 = vadd.f32 %v5509_v58, %v5508_v17  ;;  %v14136_v5 = vadd.f32 %v5201_v20, %v3479_v2  ;;  %v16013_v17 = vld [vmem:[#allocation269_spill] sm:$0xff]  ;;  %v16018_v58 = vld [vmem:[#allocation284_spill] sm:$0xff]  ;;  %v16019_v2 = vld [vmem:[#allocation287_spill] sm:$0xff] }
 0x89a   : > { %v14138_v27 = vadd.f32 %v5407_v28, %v3685_v4  ;;  %v14140_v30 = vadd.f32 %v5304_v57, %v3582_v33  ;;  %v16017_v53 = vld [vmem:[#allocation281_spill] sm:$0xff]  ;;  %v16020_v4 = vld [vmem:[#allocation290_spill] sm:$0xff]  ;;  %v16022_v28 = vld [vmem:[#allocation296_spill] sm:$0xff] }
 0x89b   : > { %v14142_v38 = vadd.f32 %v5510_v63, %v3788_v35  ;;  %v16021_v20 = vld [vmem:[#allocation293_spill] sm:$0xff]  ;;  %v16023_v33 = vld [vmem:[#allocation299_spill] sm:$0xff]  ;;  %v16024_v35 = vld [vmem:[#allocation302_spill] sm:$0xff] }
 0x89c   : > { %v16025_v57 = vld [vmem:[#allocation305_spill] sm:$0xff]  ;;  %v16026_v63 = vld [vmem:[#allocation308_spill] sm:$0xff] }
 0x89d   : > { %5748 = vmatmul.mubr.f32.gmra.mrb[200].mxu0 %v15970_v43 }
 0x89e   : > { %6401 = vmatmul.mubr.f32.gmra.mrb[200].mxu1 %v15970_v43  ;;  %5753 = vmatprep.mubr.f32.mxu0 %v15648_v60  ;;  %v16027_v43 = vld [vmem:[#allocation311_spill] sm:$0xff] }
 0x89f   : > { %6406 = vmatprep.mubr.f32.mxu1 %v15648_v60 }
 0x8a5   : > { %5754 = vmatmul.mubr.f32.gmra.mrb[200].mxu0 %v15971_v1 }
 0x8a6   : > { %6407 = vmatmul.mubr.f32.gmra.mrb[200].mxu1 %v15971_v1  ;;  %5759 = vmatprep.mubr.f32.mxu0 %v15648_v60  ;;  %v16028_v1 = vld [vmem:[#allocation314_spill] sm:$0xff] }
 0x8a7   : > { %6412 = vmatprep.mubr.f32.mxu1 %v15648_v60 }
 0x8ad   : > { %5760 = vmatmul.mubr.f32.gmra.mrb[200].mxu0 %v15972_v9 }
 0x8ae   : > { %6413 = vmatmul.mubr.f32.gmra.mrb[200].mxu1 %v15972_v9  ;;  %5765 = vmatprep.mubr.f32.mxu0 %v15648_v60  ;;  %v16029_v9 = vld [vmem:[#allocation317_spill] sm:$0xff] }
 0x8af   : > { %6418 = vmatprep.mubr.f32.mxu1 %v15648_v60 }
 0x8b5   : > { %5766 = vmatmul.mubr.f32.gmra.mrb[200].mxu0 %v15973_v15 }
 0x8b6   : > { %6419 = vmatmul.mubr.f32.gmra.mrb[200].mxu1 %v15973_v15  ;;  %5771 = vmatprep.mubr.f32.mxu0 %v15648_v60  ;;  %v16030_v15 = vld [vmem:[#allocation320_spill] sm:$0xff] }
 0x8b7   : > { %6424 = vmatprep.mubr.f32.mxu1 %v15648_v60 }
 0x8bd   : > { %5772 = vmatmul.mubr.f32.gmra.mrb[200].mxu0 %v15974_v29 }
 0x8be   : > { %6425 = vmatmul.mubr.f32.gmra.mrb[200].mxu1 %v15974_v29  ;;  %5777 = vmatprep.mubr.f32.mxu0 %v15648_v60  ;;  %v16031_v29 = vld [vmem:[#allocation323_spill] sm:$0xff] }
 0x8bf   : > { %6430 = vmatprep.mubr.f32.mxu1 %v15648_v60 }
 0x8c5   : > { %5778 = vmatmul.mubr.f32.gmra.mrb[200].mxu0 %v15975_v36 }
 0x8c6   : > { %6431 = vmatmul.mubr.f32.gmra.mrb[200].mxu1 %v15975_v36  ;;  %5783 = vmatprep.mubr.f32.mxu0 %v15648_v60  ;;  %v16032_v36 = vld [vmem:[#allocation326_spill] sm:$0xff] }
 0x8c7   : > { %6436 = vmatprep.mubr.f32.mxu1 %v15648_v60 }
 0x8cd   : > { %5784 = vmatmul.mubr.f32.gmra.mrb[200].mxu0 %v15976_v42 }
 0x8ce   : > { %6437 = vmatmul.mubr.f32.gmra.mrb[200].mxu1 %v15976_v42  ;;  %5789 = vmatprep.mubr.f32.mxu0 %v15648_v60  ;;  %v16033_v42 = vld [vmem:[#allocation329_spill] sm:$0xff] }
 0x8cf   : > { %6442 = vmatprep.mubr.f32.mxu1 %v15648_v60 }
 0x8d5   : > { %5790 = vmatmul.mubr.f32.gmra.mrb[200].mxu0 %v15977_v51 }
 0x8d6   : > { %6443 = vmatmul.mubr.f32.gmra.mrb[200].mxu1 %v15977_v51  ;;  %5795 = vmatprep.mubr.f32.mxu0 %v15648_v60  ;;  %v16034_v51 = vld [vmem:[#allocation331_spill] sm:$0xff] }
 0x8d7   : > { %6448 = vmatprep.mubr.f32.mxu1 %v15648_v60 }
 0x8dd   : > { %5796 = vmatmul.mubr.f32.gmra.mrb[200].mxu0 %v15978_v59 }
 0x8de   : > { %6449 = vmatmul.mubr.f32.gmra.mrb[200].mxu1 %v15978_v59  ;;  %5801 = vmatprep.mubr.f32.mxu0 %v15648_v60  ;;  %v16035_v59 = vld [vmem:[#allocation334_spill] sm:$0xff] }
 0x8df   : > { %6454 = vmatprep.mubr.f32.mxu1 %v15648_v60 }
 0x8e5   : > { %5802 = vmatmul.mubr.f32.gmra.mrb[200].mxu0 %v15979_v14 }
 0x8e6   : > { %6455 = vmatmul.mubr.f32.gmra.mrb[200].mxu1 %v15979_v14  ;;  %5807 = vmatprep.mubr.f32.mxu0 %v15648_v60  ;;  %v16036_v14 = vld [vmem:[#allocation336_spill] sm:$0xff] }
 0x8e7   : > { %6460 = vmatprep.mubr.f32.mxu1 %v15648_v60 }
 0x8ed   : > { %5808 = vmatmul.mubr.f32.gmra.mrb[200].mxu0 %v15980_v44 }
 0x8ee   : > { %6461 = vmatmul.mubr.f32.gmra.mrb[200].mxu1 %v15980_v44  ;;  %5813 = vmatprep.mubr.f32.mxu0 %v15648_v60  ;;  %v16037_v44 = vld [vmem:[#allocation339_spill] sm:$0xff] }
 0x8ef   : > { %6466 = vmatprep.mubr.f32.mxu1 %v15648_v60 }
 0x8f5   : > { %5814 = vmatmul.mubr.f32.gmra.mrb[200].mxu0 %v15981_v16 }
 0x8f6   : > { %6467 = vmatmul.mubr.f32.gmra.mrb[200].mxu1 %v15981_v16  ;;  %5819 = vmatprep.mubr.f32.mxu0 %v15648_v60  ;;  %v16038_v16 = vld [vmem:[#allocation341_spill] sm:$0xff] }
 0x8f7   : > { %6472 = vmatprep.mubr.f32.mxu1 %v15648_v60 }
 0x8fd   : > { %5820 = vmatmul.mubr.f32.gmra.mrb[200].mxu0 %v15982_v32 }
 0x8fe   : > { %6473 = vmatmul.mubr.f32.gmra.mrb[200].mxu1 %v15982_v32  ;;  %5825 = vmatprep.mubr.f32.mxu0 %v15648_v60  ;;  %v16039_v32 = vld [vmem:[#allocation33_spill] sm:$0xff] }
 0x8ff   : > { %6478 = vmatprep.mubr.f32.mxu1 %v15648_v60 }
 0x905   : > { %5826 = vmatmul.mubr.f32.gmra.mrb[200].mxu0 %v15983_v50 }
 0x906   : > { %6479 = vmatmul.mubr.f32.gmra.mrb[200].mxu1 %v15983_v50  ;;  %5831 = vmatprep.mubr.f32.mxu0 %v15648_v60  ;;  %v16040_v50 = vld [vmem:[#allocation37_spill] sm:$0xff] }
 0x907   : > { %6484 = vmatprep.mubr.f32.mxu1 %v15648_v60 }
 0x90d   : > { %5832 = vmatmul.mubr.f32.gmra.mrb[200].mxu0 %v15984_v18 }
 0x90e   : > { %6485 = vmatmul.mubr.f32.gmra.mrb[200].mxu1 %v15984_v18  ;;  %5837 = vmatprep.mubr.f32.mxu0 %v15648_v60  ;;  %v16042_v18 = vld [vmem:[#allocation46_spill] sm:$0xff] }
 0x90f   : > { %6490 = vmatprep.mubr.f32.mxu1 %v15648_v60 }
 0x915   : > { %5838 = vmatmul.mubr.f32.gmra.mrb[200].mxu0 %v15985_v54 }
 0x916   : > { %6491 = vmatmul.mubr.f32.gmra.mrb[200].mxu1 %v15985_v54  ;;  %5843 = vmatprep.mubr.f32.mxu0 %v15648_v60  ;;  %v16043_v54 = vld [vmem:[#allocation49_spill] sm:$0xff] }
 0x917   : > { %6496 = vmatprep.mubr.f32.mxu1 %v15648_v60 }
 0x91d   : > { %5844 = vmatmul.mubr.f32.gmra.mrb[200].mxu0 %v15986_v22 }
 0x91e   : > { %6497 = vmatmul.mubr.f32.gmra.mrb[200].mxu1 %v15986_v22  ;;  %5849 = vmatprep.mubr.f32.mxu0 %v15648_v60  ;;  %v16044_v22 = vld [vmem:[#allocation52_spill] sm:$0xff] }
 0x91f   : > { %6502 = vmatprep.mubr.f32.mxu1 %v15648_v60 }
 0x925   : > { %5850 = vmatmul.mubr.f32.gmra.mrb[200].mxu0 %v15987_v10 }
 0x926   : > { %6503 = vmatmul.mubr.f32.gmra.mrb[200].mxu1 %v15987_v10  ;;  %5855 = vmatprep.mubr.f32.mxu0 %v15648_v60  ;;  %v16045_v10 = vld [vmem:[#allocation55_spill] sm:$0xff] }
 0x927   : > { %6508 = vmatprep.mubr.f32.mxu1 %v15648_v60 }
 0x92d   : > { %5856 = vmatmul.mubr.f32.gmra.mrb[200].mxu0 %v15988_v40 }
 0x92e   : > { %6509 = vmatmul.mubr.f32.gmra.mrb[200].mxu1 %v15988_v40  ;;  %5861 = vmatprep.mubr.f32.mxu0 %v15648_v60  ;;  %v16046_v40 = vld [vmem:[#allocation58_spill] sm:$0xff] }
 0x92f   : > { %6514 = vmatprep.mubr.f32.mxu1 %v15648_v60 }
 0x935   : > { %5862 = vmatmul.mubr.f32.gmra.mrb[200].mxu0 %v15989_v47 }
 0x936   : > { %6515 = vmatmul.mubr.f32.gmra.mrb[200].mxu1 %v15989_v47  ;;  %5867 = vmatprep.mubr.f32.mxu0 %v15648_v60  ;;  %v16047_v47 = vld [vmem:[#allocation61_spill] sm:$0xff] }
 0x937   : > { %6520 = vmatprep.mubr.f32.mxu1 %v15648_v60 }
 0x93d   : > { %5868 = vmatmul.mubr.f32.gmra.mrb[200].mxu0 %v15990_v55 }
 0x93e   : > { %6521 = vmatmul.mubr.f32.gmra.mrb[200].mxu1 %v15990_v55  ;;  %5873 = vmatprep.mubr.f32.mxu0 %v15648_v60  ;;  %v16048_v55 = vld [vmem:[#allocation64_spill] sm:$0xff] }
 0x93f   : > { %6526 = vmatprep.mubr.f32.mxu1 %v15648_v60 }
 0x945   : > { %5874 = vmatmul.mubr.f32.gmra.mrb[200].mxu0 %v15991_v8 }
 0x946   : > { %6527 = vmatmul.mubr.f32.gmra.mrb[200].mxu1 %v15991_v8  ;;  %5879 = vmatprep.mubr.f32.mxu0 %v15648_v60  ;;  %v16049_v8 = vld [vmem:[#allocation67_spill] sm:$0xff] }
 0x947   : > { %6532 = vmatprep.mubr.f32.mxu1 %v15648_v60 }
 0x94d   : > { %5880 = vmatmul.mubr.f32.gmra.mrb[200].mxu0 %v15992_v34 }
 0x94e   : > { %6533 = vmatmul.mubr.f32.gmra.mrb[200].mxu1 %v15992_v34  ;;  %5885 = vmatprep.mubr.f32.mxu0 %v15648_v60  ;;  %v16050_v34 = vld [vmem:[#allocation70_spill] sm:$0xff] }
 0x94f   : > { %6538 = vmatprep.mubr.f32.mxu1 %v15648_v60 }
 0x955   : > { %5886 = vmatmul.mubr.f32.gmra.mrb[200].mxu0 %v15993_v11 }
 0x956   : > { %6539 = vmatmul.mubr.f32.gmra.mrb[200].mxu1 %v15993_v11  ;;  %5891 = vmatprep.mubr.f32.mxu0 %v15648_v60  ;;  %v16051_v11 = vld [vmem:[#allocation73_spill] sm:$0xff] }
 0x957   : > { %6544 = vmatprep.mubr.f32.mxu1 %v15648_v60 }
 0x95d   : > { %5892 = vmatmul.mubr.f32.gmra.mrb[200].mxu0 %v15994_v61 }
 0x95e   : > { %6545 = vmatmul.mubr.f32.gmra.mrb[200].mxu1 %v15994_v61  ;;  %5897 = vmatprep.mubr.f32.mxu0 %v15648_v60  ;;  %v400_v61 = vld [vmem:[%s15075_s3 + $0x80] sm:$0xff] }
 0x95f   : > { %6550 = vmatprep.mubr.f32.mxu1 %v15648_v60 }
 0x965   : > { %5898 = vmatmul.mubr.f32.gmra.mrb[200].mxu0 %v15995_v0 }
 0x966   : > { %6551 = vmatmul.mubr.f32.gmra.mrb[200].mxu1 %v15995_v0  ;;  %5903 = vmatprep.mubr.f32.mxu0 %v15648_v60  ;;  %v401_v0 = vld [vmem:[%s15075_s3 + $0x88] sm:$0xff] }
 0x967   : > { %6556 = vmatprep.mubr.f32.mxu1 %v15648_v60 }
 0x96d   : > { %5904 = vmatmul.mubr.f32.gmra.mrb[200].mxu0 %v15996_v23 }
 0x96e   : > { %6557 = vmatmul.mubr.f32.gmra.mrb[200].mxu1 %v15996_v23  ;;  %5909 = vmatprep.mubr.f32.mxu0 %v15648_v60  ;;  %v384_v23 = vld [vmem:[%s15075_s3] sm:$0xff] }
 0x96f   : > { %6562 = vmatprep.mubr.f32.mxu1 %v15648_v60 }
 0x975   : > { %5910 = vmatmul.mubr.f32.gmra.mrb[200].mxu0 %v15997_v7 }
 0x976   : > { %6563 = vmatmul.mubr.f32.gmra.mrb[200].mxu1 %v15997_v7  ;;  %5915 = vmatprep.mubr.f32.mxu0 %v15648_v60  ;;  %v9718_v7 = vpack.c.bf16 %v401_v0, %v400_v61 }
 0x977   : > { %6568 = vmatprep.mubr.f32.mxu1 %v15648_v60 }
 0x978   : > { %9719 = vmatprep.subr.bf16.mxu0 %v9718_v7 }
 0x97d   : > { %5916 = vmatmul.mubr.f32.gmra.mrb[200].mxu0 %v15998_v45 }
 0x97e   : > { %6569 = vmatmul.mubr.f32.gmra.mrb[200].mxu1 %v15998_v45  ;;  %5921 = vmatprep.mubr.f32.mxu0 %v15648_v60  ;;  %v385_v45 = vld [vmem:[%s15075_s3 + $0x8] sm:$0xff] }
 0x97f   : > { %6574 = vmatprep.mubr.f32.mxu1 %v15648_v60 }
 0x985   : > { %5922 = vmatmul.mubr.f32.gmra.mrb[200].mxu0 %v15999_v52 }
 0x986   : > { %6575 = vmatmul.mubr.f32.gmra.mrb[200].mxu1 %v15999_v52  ;;  %5927 = vmatprep.mubr.f32.mxu0 %v15648_v60  ;;  %v432_v52 = vld [vmem:[%s15075_s3 + $0x180] sm:$0xff] }
 0x987   : > { %6580 = vmatprep.mubr.f32.mxu1 %v15648_v60 }
 0x98d   : > { %5928 = vmatmul.mubr.f32.gmra.mrb[200].mxu0 %v16000_v3 }
 0x98e   : > { %6581 = vmatmul.mubr.f32.gmra.mrb[200].mxu1 %v16000_v3  ;;  %5933 = vmatprep.mubr.f32.mxu0 %v15648_v60  ;;  %v433_v3 = vld [vmem:[%s15075_s3 + $0x188] sm:$0xff] }
 0x98f   : > { %6586 = vmatprep.mubr.f32.mxu1 %v15648_v60 }
 0x995   : > { %5934 = vmatmul.mubr.f32.gmra.mrb[200].mxu0 %v16001_v24 }
 0x996   : > { %6587 = vmatmul.mubr.f32.gmra.mrb[200].mxu1 %v16001_v24  ;;  %5939 = vmatprep.mubr.f32.mxu0 %v15648_v60  ;;  %v9720_v24 = vpack.c.bf16 %v385_v45, %v384_v23  ;;  %v16066_v23 = vld [vmem:[#allocation123_spill] sm:$0xff] }
 0x997   : > { %6592 = vmatprep.mubr.f32.mxu1 %v15648_v60 }
 0x99d   : > { %5940 = vmatmul.mubr.f32.gmra.mrb[200].mxu0 %v16002_v56 }
 0x99e   : > { %6593 = vmatmul.mubr.f32.gmra.mrb[200].mxu1 %v16002_v56  ;;  %5945 = vmatprep.mubr.f32.mxu0 %v15648_v60  ;;  %v9750_v56 = vpack.c.bf16 %v433_v3, %v432_v52 }
 0x99f   : > { %6598 = vmatprep.mubr.f32.mxu1 %v15648_v60 }
 0x9a0   : > { %9751 = vmatprep.subr.bf16.mxu1 %v9750_v56 }
 0x9a5   : > { %5946 = vmatmul.mubr.f32.gmra.mrb[200].mxu0 %v16003_v41 }
 0x9a6   : > { %6599 = vmatmul.mubr.f32.gmra.mrb[200].mxu1 %v16003_v41  ;;  %5951 = vmatprep.mubr.f32.mxu0 %v15648_v60  ;;  %v416_v41 = vld [vmem:[%s15075_s3 + $0x100] sm:$0xff] }
 0x9a7   : > { %6604 = vmatprep.mubr.f32.mxu1 %v15648_v60 }
 0x9ad   : > { %5952 = vmatmul.mubr.f32.gmra.mrb[200].mxu0 %v16004_v62 }
 0x9ae   : > { %6605 = vmatmul.mubr.f32.gmra.mrb[200].mxu1 %v16004_v62  ;;  %5957 = vmatprep.mubr.f32.mxu0 %v15648_v60  ;;  %v417_v62 = vld [vmem:[%s15075_s3 + $0x108] sm:$0xff] }
 0x9af   : > { %6610 = vmatprep.mubr.f32.mxu1 %v15648_v60 }
 0x9b5   : > { %5958 = vmatmul.mubr.f32.gmra.mrb[200].mxu0 %v16005_v48 }
 0x9b6   : > { %6611 = vmatmul.mubr.f32.gmra.mrb[200].mxu1 %v16005_v48  ;;  %5963 = vmatprep.mubr.f32.mxu0 %v15648_v60  ;;  %v9752_v48 = vpack.c.bf16 %v417_v62, %v416_v41 }
 0x9b7   : > { %6616 = vmatprep.mubr.f32.mxu1 %v15648_v60 }
 0x9bd   : > { %5964 = vmatmul.mubr.f32.gmra.mrb[200].mxu0 %v16006_v12 }
 0x9be   : > { %6617 = vmatmul.mubr.f32.gmra.mrb[200].mxu1 %v16006_v12  ;;  %5969 = vmatprep.mubr.f32.mxu0 %v15648_v60  ;;  %v16052_v12 = vld [vmem:[#allocation76_spill] sm:$0xff] }
 0x9bf   : > { %6622 = vmatprep.mubr.f32.mxu1 %v15648_v60 }
 0x9c5   : > { %5970 = vmatmul.mubr.f32.gmra.mrb[200].mxu0 %v16007_v13 }
 0x9c6   : > { %6623 = vmatmul.mubr.f32.gmra.mrb[200].mxu1 %v16007_v13  ;;  %5975 = vmatprep.mubr.f32.mxu0 %v15648_v60  ;;  %v16053_v13 = vld [vmem:[#allocation79_spill] sm:$0xff] }
 0x9c7   : > { %6628 = vmatprep.mubr.f32.mxu1 %v15648_v60 }
 0x9cd   : > { %5976 = vmatmul.mubr.f32.gmra.mrb[200].mxu0 %v16008_v19 }
 0x9ce   : > { %6629 = vmatmul.mubr.f32.gmra.mrb[200].mxu1 %v16008_v19  ;;  %5981 = vmatprep.mubr.f32.mxu0 %v15648_v60  ;;  %v16054_v19 = vld [vmem:[#allocation82_spill] sm:$0xff] }
 0x9cf   : > { %6634 = vmatprep.mubr.f32.mxu1 %v15648_v60 }
 0x9d5   : > { %5982 = vmatmul.mubr.f32.gmra.mrb[200].mxu0 %v16009_v31 }
 0x9d6   : > { %6635 = vmatmul.mubr.f32.gmra.mrb[200].mxu1 %v16009_v31  ;;  %5987 = vmatprep.mubr.f32.mxu0 %v15648_v60  ;;  %v16055_v31 = vld [vmem:[#allocation85_spill] sm:$0xff] }
 0x9d7   : > { %6640 = vmatprep.mubr.f32.mxu1 %v15648_v60 }
 0x9dd   : > { %5988 = vmatmul.mubr.f32.gmra.mrb[200].mxu0 %v16010_v25 }
 0x9de   : > { %6641 = vmatmul.mubr.f32.gmra.mrb[200].mxu1 %v16010_v25  ;;  %5993 = vmatprep.mubr.f32.mxu0 %v15648_v60  ;;  %v16056_v25 = vld [vmem:[#allocation88_spill] sm:$0xff] }
 0x9df   : > { %6646 = vmatprep.mubr.f32.mxu1 %v15648_v60 }
 0x9e5   : > { %5994 = vmatmul.mubr.f32.gmra.mrb[200].mxu0 %v16011_v26 }
 0x9e6   : > { %6647 = vmatmul.mubr.f32.gmra.mrb[200].mxu1 %v16011_v26  ;;  %5999 = vmatprep.mubr.f32.mxu0 %v15648_v60  ;;  %v16057_v26 = vld [vmem:[#allocation91_spill] sm:$0xff] }
 0x9e7   : > { %6652 = vmatprep.mubr.f32.mxu1 %v15648_v60 }
 0x9ed   : > { %6000 = vmatmul.mubr.f32.gmra.mrb[200].mxu0 %v16012_v39 }
 0x9ee   : > { %6653 = vmatmul.mubr.f32.gmra.mrb[200].mxu1 %v16012_v39  ;;  %6005 = vmatprep.mubr.f32.mxu0 %v15648_v60  ;;  %v16058_v39 = vld [vmem:[#allocation94_spill] sm:$0xff] }
 0x9ef   : > { %6658 = vmatprep.mubr.f32.mxu1 %v15648_v60 }
 0x9f5   : > { %6006 = vmatmul.mubr.f32.gmra.mrb[200].mxu0 %v16013_v17 }
 0x9f6   : > { %6659 = vmatmul.mubr.f32.gmra.mrb[200].mxu1 %v16013_v17  ;;  %6011 = vmatprep.mubr.f32.mxu0 %v15648_v60  ;;  %v16059_v17 = vld [vmem:[#allocation97_spill] sm:$0xff] }
 0x9f7   : > { %6664 = vmatprep.mubr.f32.mxu1 %v15648_v60 }
 0x9fd   : > { %6012 = vmatmul.mubr.f32.gmra.mrb[200].mxu0 %v16014_v21 }
 0x9fe   : > { %6665 = vmatmul.mubr.f32.gmra.mrb[200].mxu1 %v16014_v21  ;;  %6017 = vmatprep.mubr.f32.mxu0 %v15648_v60  ;;  %v16060_v21 = vld [vmem:[#allocation100_spill] sm:$0xff] }
 0x9ff   : > { %6670 = vmatprep.mubr.f32.mxu1 %v15648_v60 }
 0xa05   : > { %6018 = vmatmul.mubr.f32.gmra.mrb[200].mxu0 %v16015_v46 }
 0xa06   : > { %6671 = vmatmul.mubr.f32.gmra.mrb[200].mxu1 %v16015_v46  ;;  %6023 = vmatprep.mubr.f32.mxu0 %v15648_v60  ;;  %v16061_v46 = vld [vmem:[#allocation103_spill] sm:$0xff] }
 0xa07   : > { %6676 = vmatprep.mubr.f32.mxu1 %v15648_v60 }
 0xa0d   : > { %6024 = vmatmul.mubr.f32.gmra.mrb[200].mxu0 %v16016_v49 }
 0xa0e   : > { %6677 = vmatmul.mubr.f32.gmra.mrb[200].mxu1 %v16016_v49  ;;  %6029 = vmatprep.mubr.f32.mxu0 %v15648_v60  ;;  %v16062_v49 = vld [vmem:[#allocation107_spill] sm:$0xff] }
 0xa0f   : > { %6682 = vmatprep.mubr.f32.mxu1 %v15648_v60 }
 0xa15   : > { %6030 = vmatmul.mubr.f32.gmra.mrb[200].mxu0 %v16017_v53 }
 0xa16   : > { %6683 = vmatmul.mubr.f32.gmra.mrb[200].mxu1 %v16017_v53  ;;  %6035 = vmatprep.mubr.f32.mxu0 %v15648_v60  ;;  %v16063_v53 = vld [vmem:[#allocation111_spill] sm:$0xff] }
 0xa17   : > { %6688 = vmatprep.mubr.f32.mxu1 %v15648_v60 }
 0xa1d   : > { %6036 = vmatmul.mubr.f32.gmra.mrb[200].mxu0 %v16018_v58 }
 0xa1e   : > { %6689 = vmatmul.mubr.f32.gmra.mrb[200].mxu1 %v16018_v58  ;;  %6041 = vmatprep.mubr.f32.mxu0 %v15648_v60  ;;  %v402_v58 = vld [vmem:[%s15075_s3 + $0x90] sm:$0xff] }
 0xa1f   : > { %6694 = vmatprep.mubr.f32.mxu1 %v15648_v60 }
 0xa25   : > { %6042 = vmatmul.mubr.f32.gmra.mrb[200].mxu0 %v16019_v2 }
 0xa26   : > { %6695 = vmatmul.mubr.f32.gmra.mrb[200].mxu1 %v16019_v2  ;;  %6047 = vmatprep.mubr.f32.mxu0 %v15648_v60  ;;  %v403_v2 = vld [vmem:[%s15075_s3 + $0x98] sm:$0xff] }
 0xa27   : > { %6700 = vmatprep.mubr.f32.mxu1 %v15648_v60 }
 0xa2d   : > { %6048 = vmatmul.mubr.f32.gmra.mrb[200].mxu0 %v16020_v4 }
 0xa2e   : > { %6701 = vmatmul.mubr.f32.gmra.mrb[200].mxu1 %v16020_v4  ;;  %6053 = vmatprep.mubr.f32.mxu0 %v15648_v60  ;;  %v386_v4 = vld [vmem:[%s15075_s3 + $0x10] sm:$0xff] }
 0xa2f   : > { %6706 = vmatprep.mubr.f32.mxu1 %v15648_v60 }
 0xa35   : > { %6054 = vmatmul.mubr.f32.gmra.mrb[200].mxu0 %v16021_v20 }
 0xa36   : > { %6707 = vmatmul.mubr.f32.gmra.mrb[200].mxu1 %v16021_v20  ;;  %6059 = vmatprep.mubr.f32.mxu0 %v15648_v60  ;;  %v9722_v20 = vpack.c.bf16 %v403_v2, %v402_v58  ;;  %v437_v58 = vld [vmem:[%s15075_s3 + $0x1a8] sm:$0xff] }
 0xa37   : > { %6712 = vmatprep.mubr.f32.mxu1 %v15648_v60 }
 0xa3d   : > { %6060 = vmatmul.mubr.f32.gmra.mrb[200].mxu0 %v16022_v28 }
 0xa3e   : > { %6713 = vmatmul.mubr.f32.gmra.mrb[200].mxu1 %v16022_v28  ;;  %6065 = vmatprep.mubr.f32.mxu0 %v15648_v60  ;;  %v387_v28 = vld [vmem:[%s15075_s3 + $0x18] sm:$0xff] }
 0xa3f   : > { %6718 = vmatprep.mubr.f32.mxu1 %v15648_v60 }
 0xa45   : > { %6066 = vmatmul.mubr.f32.gmra.mrb[200].mxu0 %v16023_v33 }
 0xa46   : > { %6719 = vmatmul.mubr.f32.gmra.mrb[200].mxu1 %v16023_v33  ;;  %6071 = vmatprep.mubr.f32.mxu0 %v15648_v60  ;;  %v434_v33 = vld [vmem:[%s15075_s3 + $0x190] sm:$0xff] }
 0xa47   : > { %6724 = vmatprep.mubr.f32.mxu1 %v15648_v60 }
 0xa4d   : > { %6072 = vmatmul.mubr.f32.gmra.mrb[200].mxu0 %v16024_v35 }
 0xa4e   : > { %6725 = vmatmul.mubr.f32.gmra.mrb[200].mxu1 %v16024_v35  ;;  %6077 = vmatprep.mubr.f32.mxu0 %v15648_v60  ;;  %v435_v35 = vld [vmem:[%s15075_s3 + $0x198] sm:$0xff] }
 0xa4f   : > { %6730 = vmatprep.mubr.f32.mxu1 %v15648_v60 }
 0xa55   : > { %6078 = vmatmul.mubr.f32.gmra.mrb[200].mxu0 %v16025_v57 }
 0xa56   : > { %6731 = vmatmul.mubr.f32.gmra.mrb[200].mxu1 %v16025_v57  ;;  %6083 = vmatprep.mubr.f32.mxu0 %v15648_v60  ;;  %v9724_v57 = vpack.c.bf16 %v387_v28, %v386_v4  ;;  %v421_v28 = vld [vmem:[%s15075_s3 + $0x128] sm:$0xff] }
 0xa57   : > { %6736 = vmatprep.mubr.f32.mxu1 %v15648_v60 }
 0xa5d   : > { %6084 = vmatmul.mubr.f32.gmra.mrb[200].mxu0 %v16026_v63 }
 0xa5e   : > { %6737 = vmatmul.mubr.f32.gmra.mrb[200].mxu1 %v16026_v63  ;;  %6089 = vmatprep.mubr.f32.mxu0 %v15648_v60  ;;  %v9754_v63 = vpack.c.bf16 %v435_v35, %v434_v33  ;;  %v16076_v35 = vld [vmem:[#allocation163_spill] sm:$0xff] }
 0xa5f   : > { %6742 = vmatprep.mubr.f32.mxu1 %v15648_v60 }
 0xa65   : > { %6090 = vmatmul.mubr.f32.gmra.mrb[200].mxu0 %v16027_v43 }
 0xa66   : > { %6743 = vmatmul.mubr.f32.gmra.mrb[200].mxu1 %v16027_v43  ;;  %6095 = vmatprep.mubr.f32.mxu0 %v15648_v60  ;;  %v418_v43 = vld [vmem:[%s15075_s3 + $0x110] sm:$0xff] }
 0xa67   : > { %6748 = vmatprep.mubr.f32.mxu1 %v15648_v60 }
 0xa6d   : > { %6096 = vmatmul.mubr.f32.gmra.mrb[200].mxu0 %v16028_v1 }
 0xa6e   : > { %6749 = vmatmul.mubr.f32.gmra.mrb[200].mxu1 %v16028_v1  ;;  %6101 = vmatprep.mubr.f32.mxu0 %v15648_v60  ;;  %v419_v1 = vld [vmem:[%s15075_s3 + $0x118] sm:$0xff] }
 0xa6f   : > { %6754 = vmatprep.mubr.f32.mxu1 %v15648_v60 }
 0xa75   : > { %6102 = vmatmul.mubr.f32.gmra.mrb[200].mxu0 %v16029_v9 }
 0xa76   : > { %6755 = vmatmul.mubr.f32.gmra.mrb[200].mxu1 %v16029_v9  ;;  %6107 = vmatprep.mubr.f32.mxu0 %v15648_v60  ;;  %v9756_v9 = vpack.c.bf16 %v419_v1, %v418_v43  ;;  %v16079_v43 = vld [vmem:[#allocation175_spill] sm:$0xff] }
 0xa77   : > { %6760 = vmatprep.mubr.f32.mxu1 %v15648_v60  ;;  %v16080_v1 = vld [vmem:[#allocation179_spill] sm:$0xff] }
 0xa7d   : > { %6108 = vmatmul.mubr.f32.gmra.mrb[200].mxu0 %v16030_v15 }
 0xa7e   : > { %6761 = vmatmul.mubr.f32.gmra.mrb[200].mxu1 %v16030_v15  ;;  %6113 = vmatprep.mubr.f32.mxu0 %v15648_v60  ;;  %v16064_v15 = vld [vmem:[#allocation115_spill] sm:$0xff] }
 0xa7f   : > { %6766 = vmatprep.mubr.f32.mxu1 %v15648_v60 }
 0xa85   : > { %6114 = vmatmul.mubr.f32.gmra.mrb[200].mxu0 %v16031_v29 }
 0xa86   : > { %6767 = vmatmul.mubr.f32.gmra.mrb[200].mxu1 %v16031_v29  ;;  %6119 = vmatprep.mubr.f32.mxu0 %v15648_v60 }
 0xa87   : > { %6772 = vmatprep.mubr.f32.mxu1 %v15648_v60 }
 0xa8d   : > { %6120 = vmatmul.mubr.f32.gmra.mrb[200].mxu0 %v16032_v36 }
 0xa8e   : > { %6773 = vmatmul.mubr.f32.gmra.mrb[200].mxu1 %v16032_v36  ;;  %6125 = vmatprep.mubr.f32.mxu0 %v15648_v60 }
 0xa8f   : > { %6778 = vmatprep.mubr.f32.mxu1 %v15648_v60 }
 0xa95   : > { %6126 = vmatmul.mubr.f32.gmra.mrb[200].mxu0 %v16033_v42 }
 0xa96   : > { %6779 = vmatmul.mubr.f32.gmra.mrb[200].mxu1 %v16033_v42  ;;  %6131 = vmatprep.mubr.f32.mxu0 %v15648_v60 }
 0xa97   : > { %6784 = vmatprep.mubr.f32.mxu1 %v15648_v60 }
 0xa9d   : > { %6132 = vmatmul.mubr.f32.gmra.mrb[200].mxu0 %v16034_v51 }
 0xa9e   : > { %6785 = vmatmul.mubr.f32.gmra.mrb[200].mxu1 %v16034_v51  ;;  %6137 = vmatprep.mubr.f32.mxu0 %v15648_v60 }
 0xa9f   : > { %6790 = vmatprep.mubr.f32.mxu1 %v15648_v60 }
 0xaa5   : > { %6138 = vmatmul.mubr.f32.gmra.mrb[200].mxu0 %v16035_v59 }
 0xaa6   : > { %6791 = vmatmul.mubr.f32.gmra.mrb[200].mxu1 %v16035_v59  ;;  %6143 = vmatprep.mubr.f32.mxu0 %v15648_v60 }
 0xaa7   : > { %6796 = vmatprep.mubr.f32.mxu1 %v15648_v60 }
 0xaad   : > { %6144 = vmatmul.mubr.f32.gmra.mrb[200].mxu0 %v16036_v14 }
 0xaae   : > { %6797 = vmatmul.mubr.f32.gmra.mrb[200].mxu1 %v16036_v14  ;;  %6149 = vmatprep.mubr.f32.mxu0 %v15648_v60 }
 0xaaf   : > { %6802 = vmatprep.mubr.f32.mxu1 %v15648_v60 }
 0xab5   : > { %6150 = vmatmul.mubr.f32.gmra.mrb[200].mxu0 %v16037_v44 }
 0xab6   : > { %6803 = vmatmul.mubr.f32.gmra.mrb[200].mxu1 %v16037_v44  ;;  %6155 = vmatprep.mubr.f32.mxu0 %v15648_v60  ;;  %v16065_v44 = vld [vmem:[#allocation119_spill] sm:$0xff] }
 0xab7   : > { %6808 = vmatprep.mubr.f32.mxu1 %v15648_v60 }
 0xabd   : > { %6156 = vmatmul.mubr.f32.gmra.mrb[200].mxu0 %v16038_v16 }
 0xabe   : > { %6809 = vmatmul.mubr.f32.gmra.mrb[200].mxu1 %v16038_v16  ;;  %6161 = vmatprep.mubr.f32.mxu0 %v15648_v60 }
 0xabf   : > { %6814 = vmatprep.mubr.f32.mxu1 %v15648_v60 }
 0xac5   : > { %6162 = vmatmul.mubr.f32.gmra.mrb[200].mxu0 %v13260_v37 }
 0xac6   : > { %6815 = vmatmul.mubr.f32.gmra.mrb[200].mxu1 %v13260_v37  ;;  %7301 = vmatprep.mubr.f32.mxu0 %v15648_v60  ;;  %v16041_v37 = vld [vmem:[#allocation43_spill] sm:$0xff] }
 0xac7   : > { %7954 = vmatprep.mubr.f32.mxu1 %v15648_v60 }
 0xac9   : > { %7302 = vmatmul.mubr.f32.vlgmr.msra.gmra.mrb[202].mxu0 %v16039_v32 }
 0xaca   : > { %7955 = vmatmul.mubr.f32.vlgmr.msra.gmra.mrb[202].mxu1 %v16039_v32  ;;  %7307 = vmatprep.mubr.f32.mxu0 %v15648_v60 }
 0xacb   : > { %7960 = vmatprep.mubr.f32.mxu1 %v15648_v60  ;;  %9721 = vmatpush3.bf16.msra.mxu0 %v9720_v24 }
 0xacc   : > { %9753 = vmatpush3.bf16.msra.mxu1 %v9752_v48  ;;  %9723 = vmatprep.subr.bf16.mxu0 %v9722_v20  ;;  %v420_v20 = vld [vmem:[%s15075_s3 + $0x120] sm:$0xff] }
 0xacd   : > { %9755 = vmatprep.subr.bf16.mxu1 %v9754_v63  ;;  %v9760_v33 = vpack.c.bf16 %v421_v28, %v420_v20  ;;  %v16078_v63 = vld [vmem:[#allocation171_spill] sm:$0xff]  ;;  %v16107_v20 = vld [vmem:[#allocation262_spill] sm:$0xff]  ;;  %v16108_v28 = vld [vmem:[#allocation265_spill] sm:$0xff] }
 0xacf   : > { %9725 = vmatpush3.bf16.msra.mxu0 %v9724_v57  ;;  %v16077_v57 = vld [vmem:[#allocation167_spill] sm:$0xff] }
 0xad0   : > { %9757 = vmatpush3.bf16.msra.mxu1 %v9756_v9  ;;  %v16081_v9 = vld [vmem:[#allocation183_spill] sm:$0xff] }
 0xad1   : > { %7308 = vmatmul.mubr.f32.gmra.mrb[202].mxu0 %v16040_v50 }
 0xad2   : > { %7961 = vmatmul.mubr.f32.gmra.mrb[202].mxu1 %v16040_v50  ;;  %7313 = vmatprep.mubr.f32.mxu0 %v15648_v60 }
 0xad3   : > { %7966 = vmatprep.mubr.f32.mxu1 %v15648_v60 }
 0xad9   : > { %7314 = vmatmul.mubr.f32.gmra.mrb[202].mxu0 %v16041_v37 }
 0xada   : > { %7967 = vmatmul.mubr.f32.gmra.mrb[202].mxu1 %v16041_v37  ;;  %7319 = vmatprep.mubr.f32.mxu0 %v15648_v60 }
 0xadb   : > { %7972 = vmatprep.mubr.f32.mxu1 %v15648_v60 }
 0xae1   : > { %7320 = vmatmul.mubr.f32.gmra.mrb[202].mxu0 %v16042_v18 }
 0xae2   : > { %7973 = vmatmul.mubr.f32.gmra.mrb[202].mxu1 %v16042_v18  ;;  %7325 = vmatprep.mubr.f32.mxu0 %v15648_v60 }
 0xae3   : > { %7978 = vmatprep.mubr.f32.mxu1 %v15648_v60 }
 0xae9   : > { %7326 = vmatmul.mubr.f32.gmra.mrb[202].mxu0 %v16043_v54 }
 0xaea   : > { %7979 = vmatmul.mubr.f32.gmra.mrb[202].mxu1 %v16043_v54  ;;  %7331 = vmatprep.mubr.f32.mxu0 %v15648_v60 }
 0xaeb   : > { %7984 = vmatprep.mubr.f32.mxu1 %v15648_v60 }
 0xaf1   : > { %7332 = vmatmul.mubr.f32.gmra.mrb[202].mxu0 %v16044_v22 }
 0xaf2   : > { %7985 = vmatmul.mubr.f32.gmra.mrb[202].mxu1 %v16044_v22  ;;  %7337 = vmatprep.mubr.f32.mxu0 %v15648_v60 }
 0xaf3   : > { %7990 = vmatprep.mubr.f32.mxu1 %v15648_v60 }
 0xaf9   : > { %7338 = vmatmul.mubr.f32.gmra.mrb[202].mxu0 %v16045_v10 }
 0xafa   : > { %7991 = vmatmul.mubr.f32.gmra.mrb[202].mxu1 %v16045_v10  ;;  %7343 = vmatprep.mubr.f32.mxu0 %v15648_v60 }
 0xafb   : > { %7996 = vmatprep.mubr.f32.mxu1 %v15648_v60 }
 0xb01   : > { %7344 = vmatmul.mubr.f32.gmra.mrb[202].mxu0 %v16046_v40 }
 0xb02   : > { %7997 = vmatmul.mubr.f32.gmra.mrb[202].mxu1 %v16046_v40  ;;  %7349 = vmatprep.mubr.f32.mxu0 %v15648_v60 }
 0xb03   : > { %8002 = vmatprep.mubr.f32.mxu1 %v15648_v60 }
 0xb09   : > { %7350 = vmatmul.mubr.f32.gmra.mrb[202].mxu0 %v16047_v47 }
 0xb0a   : > { %8003 = vmatmul.mubr.f32.gmra.mrb[202].mxu1 %v16047_v47  ;;  %7355 = vmatprep.mubr.f32.mxu0 %v15648_v60 }
 0xb0b   : > { %8008 = vmatprep.mubr.f32.mxu1 %v15648_v60 }
 0xb11   : > { %7356 = vmatmul.mubr.f32.gmra.mrb[202].mxu0 %v16048_v55 }
 0xb12   : > { %8009 = vmatmul.mubr.f32.gmra.mrb[202].mxu1 %v16048_v55  ;;  %7361 = vmatprep.mubr.f32.mxu0 %v15648_v60 }
 0xb13   : > { %8014 = vmatprep.mubr.f32.mxu1 %v15648_v60 }
 0xb19   : > { %7362 = vmatmul.mubr.f32.gmra.mrb[202].mxu0 %v16049_v8 }
 0xb1a   : > { %8015 = vmatmul.mubr.f32.gmra.mrb[202].mxu1 %v16049_v8  ;;  %7367 = vmatprep.mubr.f32.mxu0 %v15648_v60 }
 0xb1b   : > { %8020 = vmatprep.mubr.f32.mxu1 %v15648_v60 }
 0xb21   : > { %7368 = vmatmul.mubr.f32.gmra.mrb[202].mxu0 %v16050_v34 }
 0xb22   : > { %8021 = vmatmul.mubr.f32.gmra.mrb[202].mxu1 %v16050_v34  ;;  %7373 = vmatprep.mubr.f32.mxu0 %v15648_v60 }
 0xb23   : > { %8026 = vmatprep.mubr.f32.mxu1 %v15648_v60 }
 0xb29   : > { %7374 = vmatmul.mubr.f32.gmra.mrb[202].mxu0 %v16051_v11 }
 0xb2a   : > { %8027 = vmatmul.mubr.f32.gmra.mrb[202].mxu1 %v16051_v11  ;;  %7379 = vmatprep.mubr.f32.mxu0 %v15648_v60 }
 0xb2b   : > { %8032 = vmatprep.mubr.f32.mxu1 %v15648_v60 }
 0xb31   : > { %7380 = vmatmul.mubr.f32.gmra.mrb[202].mxu0 %v16052_v12 }
 0xb32   : > { %8033 = vmatmul.mubr.f32.gmra.mrb[202].mxu1 %v16052_v12  ;;  %7385 = vmatprep.mubr.f32.mxu0 %v15648_v60 }
 0xb33   : > { %8038 = vmatprep.mubr.f32.mxu1 %v15648_v60 }
 0xb39   : > { %7386 = vmatmul.mubr.f32.gmra.mrb[202].mxu0 %v16053_v13 }
 0xb3a   : > { %8039 = vmatmul.mubr.f32.gmra.mrb[202].mxu1 %v16053_v13  ;;  %7391 = vmatprep.mubr.f32.mxu0 %v15648_v60  ;;  %v16067_v13 = vld [vmem:[#allocation127_spill] sm:$0xff] }
 0xb3b   : > { %8044 = vmatprep.mubr.f32.mxu1 %v15648_v60 }
 0xb41   : > { %7392 = vmatmul.mubr.f32.gmra.mrb[202].mxu0 %v16054_v19 }
 0xb42   : > { %8045 = vmatmul.mubr.f32.gmra.mrb[202].mxu1 %v16054_v19  ;;  %7397 = vmatprep.mubr.f32.mxu0 %v15648_v60  ;;  %v16068_v19 = vld [vmem:[#allocation131_spill] sm:$0xff] }
 0xb43   : > { %8050 = vmatprep.mubr.f32.mxu1 %v15648_v60 }
 0xb49   : > { %7398 = vmatmul.mubr.f32.gmra.mrb[202].mxu0 %v16055_v31 }
 0xb4a   : > { %8051 = vmatmul.mubr.f32.gmra.mrb[202].mxu1 %v16055_v31  ;;  %7403 = vmatprep.mubr.f32.mxu0 %v15648_v60  ;;  %v16073_v31 = vld [vmem:[#allocation151_spill] sm:$0xff] }
 0xb4b   : > { %8056 = vmatprep.mubr.f32.mxu1 %v15648_v60 }
 0xb51   : > { %7404 = vmatmul.mubr.f32.gmra.mrb[202].mxu0 %v16056_v25 }
 0xb52   : > { %8057 = vmatmul.mubr.f32.gmra.mrb[202].mxu1 %v16056_v25  ;;  %7409 = vmatprep.mubr.f32.mxu0 %v15648_v60  ;;  %v16074_v25 = vld [vmem:[#allocation155_spill] sm:$0xff] }
 0xb53   : > { %8062 = vmatprep.mubr.f32.mxu1 %v15648_v60 }
 0xb59   : > { %7410 = vmatmul.mubr.f32.gmra.mrb[202].mxu0 %v16057_v26 }
 0xb5a   : > { %8063 = vmatmul.mubr.f32.gmra.mrb[202].mxu1 %v16057_v26  ;;  %7415 = vmatprep.mubr.f32.mxu0 %v15648_v60  ;;  %v16075_v26 = vld [vmem:[#allocation159_spill] sm:$0xff] }
 0xb5b   : > { %8068 = vmatprep.mubr.f32.mxu1 %v15648_v60 }
 0xb61   : > { %7416 = vmatmul.mubr.f32.gmra.mrb[202].mxu0 %v16058_v39 }
 0xb62   : > { %8069 = vmatmul.mubr.f32.gmra.mrb[202].mxu1 %v16058_v39  ;;  %7421 = vmatprep.mubr.f32.mxu0 %v15648_v60  ;;  %v404_v39 = vld [vmem:[%s15075_s3 + $0xa0] sm:$0xff] }
 0xb63   : > { %8074 = vmatprep.mubr.f32.mxu1 %v15648_v60 }
 0xb69   : > { %7422 = vmatmul.mubr.f32.gmra.mrb[202].mxu0 %v16059_v17 }
 0xb6a   : > { %8075 = vmatmul.mubr.f32.gmra.mrb[202].mxu1 %v16059_v17  ;;  %7427 = vmatprep.mubr.f32.mxu0 %v15648_v60  ;;  %v405_v17 = vld [vmem:[%s15075_s3 + $0xa8] sm:$0xff] }
 0xb6b   : > { %8080 = vmatprep.mubr.f32.mxu1 %v15648_v60 }
 0xb71   : > { %7428 = vmatmul.mubr.f32.gmra.mrb[202].mxu0 %v16060_v21 }
 0xb72   : > { %8081 = vmatmul.mubr.f32.gmra.mrb[202].mxu1 %v16060_v21  ;;  %7433 = vmatprep.mubr.f32.mxu0 %v15648_v60  ;;  %v388_v21 = vld [vmem:[%s15075_s3 + $0x20] sm:$0xff] }
 0xb73   : > { %8086 = vmatprep.mubr.f32.mxu1 %v15648_v60 }
 0xb79   : > { %7434 = vmatmul.mubr.f32.gmra.mrb[202].mxu0 %v16061_v46 }
 0xb7a   : > { %8087 = vmatmul.mubr.f32.gmra.mrb[202].mxu1 %v16061_v46  ;;  %7439 = vmatprep.mubr.f32.mxu0 %v15648_v60  ;;  %v9726_v46 = vpack.c.bf16 %v405_v17, %v404_v39  ;;  %v425_v39 = vld [vmem:[%s15075_s3 + $0x148] sm:$0xff] }
 0xb7b   : > { %8092 = vmatprep.mubr.f32.mxu1 %v15648_v60 }
 0xb7c   : > { %9727 = vmatprep.subr.bf16.mxu0 %v9726_v46  ;;  %v16101_v46 = vld [vmem:[#allocation244_spill] sm:$0xff] }
 0xb81   : > { %7440 = vmatmul.mubr.f32.gmra.mrb[202].mxu0 %v16062_v49 }
 0xb82   : > { %8093 = vmatmul.mubr.f32.gmra.mrb[202].mxu1 %v16062_v49  ;;  %7445 = vmatprep.mubr.f32.mxu0 %v15648_v60  ;;  %v389_v49 = vld [vmem:[%s15075_s3 + $0x28] sm:$0xff] }
 0xb83   : > { %8098 = vmatprep.mubr.f32.mxu1 %v15648_v60  ;;  %v9728_v2 = vpack.c.bf16 %v389_v49, %v388_v21  ;;  %v16102_v49 = vld [vmem:[#allocation247_spill] sm:$0xff] }
 0xb85   : > { %9729 = vmatpush3.bf16.msra.mxu0 %v9728_v2  ;;  %v16105_v2 = vld [vmem:[#allocation256_spill] sm:$0xff] }
 0xb89   : > { %7446 = vmatmul.mubr.f32.gmra.mrb[202].mxu0 %v16063_v53 }
 0xb8a   : > { %8099 = vmatmul.mubr.f32.gmra.mrb[202].mxu1 %v16063_v53  ;;  %7451 = vmatprep.mubr.f32.mxu0 %v15648_v60  ;;  %v436_v53 = vld [vmem:[%s15075_s3 + $0x1a0] sm:$0xff] }
 0xb8b   : > { %8104 = vmatprep.mubr.f32.mxu1 %v15648_v60  ;;  %v9758_v4 = vpack.c.bf16 %v437_v58, %v436_v53  ;;  %v16103_v53 = vld [vmem:[#allocation250_spill] sm:$0xff]  ;;  %v16104_v58 = vld [vmem:[#allocation253_spill] sm:$0xff] }
 0xb8d   : > { %9759 = vmatprep.subr.bf16.mxu1 %v9758_v4  ;;  %v16106_v4 = vld [vmem:[#allocation259_spill] sm:$0xff] }
 0xb8e   : > { %9761 = vmatpush3.bf16.msra.mxu1 %v9760_v33  ;;  %v16109_v33 = vld [vmem:[#allocation268_spill] sm:$0xff] }
 0xb91   : > { %7452 = vmatmul.mubr.f32.gmra.mrb[202].mxu0 %v16064_v15 }
 0xb92   : > { %8105 = vmatmul.mubr.f32.gmra.mrb[202].mxu1 %v16064_v15  ;;  %7457 = vmatprep.mubr.f32.mxu0 %v15648_v60  ;;  %v16082_v15 = vld [vmem:[#allocation187_spill] sm:$0xff] }
 0xb93   : > { %8110 = vmatprep.mubr.f32.mxu1 %v15648_v60 }
 0xb98   : > { %v6163_v29 = vpop.f32.mrb[200].mxu0 }
 0xb99   : > { %v6816_v36 = vpop.f32.mrb[200].mxu1  ;;  %v6918_v42 = vrot.slane %v6163_v29, 4  ;;  %v6165_v59 = vpop.f32.mrb[201].mxu0  ;;  %7458 = vmatmul.mubr.f32.gmra.mrb[202].mxu0 %v16065_v44 }
 0xb9a   : > { %v7124_v51 = vrot.slane %v6816_v36, 4  ;;  %v6818_v14 = vpop.f32.mrb[201].mxu1  ;;  %8111 = vmatmul.mubr.f32.gmra.mrb[202].mxu1 %v16065_v44  ;;  %v7021_v16 = vrot.slane %v6165_v59, 4  ;;  %7463 = vmatprep.mubr.f32.mxu0 %v15648_v60  ;;  %v407_v44 = vld [vmem:[%s15075_s3 + $0xb8] sm:$0xff] }
 0xb9b   : > { %v7227_v32 = vrot.slane %v6818_v14, 4  ;;  %8116 = vmatprep.mubr.f32.mxu1 %v15648_v60  ;;  %v6919_v50 = vadd.f32 %v6918_v42, %v6163_v29  ;;  %v16083_v29 = vld [vmem:[#allocation190_spill] sm:$0xff]  ;;  %v16085_v42 = vld [vmem:[#allocation196_spill] sm:$0xff] }
 0xb9c   : > { %v7125_v37 = vadd.f32 %v7124_v51, %v6816_v36  ;;  %v7022_v18 = vadd.f32 %v7021_v16, %v6165_v59  ;;  %v16084_v36 = vld [vmem:[#allocation193_spill] sm:$0xff]  ;;  %v16086_v51 = vld [vmem:[#allocation199_spill] sm:$0xff]  ;;  %v16087_v59 = vld [vmem:[#allocation202_spill] sm:$0xff] }
 0xb9d   : > { %v7228_v54 = vadd.f32 %v7227_v32, %v6818_v14  ;;  %v6920_v22 = vrot.slane %v6919_v50, 2  ;;  %v406_v14 = vld [vmem:[%s15075_s3 + $0xb0] sm:$0xff] }
 0xb9e   : > { %v7126_v10 = vrot.slane %v7125_v37, 2  ;;  %v7023_v40 = vrot.slane %v7022_v18, 2  ;;  %v9730_v16 = vpack.c.bf16 %v407_v44, %v406_v14  ;;  %v390_v32 = vld [vmem:[%s15075_s3 + $0x30] sm:$0xff]  ;;  %v427_v44 = vld [vmem:[%s15075_s3 + $0x158] sm:$0xff] }
 0xb9f   : > { %v7229_v47 = vrot.slane %v7228_v54, 2  ;;  %v6921_v55 = vadd.f32 %v6920_v22, %v6919_v50  ;;  %v391_v50 = vld [vmem:[%s15075_s3 + $0x38] sm:$0xff]  ;;  %v426_v14 = vld [vmem:[%s15075_s3 + $0x150] sm:$0xff] }
 0xba0   : > { %v7127_v8 = vadd.f32 %v7126_v10, %v7125_v37  ;;  %v7024_v34 = vadd.f32 %v7023_v40, %v7022_v18  ;;  %v9732_v37 = vpack.c.bf16 %v391_v50, %v390_v32  ;;  %9731 = vmatprep.subr.bf16.mxu0 %v9730_v16  ;;  %v16088_v18 = vld [vmem:[#allocation205_spill] sm:$0xff]  ;;  %v439_v22 = vld [vmem:[%s15075_s3 + $0x1b8] sm:$0xff]  ;;  %v422_v10 = vld [vmem:[%s15075_s3 + $0x130] sm:$0xff]  ;;  %v9772_v16 = vpack.c.bf16 %v427_v44, %v426_v14 }
 0xba1   : > { %v7230_v11 = vadd.f32 %v7229_v47, %v7228_v54  ;;  %v6922_v61 = vrot.slane %v6921_v55, 1  ;;  %7464 = vmatmul.mubr.f32.gmra.mrb[202].mxu0 %v16066_v23  ;;  %v438_v54 = vld [vmem:[%s15075_s3 + $0x1b0] sm:$0xff]  ;;  %v423_v47 = vld [vmem:[%s15075_s3 + $0x138] sm:$0xff] }
 0xba2   : > { %v7128_v0 = vrot.slane %v7127_v8, 1  ;;  %8117 = vmatmul.mubr.f32.gmra.mrb[202].mxu1 %v16066_v23  ;;  %v7025_v7 = vrot.slane %v7024_v34, 1  ;;  %7469 = vmatprep.mubr.f32.mxu0 %v15648_v60  ;;  %v9762_v40 = vpack.c.bf16 %v439_v22, %v438_v54  ;;  %v16094_v23 = vld [vmem:[#allocation223_spill] sm:$0xff]  ;;  %v16113_v32 = vld [vmem:[#allocation280_spill] sm:$0xff] }
 0xba3   : > { %v7231_v45 = vrot.slane %v7230_v11, 1  ;;  %8122 = vmatprep.mubr.f32.mxu1 %v15648_v60  ;;  %v6923_v52 = vadd.f32 %v6922_v61, %v6921_v55  ;;  %9733 = vmatpush3.bf16.msra.mxu0 %v9732_v37  ;;  %v9764_v55 = vpack.c.bf16 %v423_v47, %v422_v10  ;;  %v16092_v61 = vld [vmem:[#allocation217_spill] sm:$0xff]  ;;  %v16114_v50 = vld [vmem:[#allocation283_spill] sm:$0xff]  ;;  %v16115_v37 = vld [vmem:[#allocation286_spill] sm:$0xff] }
 0xba4   : > { %v7129_v3 = vadd.f32 %v7128_v0, %v7127_v8  ;;  %v7026_v24 = vadd.f32 %v7025_v7, %v7024_v34  ;;  %9763 = vmatprep.subr.bf16.mxu1 %v9762_v40  ;;  %v16089_v8 = vld [vmem:[#allocation208_spill] sm:$0xff]  ;;  %v16090_v34 = vld [vmem:[#allocation211_spill] sm:$0xff]  ;;  %v16095_v7 = vld [vmem:[#allocation226_spill] sm:$0xff] }
 0xba5   : > { %v7232_v56 = vadd.f32 %v7231_v45, %v7230_v11  ;;  %v14585_v41 = vadd.f32 %v6923_v52, %v14136_v5  ;;  %v16069_v5 = vld [vmem:[#allocation135_spill] sm:$0xff]  ;;  %9765 = vmatpush3.bf16.msra.mxu1 %v9764_v55  ;;  %v16091_v11 = vld [vmem:[#allocation214_spill] sm:$0xff]  ;;  %v16093_v0 = vld [vmem:[#allocation220_spill] sm:$0xff] }
 0xba6   : > { %v14588_v62 = vadd.f32 %v7129_v3, %v14138_v27  ;;  %v14591_v48 = vadd.f32 %v7026_v24, %v14140_v30  ;;  %v16070_v27 = vld [vmem:[#allocation139_spill] sm:$0xff]  ;;  %v16096_v45 = vld [vmem:[#allocation229_spill] sm:$0xff]  ;;  %v16097_v52 = vld [vmem:[#allocation232_spill] sm:$0xff] }
 0xba7   : > { %v14594_v12 = vadd.f32 %v7232_v56, %v14142_v38  ;;  %v16071_v30 = vld [vmem:[#allocation143_spill] sm:$0xff]  ;;  %v16099_v24 = vld [vmem:[#allocation238_spill] sm:$0xff]  ;;  %v408_v56 = vld [vmem:[%s15075_s3 + $0xc0] sm:$0xff] }
 0xba8   : > { %v16072_v38 = vld [vmem:[#allocation147_spill] sm:$0xff]  ;;  %v16117_v54 = vld [vmem:[#allocation292_spill] sm:$0xff]  ;;  %v16119_v10 = vld [vmem:[#allocation298_spill] sm:$0xff] }
 0xba9   : > { %7470 = vmatmul.mubr.f32.gmra.mrb[202].mxu0 %v16067_v13  ;;  %v16098_v3 = vld [vmem:[#allocation235_spill] sm:$0xff]  ;;  %v16120_v40 = vld [vmem:[#allocation301_spill] sm:$0xff] }
 0xbaa   : > { %8123 = vmatmul.mubr.f32.gmra.mrb[202].mxu1 %v16067_v13  ;;  %7475 = vmatprep.mubr.f32.mxu0 %v15648_v60  ;;  %v409_v13 = vld [vmem:[%s15075_s3 + $0xc8] sm:$0xff]  ;;  %v16118_v22 = vld [vmem:[#allocation295_spill] sm:$0xff]  ;;  %v412_v47 = vld [vmem:[%s15075_s3 + $0xe0] sm:$0xff] }
 0xbab   : > { %8128 = vmatprep.mubr.f32.mxu1 %v15648_v60  ;;  %v413_v55 = vld [vmem:[%s15075_s3 + $0xe8] sm:$0xff] }
 0xbb1   : > { %7476 = vmatmul.mubr.f32.gmra.mrb[202].mxu0 %v16068_v19 }
 0xbb2   : > { %8129 = vmatmul.mubr.f32.gmra.mrb[202].mxu1 %v16068_v19  ;;  %7481 = vmatprep.mubr.f32.mxu0 %v15648_v60  ;;  %v9734_v19 = vpack.c.bf16 %v409_v13, %v408_v56  ;;  %v415_v56 = vld [vmem:[%s15075_s3 + $0xf8] sm:$0xff]  ;;  %v398_v13 = vld [vmem:[%s15075_s3 + $0x70] sm:$0xff] }
 0xbb3   : > { %8134 = vmatprep.mubr.f32.mxu1 %v15648_v60 }
 0xbb4   : > { %9735 = vmatprep.subr.bf16.mxu0 %v9734_v19  ;;  %v399_v19 = vld [vmem:[%s15075_s3 + $0x78] sm:$0xff] }
 0xbb9   : > { %7482 = vmatmul.mubr.f32.gmra.mrb[202].mxu0 %v16069_v5 }
 0xbba   : > { %8135 = vmatmul.mubr.f32.gmra.mrb[202].mxu1 %v16069_v5  ;;  %7487 = vmatprep.mubr.f32.mxu0 %v15648_v60  ;;  %v16100_v5 = vld [vmem:[#allocation241_spill] sm:$0xff] }
 0xbbb   : > { %8140 = vmatprep.mubr.f32.mxu1 %v15648_v60 }
 0xbc1   : > { %7488 = vmatmul.mubr.f32.gmra.mrb[202].mxu0 %v16070_v27 }
 0xbc2   : > { %8141 = vmatmul.mubr.f32.gmra.mrb[202].mxu1 %v16070_v27  ;;  %7493 = vmatprep.mubr.f32.mxu0 %v15648_v60  ;;  %v392_v27 = vld [vmem:[%s15075_s3 + $0x40] sm:$0xff] }
 0xbc3   : > { %8146 = vmatprep.mubr.f32.mxu1 %v15648_v60 }
 0xbc9   : > { %7494 = vmatmul.mubr.f32.gmra.mrb[202].mxu0 %v16071_v30 }
 0xbca   : > { %8147 = vmatmul.mubr.f32.gmra.mrb[202].mxu1 %v16071_v30  ;;  %7499 = vmatprep.mubr.f32.mxu0 %v15648_v60  ;;  %v393_v30 = vld [vmem:[%s15075_s3 + $0x48] sm:$0xff] }
 0xbcb   : > { %8152 = vmatprep.mubr.f32.mxu1 %v15648_v60 }
 0xbd1   : > { %7500 = vmatmul.mubr.f32.gmra.mrb[202].mxu0 %v16072_v38 }
 0xbd2   : > { %8153 = vmatmul.mubr.f32.gmra.mrb[202].mxu1 %v16072_v38  ;;  %7505 = vmatprep.mubr.f32.mxu0 %v15648_v60  ;;  %v440_v38 = vld [vmem:[%s15075_s3 + $0x1c0] sm:$0xff] }
 0xbd3   : > { %8158 = vmatprep.mubr.f32.mxu1 %v15648_v60 }
 0xbd9   : > { %7506 = vmatmul.mubr.f32.gmra.mrb[202].mxu0 %v16073_v31 }
 0xbda   : > { %8159 = vmatmul.mubr.f32.gmra.mrb[202].mxu1 %v16073_v31  ;;  %7511 = vmatprep.mubr.f32.mxu0 %v15648_v60  ;;  %v9736_v31 = vpack.c.bf16 %v393_v30, %v392_v27  ;;  %v446_v27 = vld [vmem:[%s15075_s3 + $0x1f0] sm:$0xff]  ;;  %v447_v30 = vld [vmem:[%s15075_s3 + $0x1f8] sm:$0xff] }
 0xbdb   : > { %8164 = vmatprep.mubr.f32.mxu1 %v15648_v60 }
 0xbdc   : > { %9737 = vmatpush3.bf16.msra.mxu0 %v9736_v31  ;;  %v9778_v31 = vpack.c.bf16 %v447_v30, %v446_v27 }
 0xbe1   : > { %7512 = vmatmul.mubr.f32.gmra.mrb[202].mxu0 %v16074_v25 }
 0xbe2   : > { %8165 = vmatmul.mubr.f32.gmra.mrb[202].mxu1 %v16074_v25  ;;  %7517 = vmatprep.mubr.f32.mxu0 %v15648_v60  ;;  %v441_v25 = vld [vmem:[%s15075_s3 + $0x1c8] sm:$0xff] }
 0xbe3   : > { %8170 = vmatprep.mubr.f32.mxu1 %v15648_v60  ;;  %v9766_v17 = vpack.c.bf16 %v441_v25, %v440_v38  ;;  %v430_v38 = vld [vmem:[%s15075_s3 + $0x170] sm:$0xff]  ;;  %v431_v25 = vld [vmem:[%s15075_s3 + $0x178] sm:$0xff] }
 0xbe5   : > { %9767 = vmatprep.subr.bf16.mxu1 %v9766_v17  ;;  %v16121_v17 = vld [vmem:[#allocation304_spill] sm:$0xff] }
 0xbe9   : > { %7518 = vmatmul.mubr.f32.gmra.mrb[202].mxu0 %v16075_v26 }
 0xbea   : > { %8171 = vmatmul.mubr.f32.gmra.mrb[202].mxu1 %v16075_v26  ;;  %7523 = vmatprep.mubr.f32.mxu0 %v15648_v60  ;;  %v424_v26 = vld [vmem:[%s15075_s3 + $0x140] sm:$0xff] }
 0xbeb   : > { %8176 = vmatprep.mubr.f32.mxu1 %v15648_v60  ;;  %v9768_v21 = vpack.c.bf16 %v425_v39, %v424_v26  ;;  %v9748_v26 = vpack.c.bf16 %v399_v19, %v398_v13  ;;  %v9780_v39 = vpack.c.bf16 %v431_v25, %v430_v38 }
 0xbed   : > { %9769 = vmatpush3.bf16.msra.mxu1 %v9768_v21  ;;  %v16122_v21 = vld [vmem:[#allocation307_spill] sm:$0xff] }
 0xbf1   : > { %7524 = vmatmul.mubr.f32.gmra.mrb[202].mxu0 %v16076_v35 }
 0xbf2   : > { %8177 = vmatmul.mubr.f32.gmra.mrb[202].mxu1 %v16076_v35  ;;  %7529 = vmatprep.mubr.f32.mxu0 %v15648_v60  ;;  %v16110_v35 = vld [vmem:[#allocation271_spill] sm:$0xff] }
 0xbf3   : > { %8182 = vmatprep.mubr.f32.mxu1 %v15648_v60 }
 0xbf9   : > { %7530 = vmatmul.mubr.f32.gmra.mrb[202].mxu0 %v16077_v57 }
 0xbfa   : > { %8183 = vmatmul.mubr.f32.gmra.mrb[202].mxu1 %v16077_v57  ;;  %7535 = vmatprep.mubr.f32.mxu0 %v15648_v60  ;;  %v16111_v57 = vld [vmem:[#allocation274_spill] sm:$0xff] }
 0xbfb   : > { %8188 = vmatprep.mubr.f32.mxu1 %v15648_v60 }
 0xc01   : > { %7536 = vmatmul.mubr.f32.gmra.mrb[202].mxu0 %v16078_v63 }
 0xc02   : > { %8189 = vmatmul.mubr.f32.gmra.mrb[202].mxu1 %v16078_v63  ;;  %7541 = vmatprep.mubr.f32.mxu0 %v15648_v60  ;;  %v16112_v63 = vld [vmem:[#allocation277_spill] sm:$0xff] }
 0xc03   : > { %8194 = vmatprep.mubr.f32.mxu1 %v15648_v60 }
 0xc09   : > { %7542 = vmatmul.mubr.f32.gmra.mrb[202].mxu0 %v16079_v43 }
 0xc0a   : > { %8195 = vmatmul.mubr.f32.gmra.mrb[202].mxu1 %v16079_v43  ;;  %7547 = vmatprep.mubr.f32.mxu0 %v15648_v60  ;;  %v410_v43 = vld [vmem:[%s15075_s3 + $0xd0] sm:$0xff] }
 0xc0b   : > { %8200 = vmatprep.mubr.f32.mxu1 %v15648_v60 }
 0xc11   : > { %7548 = vmatmul.mubr.f32.gmra.mrb[202].mxu0 %v16080_v1 }
 0xc12   : > { %8201 = vmatmul.mubr.f32.gmra.mrb[202].mxu1 %v16080_v1  ;;  %7553 = vmatprep.mubr.f32.mxu0 %v15648_v60  ;;  %v411_v1 = vld [vmem:[%s15075_s3 + $0xd8] sm:$0xff] }
 0xc13   : > { %8206 = vmatprep.mubr.f32.mxu1 %v15648_v60 }
 0xc19   : > { %7554 = vmatmul.mubr.f32.gmra.mrb[202].mxu0 %v16081_v9 }
 0xc1a   : > { %8207 = vmatmul.mubr.f32.gmra.mrb[202].mxu1 %v16081_v9  ;;  %7559 = vmatprep.mubr.f32.mxu0 %v15648_v60  ;;  %v394_v9 = vld [vmem:[%s15075_s3 + $0x50] sm:$0xff] }
 0xc1b   : > { %8212 = vmatprep.mubr.f32.mxu1 %v15648_v60 }
 0xc21   : > { %7560 = vmatmul.mubr.f32.gmra.mrb[202].mxu0 %v16082_v15 }
 0xc22   : > { %8213 = vmatmul.mubr.f32.gmra.mrb[202].mxu1 %v16082_v15  ;;  %7565 = vmatprep.mubr.f32.mxu0 %v15648_v60  ;;  %v9738_v15 = vpack.c.bf16 %v411_v1, %v410_v43  ;;  %v16135_v43 = vld [vmem:[#allocation342_spill] sm:$0xff] }
 0xc23   : > { %8218 = vmatprep.mubr.f32.mxu1 %v15648_v60 }
 0xc24   : > { %9739 = vmatprep.subr.bf16.mxu0 %v9738_v15 }
 0xc29   : > { %7566 = vmatmul.mubr.f32.gmra.mrb[202].mxu0 %v16083_v29 }
 0xc2a   : > { %8219 = vmatmul.mubr.f32.gmra.mrb[202].mxu1 %v16083_v29  ;;  %7571 = vmatprep.mubr.f32.mxu0 %v15648_v60  ;;  %v395_v29 = vld [vmem:[%s15075_s3 + $0x58] sm:$0xff] }
 0xc2b   : > { %8224 = vmatprep.mubr.f32.mxu1 %v15648_v60 }
 0xc31   : > { %7572 = vmatmul.mubr.f32.gmra.mrb[202].mxu0 %v16084_v36 }
 0xc32   : > { %8225 = vmatmul.mubr.f32.gmra.mrb[202].mxu1 %v16084_v36  ;;  %7577 = vmatprep.mubr.f32.mxu0 %v15648_v60  ;;  %v442_v36 = vld [vmem:[%s15075_s3 + $0x1d0] sm:$0xff] }
 0xc33   : > { %8230 = vmatprep.mubr.f32.mxu1 %v15648_v60 }
 0xc39   : > { %7578 = vmatmul.mubr.f32.gmra.mrb[202].mxu0 %v16085_v42 }
 0xc3a   : > { %8231 = vmatmul.mubr.f32.gmra.mrb[202].mxu1 %v16085_v42  ;;  %7583 = vmatprep.mubr.f32.mxu0 %v15648_v60  ;;  %v443_v42 = vld [vmem:[%s15075_s3 + $0x1d8] sm:$0xff] }
 0xc3b   : > { %8236 = vmatprep.mubr.f32.mxu1 %v15648_v60 }
 0xc41   : > { %7584 = vmatmul.mubr.f32.gmra.mrb[202].mxu0 %v16086_v51 }
 0xc42   : > { %8237 = vmatmul.mubr.f32.gmra.mrb[202].mxu1 %v16086_v51  ;;  %7589 = vmatprep.mubr.f32.mxu0 %v15648_v60  ;;  %v9740_v51 = vpack.c.bf16 %v395_v29, %v394_v9 }
 0xc43   : > { %8242 = vmatprep.mubr.f32.mxu1 %v15648_v60 }
 0xc44   : > { %9741 = vmatpush3.bf16.msra.mxu0 %v9740_v51 }
 0xc49   : > { %7590 = vmatmul.mubr.f32.gmra.mrb[202].mxu0 %v16087_v59 }
 0xc4a   : > { %8243 = vmatmul.mubr.f32.gmra.mrb[202].mxu1 %v16087_v59  ;;  %7595 = vmatprep.mubr.f32.mxu0 %v15648_v60  ;;  %v9770_v59 = vpack.c.bf16 %v443_v42, %v442_v36 }
 0xc4b   : > { %8248 = vmatprep.mubr.f32.mxu1 %v15648_v60 }
 0xc4c   : > { %9771 = vmatprep.subr.bf16.mxu1 %v9770_v59 }
 0xc4d   : > { %9773 = vmatpush3.bf16.msra.mxu1 %v9772_v16 }
 0xc51   : > { %7596 = vmatmul.mubr.f32.gmra.mrb[202].mxu0 %v16088_v18 }
 0xc52   : > { %8249 = vmatmul.mubr.f32.gmra.mrb[202].mxu1 %v16088_v18  ;;  %7601 = vmatprep.mubr.f32.mxu0 %v15648_v60  ;;  %v16116_v18 = vld [vmem:[#allocation289_spill] sm:$0xff] }
 0xc53   : > { %8254 = vmatprep.mubr.f32.mxu1 %v15648_v60 }
 0xc59   : > { %7602 = vmatmul.mubr.f32.gmra.mrb[202].mxu0 %v16089_v8 }
 0xc5a   : > { %8255 = vmatmul.mubr.f32.gmra.mrb[202].mxu1 %v16089_v8  ;;  %7607 = vmatprep.mubr.f32.mxu0 %v15648_v60  ;;  %v396_v8 = vld [vmem:[%s15075_s3 + $0x60] sm:$0xff] }
 0xc5b   : > { %8260 = vmatprep.mubr.f32.mxu1 %v15648_v60 }
 0xc61   : > { %7608 = vmatmul.mubr.f32.gmra.mrb[202].mxu0 %v16090_v34 }
 0xc62   : > { %8261 = vmatmul.mubr.f32.gmra.mrb[202].mxu1 %v16090_v34  ;;  %7613 = vmatprep.mubr.f32.mxu0 %v15648_v60  ;;  %v9742_v34 = vpack.c.bf16 %v413_v55, %v412_v47 }
 0xc63   : > { %8266 = vmatprep.mubr.f32.mxu1 %v15648_v60 }
 0xc64   : > { %9743 = vmatprep.subr.bf16.mxu0 %v9742_v34 }
 0xc69   : > { %7614 = vmatmul.mubr.f32.gmra.mrb[202].mxu0 %v16091_v11 }
 0xc6a   : > { %8267 = vmatmul.mubr.f32.gmra.mrb[202].mxu1 %v16091_v11  ;;  %7619 = vmatprep.mubr.f32.mxu0 %v15648_v60  ;;  %v397_v11 = vld [vmem:[%s15075_s3 + $0x68] sm:$0xff] }
 0xc6b   : > { %8272 = vmatprep.mubr.f32.mxu1 %v15648_v60 }
 0xc71   : > { %7620 = vmatmul.mubr.f32.gmra.mrb[202].mxu0 %v16092_v61 }
 0xc72   : > { %8273 = vmatmul.mubr.f32.gmra.mrb[202].mxu1 %v16092_v61  ;;  %7625 = vmatprep.mubr.f32.mxu0 %v15648_v60  ;;  %v444_v61 = vld [vmem:[%s15075_s3 + $0x1e0] sm:$0xff] }
 0xc73   : > { %8278 = vmatprep.mubr.f32.mxu1 %v15648_v60 }
 0xc79   : > { %7626 = vmatmul.mubr.f32.gmra.mrb[202].mxu0 %v16093_v0 }
 0xc7a   : > { %8279 = vmatmul.mubr.f32.gmra.mrb[202].mxu1 %v16093_v0  ;;  %7631 = vmatprep.mubr.f32.mxu0 %v15648_v60  ;;  %v445_v0 = vld [vmem:[%s15075_s3 + $0x1e8] sm:$0xff] }
 0xc7b   : > { %8284 = vmatprep.mubr.f32.mxu1 %v15648_v60 }
 0xc81   : > { %7632 = vmatmul.mubr.f32.gmra.mrb[202].mxu0 %v16094_v23 }
 0xc82   : > { %8285 = vmatmul.mubr.f32.gmra.mrb[202].mxu1 %v16094_v23  ;;  %7637 = vmatprep.mubr.f32.mxu0 %v15648_v60  ;;  %v9744_v23 = vpack.c.bf16 %v397_v11, %v396_v8 }
 0xc83   : > { %8290 = vmatprep.mubr.f32.mxu1 %v15648_v60 }
 0xc84   : > { %9745 = vmatpush3.bf16.msra.mxu0 %v9744_v23 }
 0xc89   : > { %7638 = vmatmul.mubr.f32.gmra.mrb[202].mxu0 %v16095_v7 }
 0xc8a   : > { %8291 = vmatmul.mubr.f32.gmra.mrb[202].mxu1 %v16095_v7  ;;  %7643 = vmatprep.mubr.f32.mxu0 %v15648_v60  ;;  %v9774_v7 = vpack.c.bf16 %v445_v0, %v444_v61 }
 0xc8b   : > { %8296 = vmatprep.mubr.f32.mxu1 %v15648_v60 }
 0xc8c   : > { %9775 = vmatprep.subr.bf16.mxu1 %v9774_v7 }
 0xc91   : > { %7644 = vmatmul.mubr.f32.gmra.mrb[202].mxu0 %v16096_v45 }
 0xc92   : > { %8297 = vmatmul.mubr.f32.gmra.mrb[202].mxu1 %v16096_v45  ;;  %7649 = vmatprep.mubr.f32.mxu0 %v15648_v60  ;;  %v428_v45 = vld [vmem:[%s15075_s3 + $0x160] sm:$0xff] }
 0xc93   : > { %8302 = vmatprep.mubr.f32.mxu1 %v15648_v60 }
 0xc99   : > { %7650 = vmatmul.mubr.f32.gmra.mrb[202].mxu0 %v16097_v52 }
 0xc9a   : > { %8303 = vmatmul.mubr.f32.gmra.mrb[202].mxu1 %v16097_v52  ;;  %7655 = vmatprep.mubr.f32.mxu0 %v15648_v60  ;;  %v429_v52 = vld [vmem:[%s15075_s3 + $0x168] sm:$0xff] }
 0xc9b   : > { %8308 = vmatprep.mubr.f32.mxu1 %v15648_v60 }
 0xca1   : > { %7656 = vmatmul.mubr.f32.gmra.mrb[202].mxu0 %v16098_v3 }
 0xca2   : > { %8309 = vmatmul.mubr.f32.gmra.mrb[202].mxu1 %v16098_v3  ;;  %7661 = vmatprep.mubr.f32.mxu0 %v15648_v60  ;;  %v414_v3 = vld [vmem:[%s15075_s3 + $0xf0] sm:$0xff] }
 0xca3   : > { %8314 = vmatprep.mubr.f32.mxu1 %v15648_v60 }
 0xca9   : > { %7662 = vmatmul.mubr.f32.gmra.mrb[202].mxu0 %v16099_v24 }
 0xcaa   : > { %8315 = vmatmul.mubr.f32.gmra.mrb[202].mxu1 %v16099_v24  ;;  %7667 = vmatprep.mubr.f32.mxu0 %v15648_v60  ;;  %v9776_v24 = vpack.c.bf16 %v429_v52, %v428_v45 }
 0xcab   : > { %8320 = vmatprep.mubr.f32.mxu1 %v15648_v60 }
 0xcac   : > { %9777 = vmatpush3.bf16.msra.mxu1 %v9776_v24 }
 0xcad   : > { %9779 = vmatprep.subr.bf16.mxu1 %v9778_v31 }
 0xcb0   : > { %9781 = vmatpush3.bf16.msra.mxu1 %v9780_v39 }
 0xcb1   : > { %7668 = vmatmul.mubr.f32.gmra.mrb[202].mxu0 %v16100_v5 }
 0xcb2   : > { %8321 = vmatmul.mubr.f32.gmra.mrb[202].mxu1 %v16100_v5  ;;  %7673 = vmatprep.mubr.f32.mxu0 %v15648_v60  ;;  %v9746_v5 = vpack.c.bf16 %v415_v56, %v414_v3 }
 0xcb3   : > { %8326 = vmatprep.mubr.f32.mxu1 %v15648_v60 }
 0xcb4   : > { %9747 = vmatprep.subr.bf16.mxu0 %v9746_v5 }
 0xcb5   : > { %9749 = vmatpush3.bf16.msra.mxu0 %v9748_v26 }
 0xcb9   : > { %7674 = vmatmul.mubr.f32.gmra.mrb[202].mxu0 %v16101_v46 }
 0xcba   : > { %8327 = vmatmul.mubr.f32.gmra.mrb[202].mxu1 %v16101_v46  ;;  %7679 = vmatprep.mubr.f32.mxu0 %v15648_v60  ;;  %v16123_v46 = vld [vmem:[#allocation310_spill] sm:$0xff] }
 0xcbb   : > { %8332 = vmatprep.mubr.f32.mxu1 %v15648_v60 }
 0xcc1   : > { %7680 = vmatmul.mubr.f32.gmra.mrb[202].mxu0 %v16102_v49 }
 0xcc2   : > { %8333 = vmatmul.mubr.f32.gmra.mrb[202].mxu1 %v16102_v49  ;;  %7685 = vmatprep.mubr.f32.mxu0 %v15648_v60  ;;  %v16124_v49 = vld [vmem:[#allocation313_spill] sm:$0xff] }
 0xcc3   : > { %8338 = vmatprep.mubr.f32.mxu1 %v15648_v60 }
 0xcc9   : > { %7686 = vmatmul.mubr.f32.gmra.mrb[202].mxu0 %v16103_v53 }
 0xcca   : > { %8339 = vmatmul.mubr.f32.gmra.mrb[202].mxu1 %v16103_v53  ;;  %7691 = vmatprep.mubr.f32.mxu0 %v15648_v60  ;;  %v16125_v53 = vld [vmem:[#allocation316_spill] sm:$0xff] }
 0xccb   : > { %8344 = vmatprep.mubr.f32.mxu1 %v15648_v60 }
 0xcd1   : > { %7692 = vmatmul.mubr.f32.gmra.mrb[202].mxu0 %v16104_v58 }
 0xcd2   : > { %8345 = vmatmul.mubr.f32.gmra.mrb[202].mxu1 %v16104_v58  ;;  %7697 = vmatprep.mubr.f32.mxu0 %v15648_v60  ;;  %v16126_v58 = vld [vmem:[#allocation319_spill] sm:$0xff] }
 0xcd3   : > { %8350 = vmatprep.mubr.f32.mxu1 %v15648_v60 }
 0xcd9   : > { %7698 = vmatmul.mubr.f32.gmra.mrb[202].mxu0 %v16105_v2 }
 0xcda   : > { %8351 = vmatmul.mubr.f32.gmra.mrb[202].mxu1 %v16105_v2  ;;  %7703 = vmatprep.mubr.f32.mxu0 %v15648_v60  ;;  %v16127_v2 = vld [vmem:[#allocation322_spill] sm:$0xff] }
 0xcdb   : > { %8356 = vmatprep.mubr.f32.mxu1 %v15648_v60 }
 0xce1   : > { %7704 = vmatmul.mubr.f32.gmra.mrb[202].mxu0 %v16106_v4 }
 0xce2   : > { %8357 = vmatmul.mubr.f32.gmra.mrb[202].mxu1 %v16106_v4  ;;  %7709 = vmatprep.mubr.f32.mxu0 %v15648_v60  ;;  %v16128_v4 = vld [vmem:[#allocation325_spill] sm:$0xff] }
 0xce3   : > { %8362 = vmatprep.mubr.f32.mxu1 %v15648_v60 }
 0xce9   : > { %7710 = vmatmul.mubr.f32.gmra.mrb[202].mxu0 %v16107_v20 }
 0xcea   : > { %8363 = vmatmul.mubr.f32.gmra.mrb[202].mxu1 %v16107_v20  ;;  %7715 = vmatprep.mubr.f32.mxu0 %v15648_v60  ;;  %v16129_v20 = vld [vmem:[#allocation328_spill] sm:$0xff] }
 0xceb   : > { %8368 = vmatprep.mubr.f32.mxu1 %v15648_v60 }
 0xcf1   : > { %7716 = vmatmul.mubr.f32.gmra.mrb[202].mxu0 %v16108_v28 }
 0xcf2   : > { %8369 = vmatmul.mubr.f32.gmra.mrb[202].mxu1 %v16108_v28  ;;  %7721 = vmatprep.mubr.f32.mxu0 %v15648_v60  ;;  %v16130_v28 = vld [vmem:[#allocation104_spill] sm:$0xff] }
 0xcf3   : > { %8374 = vmatprep.mubr.f32.mxu1 %v15648_v60 }
 0xcf9   : > { %7722 = vmatmul.mubr.f32.gmra.mrb[202].mxu0 %v16109_v33 }
 0xcfa   : > { %8375 = vmatmul.mubr.f32.gmra.mrb[202].mxu1 %v16109_v33  ;;  %7727 = vmatprep.mubr.f32.mxu0 %v15648_v60  ;;  %v16131_v33 = vld [vmem:[#allocation333_spill] sm:$0xff] }
 0xcfb   : > { %8380 = vmatprep.mubr.f32.mxu1 %v15648_v60 }
 0xd01   : > { %7728 = vmatmul.mubr.f32.gmra.mrb[202].mxu0 %v16110_v35 }
 0xd02   : > { %8381 = vmatmul.mubr.f32.gmra.mrb[202].mxu1 %v16110_v35  ;;  %7733 = vmatprep.mubr.f32.mxu0 %v15648_v60  ;;  %v16132_v35 = vld [vmem:[#allocation108_spill] sm:$0xff] }
 0xd03   : > { %8386 = vmatprep.mubr.f32.mxu1 %v15648_v60 }
 0xd09   : > { %7734 = vmatmul.mubr.f32.gmra.mrb[202].mxu0 %v16111_v57 }
 0xd0a   : > { %8387 = vmatmul.mubr.f32.gmra.mrb[202].mxu1 %v16111_v57  ;;  %7739 = vmatprep.mubr.f32.mxu0 %v15648_v60  ;;  %v16133_v57 = vld [vmem:[#allocation338_spill] sm:$0xff] }
 0xd0b   : > { %8392 = vmatprep.mubr.f32.mxu1 %v15648_v60 }
 0xd11   : > { %7740 = vmatmul.mubr.f32.gmra.mrb[202].mxu0 %v16112_v63 }
 0xd12   : > { %8393 = vmatmul.mubr.f32.gmra.mrb[202].mxu1 %v16112_v63  ;;  %7745 = vmatprep.mubr.f32.mxu0 %v15648_v60  ;;  %v16134_v63 = vld [vmem:[#allocation112_spill] sm:$0xff] }
 0xd13   : > { %8398 = vmatprep.mubr.f32.mxu1 %v15648_v60 }
 0xd19   : > { %7746 = vmatmul.mubr.f32.gmra.mrb[202].mxu0 %v16113_v32 }
 0xd1a   : > { %8399 = vmatmul.mubr.f32.gmra.mrb[202].mxu1 %v16113_v32  ;;  %7751 = vmatprep.mubr.f32.mxu0 %v15648_v60 }
 0xd1b   : > { %8404 = vmatprep.mubr.f32.mxu1 %v15648_v60 }
 0xd21   : > { %7752 = vmatmul.mubr.f32.gmra.mrb[202].mxu0 %v16114_v50 }
 0xd22   : > { %8405 = vmatmul.mubr.f32.gmra.mrb[202].mxu1 %v16114_v50  ;;  %7757 = vmatprep.mubr.f32.mxu0 %v15648_v60 }
 0xd23   : > { %8410 = vmatprep.mubr.f32.mxu1 %v15648_v60 }
 0xd29   : > { %7758 = vmatmul.mubr.f32.gmra.mrb[202].mxu0 %v16115_v37 }
 0xd2a   : > { %8411 = vmatmul.mubr.f32.gmra.mrb[202].mxu1 %v16115_v37  ;;  %7763 = vmatprep.mubr.f32.mxu0 %v15648_v60 }
 0xd2b   : > { %8416 = vmatprep.mubr.f32.mxu1 %v15648_v60 }
 0xd31   : > { %7764 = vmatmul.mubr.f32.gmra.mrb[202].mxu0 %v16116_v18 }
 0xd32   : > { %8417 = vmatmul.mubr.f32.gmra.mrb[202].mxu1 %v16116_v18  ;;  %7769 = vmatprep.mubr.f32.mxu0 %v15648_v60 }
 0xd33   : > { %8422 = vmatprep.mubr.f32.mxu1 %v15648_v60 }
 0xd39   : > { %7770 = vmatmul.mubr.f32.gmra.mrb[202].mxu0 %v16117_v54 }
 0xd3a   : > { %8423 = vmatmul.mubr.f32.gmra.mrb[202].mxu1 %v16117_v54  ;;  %7775 = vmatprep.mubr.f32.mxu0 %v15648_v60 }
 0xd3b   : > { %8428 = vmatprep.mubr.f32.mxu1 %v15648_v60 }
 0xd41   : > { %7776 = vmatmul.mubr.f32.gmra.mrb[202].mxu0 %v16118_v22 }
 0xd42   : > { %8429 = vmatmul.mubr.f32.gmra.mrb[202].mxu1 %v16118_v22  ;;  %7781 = vmatprep.mubr.f32.mxu0 %v15648_v60 }
 0xd43   : > { %8434 = vmatprep.mubr.f32.mxu1 %v15648_v60 }
 0xd49   : > { %7782 = vmatmul.mubr.f32.gmra.mrb[202].mxu0 %v16119_v10 }
 0xd4a   : > { %8435 = vmatmul.mubr.f32.gmra.mrb[202].mxu1 %v16119_v10  ;;  %7787 = vmatprep.mubr.f32.mxu0 %v15648_v60 }
 0xd4b   : > { %8440 = vmatprep.mubr.f32.mxu1 %v15648_v60 }
 0xd51   : > { %7788 = vmatmul.mubr.f32.gmra.mrb[202].mxu0 %v16120_v40 }
 0xd52   : > { %8441 = vmatmul.mubr.f32.gmra.mrb[202].mxu1 %v16120_v40  ;;  %7793 = vmatprep.mubr.f32.mxu0 %v15648_v60 }
 0xd53   : > { %8446 = vmatprep.mubr.f32.mxu1 %v15648_v60 }
 0xd59   : > { %7794 = vmatmul.mubr.f32.gmra.mrb[202].mxu0 %v16121_v17 }
 0xd5a   : > { %8447 = vmatmul.mubr.f32.gmra.mrb[202].mxu1 %v16121_v17  ;;  %7799 = vmatprep.mubr.f32.mxu0 %v15648_v60 }
 0xd5b   : > { %8452 = vmatprep.mubr.f32.mxu1 %v15648_v60 }
 0xd61   : > { %7800 = vmatmul.mubr.f32.gmra.mrb[202].mxu0 %v16122_v21 }
 0xd62   : > { %8453 = vmatmul.mubr.f32.gmra.mrb[202].mxu1 %v16122_v21  ;;  %7805 = vmatprep.mubr.f32.mxu0 %v15648_v60 }
 0xd63   : > { %8458 = vmatprep.mubr.f32.mxu1 %v15648_v60 }
 0xd69   : > { %7806 = vmatmul.mubr.f32.gmra.mrb[202].mxu0 %v16123_v46 }
 0xd6a   : > { %8459 = vmatmul.mubr.f32.gmra.mrb[202].mxu1 %v16123_v46  ;;  %7811 = vmatprep.mubr.f32.mxu0 %v15648_v60 }
 0xd6b   : > { %8464 = vmatprep.mubr.f32.mxu1 %v15648_v60 }
 0xd71   : > { %7812 = vmatmul.mubr.f32.gmra.mrb[202].mxu0 %v16124_v49 }
 0xd72   : > { %8465 = vmatmul.mubr.f32.gmra.mrb[202].mxu1 %v16124_v49  ;;  %7817 = vmatprep.mubr.f32.mxu0 %v15648_v60 }
 0xd73   : > { %8470 = vmatprep.mubr.f32.mxu1 %v15648_v60 }
 0xd79   : > { %7818 = vmatmul.mubr.f32.gmra.mrb[202].mxu0 %v16125_v53 }
 0xd7a   : > { %8471 = vmatmul.mubr.f32.gmra.mrb[202].mxu1 %v16125_v53  ;;  %7823 = vmatprep.mubr.f32.mxu0 %v15648_v60 }
 0xd7b   : > { %8476 = vmatprep.mubr.f32.mxu1 %v15648_v60 }
 0xd81   : > { %7824 = vmatmul.mubr.f32.gmra.mrb[202].mxu0 %v16126_v58 }
 0xd82   : > { %8477 = vmatmul.mubr.f32.gmra.mrb[202].mxu1 %v16126_v58  ;;  %7829 = vmatprep.mubr.f32.mxu0 %v15648_v60 }
 0xd83   : > { %8482 = vmatprep.mubr.f32.mxu1 %v15648_v60 }
 0xd89   : > { %7830 = vmatmul.mubr.f32.gmra.mrb[202].mxu0 %v16127_v2 }
 0xd8a   : > { %8483 = vmatmul.mubr.f32.gmra.mrb[202].mxu1 %v16127_v2  ;;  %7835 = vmatprep.mubr.f32.mxu0 %v15648_v60 }
 0xd8b   : > { %8488 = vmatprep.mubr.f32.mxu1 %v15648_v60 }
 0xd91   : > { %7836 = vmatmul.mubr.f32.gmra.mrb[202].mxu0 %v16128_v4 }
 0xd92   : > { %8489 = vmatmul.mubr.f32.gmra.mrb[202].mxu1 %v16128_v4  ;;  %7841 = vmatprep.mubr.f32.mxu0 %v15648_v60 }
 0xd93   : > { %8494 = vmatprep.mubr.f32.mxu1 %v15648_v60 }
 0xd99   : > { %7842 = vmatmul.mubr.f32.gmra.mrb[202].mxu0 %v16129_v20 }
 0xd9a   : > { %8495 = vmatmul.mubr.f32.gmra.mrb[202].mxu1 %v16129_v20  ;;  %7847 = vmatprep.mubr.f32.mxu0 %v15648_v60 }
 0xd9b   : > { %8500 = vmatprep.mubr.f32.mxu1 %v15648_v60 }
 0xda1   : > { %7848 = vmatmul.mubr.f32.gmra.mrb[202].mxu0 %v16130_v28 }
 0xda2   : > { %8501 = vmatmul.mubr.f32.gmra.mrb[202].mxu1 %v16130_v28  ;;  %7853 = vmatprep.mubr.f32.mxu0 %v15648_v60 }
 0xda3   : > { %8506 = vmatprep.mubr.f32.mxu1 %v15648_v60 }
 0xda9   : > { %7854 = vmatmul.mubr.f32.gmra.mrb[202].mxu0 %v16131_v33 }
 0xdaa   : > { %8507 = vmatmul.mubr.f32.gmra.mrb[202].mxu1 %v16131_v33  ;;  %7859 = vmatprep.mubr.f32.mxu0 %v15648_v60 }
 0xdab   : > { %8512 = vmatprep.mubr.f32.mxu1 %v15648_v60 }
 0xdb1   : > { %7860 = vmatmul.mubr.f32.gmra.mrb[202].mxu0 %v16132_v35 }
 0xdb2   : > { %8513 = vmatmul.mubr.f32.gmra.mrb[202].mxu1 %v16132_v35  ;;  %7865 = vmatprep.mubr.f32.mxu0 %v15648_v60 }
 0xdb3   : > { %8518 = vmatprep.mubr.f32.mxu1 %v15648_v60 }
 0xdb9   : > { %7866 = vmatmul.mubr.f32.gmra.mrb[202].mxu0 %v16133_v57 }
 0xdba   : > { %8519 = vmatmul.mubr.f32.gmra.mrb[202].mxu1 %v16133_v57  ;;  %7871 = vmatprep.mubr.f32.mxu0 %v15648_v60 }
 0xdbb   : > { %8524 = vmatprep.mubr.f32.mxu1 %v15648_v60 }
 0xdc1   : > { %7872 = vmatmul.mubr.f32.gmra.mrb[202].mxu0 %v16134_v63 }
 0xdc2   : > { %8525 = vmatmul.mubr.f32.gmra.mrb[202].mxu1 %v16134_v63  ;;  %7877 = vmatprep.mubr.f32.mxu0 %v15648_v60 }
 0xdc3   : > { %8530 = vmatprep.mubr.f32.mxu1 %v15648_v60 }
 0xdc9   : > { %7878 = vmatmul.mubr.f32.gmra.mrb[202].mxu0 %v16135_v43 }
 0xdca   : > { %8531 = vmatmul.mubr.f32.gmra.mrb[202].mxu1 %v16135_v43  ;;  %7883 = vmatprep.mubr.f32.mxu0 %v15648_v60 }
 0xdcb   : > { %8536 = vmatprep.mubr.f32.mxu1 %v15648_v60 }
 0xdd1   : > { %7884 = vmatmul.mubr.f32.gmra.mrb[202].mxu0 %v13266_v6 }
 0xdd2   : > { %8537 = vmatmul.mubr.f32.gmra.mrb[202].mxu1 %v13266_v6 }
 0xea4   : > { %v7885_v1 = vpop.f32.mrb[202].mxu0 }
 0xea5   : > { %v8538_v9 = vpop.f32.mrb[202].mxu1  ;;  %v8640_v15 = vrot.slane %v7885_v1, 4  ;;  %v7887_v36 = vpop.f32.mrb[203].mxu0 }
 0xea6   : > { %v8846_v29 = vrot.slane %v8538_v9, 4  ;;  %v8540_v42 = vpop.f32.mrb[203].mxu1  ;;  %v8743_v51 = vrot.slane %v7887_v36, 4 }
 0xea7   : > { %v8949_v59 = vrot.slane %v8540_v42, 4  ;;  %v8641_v14 = vadd.f32 %v8640_v15, %v7885_v1 }
 0xea8   : > { %v8847_v44 = vadd.f32 %v8846_v29, %v8538_v9  ;;  %v8744_v16 = vadd.f32 %v8743_v51, %v7887_v36 }
 0xea9   : > { %v8950_v32 = vadd.f32 %v8949_v59, %v8540_v42  ;;  %v8642_v50 = vrot.slane %v8641_v14, 2 }
 0xeaa   : > { %v8848_v37 = vrot.slane %v8847_v44, 2  ;;  %v8745_v18 = vrot.slane %v8744_v16, 2 }
 0xeab   : > { %v8951_v60 = vrot.slane %v8950_v32, 2  ;;  %v8643_v54 = vadd.f32 %v8642_v50, %v8641_v14 }
 0xeac   : > { %v8849_v22 = vadd.f32 %v8848_v37, %v8847_v44  ;;  %v8746_v10 = vadd.f32 %v8745_v18, %v8744_v16 }
 0xead   : > { %v8952_v6 = vadd.f32 %v8951_v60, %v8950_v32  ;;  %v8644_v40 = vrot.slane %v8643_v54, 1 }
 0xeae   : > { %v8850_v47 = vrot.slane %v8849_v22, 1  ;;  %v8747_v55 = vrot.slane %v8746_v10, 1 }
 0xeaf   : > { %v8953_v8 = vrot.slane %v8952_v6, 1  ;;  %v8645_v34 = vadd.f32 %v8644_v40, %v8643_v54 }
 0xeb0   : > { %v8851_v11 = vadd.f32 %v8850_v47, %v8849_v22  ;;  %v8748_v61 = vadd.f32 %v8747_v55, %v8746_v10 }
 0xeb1   : > { %v8954_v0 = vadd.f32 %v8953_v8, %v8952_v6  ;;  %v8955_v23 = vadd.f32 %v8645_v34, %v14585_v41  ;;  %v448_v41 = vld [vmem:[%s15076_s4] sm:$0x1] }
 0xeb2   : > { %v8957_v7 = vadd.f32 %v8851_v11, %v14588_v62  ;;  %v8956_v45 = vadd.f32 %v8748_v61, %v14591_v48 }
 0xeb3   : > { %v8958_v52 = vadd.f32 %v8954_v0, %v14594_v12  ;;  %v8959_v56 = vmul.f32 0.00031887754, %v8955_v23 }
 0xeb4   : > { %v8960_v3 = vmul.f32 0.00031887754, %v8956_v45  ;;  %v8961_v13 = vmul.f32 0.00031887754, %v8957_v7 }
 0xeb5   : > { %v8962_v24 = vmul.f32 0.00031887754, %v8958_v52 }
 0xeb6   : > { %9027 = vmatprep.mubr.f32.mxu0 %v8960_v3 }
 0xeb7   : > { %9097 = vmatprep.mubr.f32.mxu1 %v8962_v24  ;;  %9028 = vmatmul.mubr.f32.vlgmr.msra.gmra.mrb[204].mxu0 %v8959_v56 }
 0xeb8   : > { %9098 = vmatmul.mubr.f32.vlgmr.msra.gmra.mrb[204].mxu1 %v8961_v13 }
 0xf8a   : > { %v9412_v19 = vpop.f32.mrb[204].mxu0 }
 0xf8b   : > { %v9447_v5 = vpop.f32.mrb[204].mxu1  ;;  %v9413_v62 = vpop.f32.mrb[205].mxu0 }
 0xf8c   : > { %v9448_v48 = vpop.f32.mrb[205].mxu1  ;;  %v9414_v12 = vadd.f32 %v9413_v62, %v9412_v19 }
 0xf8d   : > { %v9449_v27 = vadd.f32 %v9448_v48, %v9447_v5 }
 0xf8e   : > { %v9030_v30 = vadd.f32 %v9414_v12, %v448_v41 }
 0xf90   : > { %v9100_v38 = vadd.f32 %v9449_v27, %v9030_v30 }
 0xf92   : > { %9103 = vst [vmem:[%s216_s23] sm:$0x1] %v9100_v38 }
 0xf93   : > { %11389 = shalt.err (!%p11386_p3)
}
 0xf94   : > { %s11390_s14 = scalar_lea.hbm %s15030_s8, 16  ;;  %s11394_s13 = scalar_lea.hbm %s15077_s5, 32 }
 0xf95   : > { %p11391_p4 = scmp.ne.s32.totalorder %s15030_s8, %s11390_s14  ;;  %p11395_p9 = scmp.lt.u32.totalorder %s15030_s8, %s15077_s5 }
 0xf96   : > { %p11396_p10 = scmp.lt.u32.totalorder %s11394_s13, %s11390_s14  ;;  %p11398_p12 = scmp.lt.u32.totalorder %s11390_s14, %s15030_s8 }
 0xf97   : > { %p11392_p7 = pnand %p11391_p4, %p11511_p5 }
 0xf98   : > { %p11397_p11 = por %p11396_p10, %p11395_p9 }
 0xf99   : > { %p11393_p8 = pneg %p11392_p7 }
 0xf9a   : > { %p11399_p13 = por %p11398_p12, %p11397_p11 }
 0xf9c   : > { %p11400_p0 = pnand %p11399_p13, %p11393_p8 }
 0xf9e   : > { %11403 = shalt.err (!%p11400_p0)
}
 0xf9f   : > { %11335 = dma.vmem_to_hbm [thread:$0]  (%p11511_p5), %s15032_s30, 16, %s15030_s8, %s9105_s9  }
 0xfa0 PF: > { %p11341_p1 = scmp.ge.s32.totalorder %s11438_s21, 2  ;;  %s9129_s26 = sand.u32 1, %s11426_s18  }
 0xfa1   : > { %s9130_s23 = scalar_lea.sflag [#allocation3], %s9129_s26 }
 0xfa2   : > { %p11338_p2 = pnand %p11341_p1, %p11515_p6 }
 0xfa4   : > { %11421 = dma.done.wait (!%p11338_p2), %s9130_s23, 16  }
 0xfa5   : > { %11423 = vsyncadd (!%p11338_p2), %s9130_s23, 4294967280  ;;  %p15_p3 = scmp.ge.s32.totalorder %s11498_s24, 4   ;;  %s16136_s18 = smov %s11430_s19 }
 0xfa6   : > { %s16137_s19 = smov %s11434_s20  ;;  %s16138_s20 = smov %s11509_s27 }
 0xfa7   : > { %s16139_s21 = smov %s11498_s24  ;;  %17 = sbr.rel (!%p15_p3) target bundleno = 3 (0x3), region = 75 }
 0xfae   :  { %9134 = vsyncpa [#allocation3], 1 }
 0xfaf   :  { %9136 = vsyncpa [#allocation3 + $0x1], 1 }

</bundles_post_ra>
